<compile_context>
chip_gen: v6e
topology: v6e:2x2x1
jax: 0.10.0
libtpu: 0.0.40
codegen_flags: <defaults>
</compile_context>

<pallas_src>
import jax
import jax.numpy as jnp
from jax.experimental import pallas as pl
from jax.experimental.pallas import tpu as pltpu

H_FEATS = 32
NUM_HEADS = 2                      # module references a global num_heads; fixed here
D_HID = H_FEATS * NUM_HEADS        # 64  (node feature width == W1 output width)

LANES = 128                        # packed scores per output row
TM_MAX = 2048                      # max edges per grid step


def _round_up(x, m):
    return ((x + m - 1) // m) * m


def _choose_tile(e):
    """Edges per grid step: multiple of 128; once E > 1024 use >=2 blocks (v7x
    megacore) with TM a multiple of 1024 so the packed-output block
    (TM//128, 128) stays sublane-aligned (rows multiple of 8)."""
    ep = _round_up(max(e, 1), LANES)
    if ep <= 1024:
        return ep                              # single tile; out block == full array
    return min(TM_MAX, _round_up(ep // 2, 1024))


# ---------------------------------------------------------------------------
# Fused kernel.  Per 128-edge chunk:
#   onehot_src/dst : (Nnp, 128) bf16   (edges on lanes)
#   h1             : relu(Gs @ onehot_src + Gd @ onehot_dst + b1)   (Dp, 128) f32
#   score          : sigmoid(sum_d h1[d, :] * w2[d] + b2)           (1, 128)
# and the 128 scores are stored lane-dense into one output row.
# ---------------------------------------------------------------------------
def _edge_mlp_kernel(idx_ref, gs_ref, gd_ref, b1_ref, w2_ref, b2_ref, o_ref):
    # idx_ref : (2, TM)    int32  row 0 = src, row 1 = dst   (streamed per tile)
    # gs_ref  : (Dp, Nnp)  bf16   (h @ W1[:d]).T             (VMEM-resident)
    # gd_ref  : (Dp, Nnp)  bf16   (h @ W1[d:]).T             (VMEM-resident)
    # b1_ref  : (Dp, 1)    f32
    # w2_ref  : (Dp, 1)    f32
    # b2_ref  : (1, 1)     f32
    # o_ref   : (TM//128, 128) f32  lane-packed sigmoid scores
    nnp = gs_ref.shape[1]
    tmb = o_ref.shape[0]

    gs = gs_ref[...]
    gd = gd_ref[...]
    b1 = b1_ref[...]
    w2 = w2_ref[...]
    b2 = b2_ref[...]
    node_ids = jax.lax.broadcasted_iota(jnp.int32, (nnp, LANES), 0)

    for c in range(tmb):                       # static unroll: 128 edges per chunk
        lo = c * LANES
        src_c = idx_ref[0:1, lo:lo + LANES]    # (1, 128) int32
        dst_c = idx_ref[1:2, lo:lo + LANES]
        # One-hot gather matrices (node id along sublanes, edge along lanes).
        oh_s = jnp.where(node_ids == src_c, 1.0, 0.0).astype(jnp.bfloat16)
        oh_d = jnp.where(node_ids == dst_c, 1.0, 0.0).astype(jnp.bfloat16)
        # Layer 1 (gather + concat + Linear folded): h1[:, e] = Gs[:, src[e]] + Gd[:, dst[e]] + b1
        h1 = (jnp.dot(gs, oh_s, preferred_element_type=jnp.float32)
              + jnp.dot(gd, oh_d, preferred_element_type=jnp.float32)
              + b1)
        h1 = jnp.maximum(h1, 0.0)              # ReLU, (Dp, 128) f32
        # Layer 2: f32 VPU multiply + sublane reduce (no zero-padded MXU dot);
        # b2 + sigmoid applied only to the 128 real scores of this chunk.
        z = jnp.sum(h1 * w2, axis=0, keepdims=True) + b2          # (1, 128)
        o_ref[c:c + 1, :] = pl.reciprocal(1.0 + jnp.exp(-z), approx=True)


def mlp_predictor_forward(params, h, src, dst):
    """Pallas equivalent of MLPPredictor.forward(g, h) -> per-edge scores [E]."""
    n_nodes, d_feat = h.shape
    d_out = params["W1"].shape[1]
    e = src.shape[0]

    dp = _round_up(d_out, 128)
    nnp = _round_up(n_nodes, LANES)
    tm = _choose_tile(e)
    ep = _round_up(e, tm)
    tmb = tm // LANES

    # Per-NODE half-layer-1 tables, computed once (per node, not per edge).
    gs = (h @ params["W1"][:d_feat, :]).T                # (d_out, n_nodes) f32
    gd = (h @ params["W1"][d_feat:, :]).T
    gs_p = jnp.pad(gs, ((0, dp - d_out), (0, nnp - n_nodes))).astype(jnp.bfloat16)
    gd_p = jnp.pad(gd, ((0, dp - d_out), (0, nnp - n_nodes))).astype(jnp.bfloat16)
    b1_p = jnp.pad(params["b1"].reshape(-1, 1).astype(jnp.float32),
                   ((0, dp - d_out), (0, 0)))
    w2_p = jnp.pad(params["W2"].astype(jnp.float32), ((0, dp - d_out), (0, 0)))
    b2_p = params["b2"].reshape(1, 1).astype(jnp.float32)

    # Only per-edge HBM traffic: (src,dst) indices in, packed scores out.
    # Padded edge slots point at node 0; their scores are sliced off below.
    idx = jnp.pad(jnp.stack([src, dst], axis=0).astype(jnp.int32),
                  ((0, 0), (0, ep - e)))                 # (2, Ep)

    # VMEM residency: node tables cost 2*dp*nnp*2 B (~64 KiB here); fine within
    # v5e's 16 MiB / v7x's 32 MiB default scoped VMEM up to ~16K nodes.
    # TODO(synk): for node tables too large for VMEM, fall back to a manual
    # double-buffered DMA gather (memory_space=pl.ANY + pltpu.make_async_copy).
    out = pl.pallas_call(
        _edge_mlp_kernel,
        out_shape=jax.ShapeDtypeStruct((ep // LANES, LANES), jnp.float32),
        grid=(ep // tm,),
        in_specs=[
            pl.BlockSpec((2, tm), lambda i: (0, i)),      # indices (streamed)
            pl.BlockSpec((dp, nnp), lambda i: (0, 0)),    # Gs (resident)
            pl.BlockSpec((dp, nnp), lambda i: (0, 0)),    # Gd (resident)
            pl.BlockSpec((dp, 1), lambda i: (0, 0)),      # b1
            pl.BlockSpec((dp, 1), lambda i: (0, 0)),      # w2
            pl.BlockSpec((1, 1), lambda i: (0, 0)),       # b2
        ],
        out_specs=pl.BlockSpec((tmb, LANES), lambda i: (i, 0)),
        compiler_params=pltpu.CompilerParams(
            dimension_semantics=("parallel",),
            vmem_limit_bytes=32 * 1024 * 1024),
    )(idx, gs_p, gd_p, b1_p, w2_p, b2_p)

    return out.reshape(-1)[:e]                            # squeeze(1)


# ---------------------------------------------------------------------------
# Parameter init (weights stored pre-transposed as [in_features, out_features])
# ---------------------------------------------------------------------------
def init_params(key, h_feats=H_FEATS, num_heads=NUM_HEADS):
    d_hid = h_feats * num_heads
    d_in = 2 * d_hid
    k1, k2, k3, k4 = jax.random.split(key, 4)
    s1 = 1.0 / jnp.sqrt(d_in)
    s2 = 1.0 / jnp.sqrt(d_hid)
    return {
        "W1": jax.random.uniform(k1, (d_in, d_hid), jnp.float32, -s1, s1),
        "b1": jax.random.uniform(k2, (d_hid,), jnp.float32, -s1, s1),
        "W2": jax.random.uniform(k3, (d_hid, 1), jnp.float32, -s2, s2),
        "b2": jax.random.uniform(k4, (1,), jnp.float32, -s2, s2),
    }


if __name__ == "__main__":
    key = jax.random.PRNGKey(0)
    k_h, k_src, k_dst, k_p = jax.random.split(key, 4)

    # 2000 edges -> TM=1024, two "parallel" grid blocks (v7x megacore) and a
    # non-multiple edge count to exercise the padding / slice path.
    n_nodes, n_edges = 64, 2000
    h = jax.random.normal(k_h, (n_nodes, D_HID), jnp.float32)      # node features
    src = jax.random.randint(k_src, (n_edges,), 0, n_nodes)        # edge endpoints
    dst = jax.random.randint(k_dst, (n_edges,), 0, n_nodes)
    params = init_params(k_p)

    scores = jax.block_until_ready(mlp_predictor_forward(params, h, src, dst))
    assert scores.shape == (n_edges,) and scores.dtype == jnp.float32

    # Pure-JAX fp32 reference (loose tolerance: node tables are bf16 in VMEM,
    # sigmoid uses the approx EUP reciprocal).
    x_ref = jnp.concatenate([h[src], h[dst]], axis=1)
    ref = jax.nn.sigmoid(
        jnp.maximum(x_ref @ params["W1"] + params["b1"], 0.0) @ params["W2"]
        + params["b2"])[:, 0]
    assert float(jnp.max(jnp.abs(scores - ref))) < 2e-2

    print("KERNEL_OK")
</pallas_src>

<mosaic_0001>
module attributes {stable_mosaic.version = 11 : i64} {
  func.func @_edge_mlp_kernel(%arg0: i32, %arg1: memref<2x1024xi32, #tpu.memory_space<vmem>>, %arg2: memref<128x128xbf16, #tpu.memory_space<vmem>>, %arg3: memref<128x128xbf16, #tpu.memory_space<vmem>>, %arg4: memref<128x1xf32, #tpu.memory_space<vmem>>, %arg5: memref<128x1xf32, #tpu.memory_space<vmem>>, %arg6: memref<1x1xf32, #tpu.memory_space<vmem>>, %arg7: memref<8x128xf32, #tpu.memory_space<vmem>>) attributes {dimension_semantics = [#tpu.dimension_semantics<parallel>], iteration_bounds = array<i64: 2>, scalar_prefetch = 0 : i64, scratch_operands = 0 : i64, tpu.core_type = #tpu.core_type<tc>, window_params = [{transform_indices = @transform_0, window_bounds = array<i64: 2, 1024>}, {pipeline_mode = #tpu.pipeline_mode<synchronous>, transform_indices = @transform_1, window_bounds = array<i64: 128, 128>}, {pipeline_mode = #tpu.pipeline_mode<synchronous>, transform_indices = @transform_2, window_bounds = array<i64: 128, 128>}, {pipeline_mode = #tpu.pipeline_mode<synchronous>, transform_indices = @transform_3, window_bounds = array<i64: 128, 1>}, {pipeline_mode = #tpu.pipeline_mode<synchronous>, transform_indices = @transform_4, window_bounds = array<i64: 128, 1>}, {pipeline_mode = #tpu.pipeline_mode<synchronous>, transform_indices = @transform_5, window_bounds = array<i64: 1, 1>}, {transform_indices = @transform_6, window_bounds = array<i64: 8, 128>}]} {
    %c0 = arith.constant 0 : index
    %c0_0 = arith.constant 0 : index
    %0 = vector.load %arg2[%c0, %c0_0] : memref<128x128xbf16, #tpu.memory_space<vmem>>, vector<128x128xbf16>
    %c0_1 = arith.constant 0 : index
    %c0_2 = arith.constant 0 : index
    %1 = vector.load %arg3[%c0_1, %c0_2] : memref<128x128xbf16, #tpu.memory_space<vmem>>, vector<128x128xbf16>
    %c0_3 = arith.constant 0 : index
    %c0_4 = arith.constant 0 : index
    %2 = vector.load %arg4[%c0_3, %c0_4] : memref<128x1xf32, #tpu.memory_space<vmem>>, vector<128x1xf32>
    %c0_5 = arith.constant 0 : index
    %c0_6 = arith.constant 0 : index
    %3 = vector.load %arg5[%c0_5, %c0_6] : memref<128x1xf32, #tpu.memory_space<vmem>>, vector<128x1xf32>
    %c0_7 = arith.constant 0 : index
    %c0_8 = arith.constant 0 : index
    %4 = vector.load %arg6[%c0_7, %c0_8] : memref<1x1xf32, #tpu.memory_space<vmem>>, vector<1x1xf32>
    %5 = tpu.iota {dimensions = array<i32: 0>} : vector<128x128xi32>
    %c0_9 = arith.constant 0 : index
    %c0_10 = arith.constant 0 : index
    %6 = vector.load %arg1[%c0_9, %c0_10] : memref<2x1024xi32, #tpu.memory_space<vmem>>, vector<1x128xi32>
    %c1 = arith.constant 1 : index
    %c0_11 = arith.constant 0 : index
    %7 = vector.load %arg1[%c1, %c0_11] : memref<2x1024xi32, #tpu.memory_space<vmem>>, vector<1x128xi32>
    %8 = vector.broadcast %6 : vector<1x128xi32> to vector<128x128xi32>
    %9 = arith.cmpi eq, %5, %8 : vector<128x128xi32>
    %cst = arith.constant 1.000000e+00 : f32
    %cst_12 = arith.constant 0.000000e+00 : f32
    %10 = vector.broadcast %cst : f32 to vector<128x128xf32>
    %11 = vector.broadcast %cst_12 : f32 to vector<128x128xf32>
    %12 = arith.select %9, %10, %11 : vector<128x128xi1>, vector<128x128xf32>
    %13 = arith.truncf %12 : vector<128x128xf32> to vector<128x128xbf16>
    %14 = vector.broadcast %7 : vector<1x128xi32> to vector<128x128xi32>
    %15 = arith.cmpi eq, %5, %14 : vector<128x128xi32>
    %cst_13 = arith.constant 1.000000e+00 : f32
    %cst_14 = arith.constant 0.000000e+00 : f32
    %16 = vector.broadcast %cst_13 : f32 to vector<128x128xf32>
    %17 = vector.broadcast %cst_14 : f32 to vector<128x128xf32>
    %18 = arith.select %15, %16, %17 : vector<128x128xi1>, vector<128x128xf32>
    %19 = arith.truncf %18 : vector<128x128xf32> to vector<128x128xbf16>
    %cst_15 = arith.constant dense<0.000000e+00> : vector<128x128xf32>
    %20 = tpu.matmul %0, %13, %cst_15 {dimension_numbers = #tpu.dot_dimension_numbers<[1], [0], [0], [1], [0, 0, 1, 1], [], []>} : vector<128x128xbf16>, vector<128x128xbf16>, vector<128x128xf32> -> vector<128x128xf32>
    %cst_16 = arith.constant dense<0.000000e+00> : vector<128x128xf32>
    %21 = tpu.matmul %1, %19, %cst_16 {dimension_numbers = #tpu.dot_dimension_numbers<[1], [0], [0], [1], [0, 0, 1, 1], [], []>} : vector<128x128xbf16>, vector<128x128xbf16>, vector<128x128xf32> -> vector<128x128xf32>
    %22 = arith.addf %20, %21 : vector<128x128xf32>
    %23 = vector.broadcast %2 : vector<128x1xf32> to vector<128x128xf32>
    %24 = arith.addf %22, %23 : vector<128x128xf32>
    %cst_17 = arith.constant 0.000000e+00 : f32
    %25 = vector.broadcast %cst_17 : f32 to vector<128x128xf32>
    %26 = arith.maximumf %24, %25 : vector<128x128xf32>
    %27 = vector.broadcast %3 : vector<128x1xf32> to vector<128x128xf32>
    %28 = arith.mulf %26, %27 : vector<128x128xf32>
    %cst_18 = arith.constant dense<0.000000e+00> : vector<128xf32>
    %29 = vector.multi_reduction <add>, %28, %cst_18 [0] : vector<128x128xf32> to vector<128xf32>
    %30 = vector.shape_cast %29 : vector<128xf32> to vector<1x128xf32>
    %31 = vector.broadcast %4 : vector<1x1xf32> to vector<1x128xf32>
    %32 = arith.addf %30, %31 : vector<1x128xf32>
    %cst_19 = arith.constant 0.000000e+00 : f32
    %33 = vector.broadcast %cst_19 : f32 to vector<1x128xf32>
    %34 = arith.subf %33, %32 : vector<1x128xf32>
    %35 = math.exp %34 : vector<1x128xf32>
    %cst_20 = arith.constant 1.000000e+00 : f32
    %36 = vector.broadcast %cst_20 : f32 to vector<1x128xf32>
    %37 = arith.addf %36, %35 : vector<1x128xf32>
    %38 = tpu.reciprocal %37 {approx = true} : vector<1x128xf32> -> vector<1x128xf32>
    %c0_21 = arith.constant 0 : index
    %c0_22 = arith.constant 0 : index
    %39 = vector.load %arg7[%c0_21, %c0_22] : memref<8x128xf32, #tpu.memory_space<vmem>>, vector<1x128xf32>
    tpu.vector_store %arg7[%c0_21, %c0_22], %38 {strides = array<i32>} : memref<8x128xf32, #tpu.memory_space<vmem>>, vector<1x128xf32>,
    %c0_23 = arith.constant 0 : index
    %c128 = arith.constant 128 : index
    %40 = vector.load %arg1[%c0_23, %c128] : memref<2x1024xi32, #tpu.memory_space<vmem>>, vector<1x128xi32>
    %c1_24 = arith.constant 1 : index
    %c128_25 = arith.constant 128 : index
    %41 = vector.load %arg1[%c1_24, %c128_25] : memref<2x1024xi32, #tpu.memory_space<vmem>>, vector<1x128xi32>
    %42 = vector.broadcast %40 : vector<1x128xi32> to vector<128x128xi32>
    %43 = arith.cmpi eq, %5, %42 : vector<128x128xi32>
    %cst_26 = arith.constant 1.000000e+00 : f32
    %cst_27 = arith.constant 0.000000e+00 : f32
    %44 = vector.broadcast %cst_26 : f32 to vector<128x128xf32>
    %45 = vector.broadcast %cst_27 : f32 to vector<128x128xf32>
    %46 = arith.select %43, %44, %45 : vector<128x128xi1>, vector<128x128xf32>
    %47 = arith.truncf %46 : vector<128x128xf32> to vector<128x128xbf16>
    %48 = vector.broadcast %41 : vector<1x128xi32> to vector<128x128xi32>
    %49 = arith.cmpi eq, %5, %48 : vector<128x128xi32>
    %cst_28 = arith.constant 1.000000e+00 : f32
    %cst_29 = arith.constant 0.000000e+00 : f32
    %50 = vector.broadcast %cst_28 : f32 to vector<128x128xf32>
    %51 = vector.broadcast %cst_29 : f32 to vector<128x128xf32>
    %52 = arith.select %49, %50, %51 : vector<128x128xi1>, vector<128x128xf32>
    %53 = arith.truncf %52 : vector<128x128xf32> to vector<128x128xbf16>
    %cst_30 = arith.constant dense<0.000000e+00> : vector<128x128xf32>
    %54 = tpu.matmul %0, %47, %cst_30 {dimension_numbers = #tpu.dot_dimension_numbers<[1], [0], [0], [1], [0, 0, 1, 1], [], []>} : vector<128x128xbf16>, vector<128x128xbf16>, vector<128x128xf32> -> vector<128x128xf32>
    %cst_31 = arith.constant dense<0.000000e+00> : vector<128x128xf32>
    %55 = tpu.matmul %1, %53, %cst_31 {dimension_numbers = #tpu.dot_dimension_numbers<[1], [0], [0], [1], [0, 0, 1, 1], [], []>} : vector<128x128xbf16>, vector<128x128xbf16>, vector<128x128xf32> -> vector<128x128xf32>
    %56 = arith.addf %54, %55 : vector<128x128xf32>
    %57 = vector.broadcast %2 : vector<128x1xf32> to vector<128x128xf32>
    %58 = arith.addf %56, %57 : vector<128x128xf32>
    %cst_32 = arith.constant 0.000000e+00 : f32
    %59 = vector.broadcast %cst_32 : f32 to vector<128x128xf32>
    %60 = arith.maximumf %58, %59 : vector<128x128xf32>
    %61 = vector.broadcast %3 : vector<128x1xf32> to vector<128x128xf32>
    %62 = arith.mulf %60, %61 : vector<128x128xf32>
    %cst_33 = arith.constant dense<0.000000e+00> : vector<128xf32>
    %63 = vector.multi_reduction <add>, %62, %cst_33 [0] : vector<128x128xf32> to vector<128xf32>
    %64 = vector.shape_cast %63 : vector<128xf32> to vector<1x128xf32>
    %65 = vector.broadcast %4 : vector<1x1xf32> to vector<1x128xf32>
    %66 = arith.addf %64, %65 : vector<1x128xf32>
    %cst_34 = arith.constant 0.000000e+00 : f32
    %67 = vector.broadcast %cst_34 : f32 to vector<1x128xf32>
    %68 = arith.subf %67, %66 : vector<1x128xf32>
    %69 = math.exp %68 : vector<1x128xf32>
    %cst_35 = arith.constant 1.000000e+00 : f32
    %70 = vector.broadcast %cst_35 : f32 to vector<1x128xf32>
    %71 = arith.addf %70, %69 : vector<1x128xf32>
    %72 = tpu.reciprocal %71 {approx = true} : vector<1x128xf32> -> vector<1x128xf32>
    %c1_36 = arith.constant 1 : index
    %c0_37 = arith.constant 0 : index
    %73 = vector.load %arg7[%c1_36, %c0_37] : memref<8x128xf32, #tpu.memory_space<vmem>>, vector<1x128xf32>
    tpu.vector_store %arg7[%c1_36, %c0_37], %72 {strides = array<i32>} : memref<8x128xf32, #tpu.memory_space<vmem>>, vector<1x128xf32>,
    %c0_38 = arith.constant 0 : index
    %c256 = arith.constant 256 : index
    %74 = vector.load %arg1[%c0_38, %c256] : memref<2x1024xi32, #tpu.memory_space<vmem>>, vector<1x128xi32>
    %c1_39 = arith.constant 1 : index
    %c256_40 = arith.constant 256 : index
    %75 = vector.load %arg1[%c1_39, %c256_40] : memref<2x1024xi32, #tpu.memory_space<vmem>>, vector<1x128xi32>
    %76 = vector.broadcast %74 : vector<1x128xi32> to vector<128x128xi32>
    %77 = arith.cmpi eq, %5, %76 : vector<128x128xi32>
    %cst_41 = arith.constant 1.000000e+00 : f32
    %cst_42 = arith.constant 0.000000e+00 : f32
    %78 = vector.broadcast %cst_41 : f32 to vector<128x128xf32>
    %79 = vector.broadcast %cst_42 : f32 to vector<128x128xf32>
    %80 = arith.select %77, %78, %79 : vector<128x128xi1>, vector<128x128xf32>
    %81 = arith.truncf %80 : vector<128x128xf32> to vector<128x128xbf16>
    %82 = vector.broadcast %75 : vector<1x128xi32> to vector<128x128xi32>
    %83 = arith.cmpi eq, %5, %82 : vector<128x128xi32>
    %cst_43 = arith.constant 1.000000e+00 : f32
    %cst_44 = arith.constant 0.000000e+00 : f32
    %84 = vector.broadcast %cst_43 : f32 to vector<128x128xf32>
    %85 = vector.broadcast %cst_44 : f32 to vector<128x128xf32>
    %86 = arith.select %83, %84, %85 : vector<128x128xi1>, vector<128x128xf32>
    %87 = arith.truncf %86 : vector<128x128xf32> to vector<128x128xbf16>
    %cst_45 = arith.constant dense<0.000000e+00> : vector<128x128xf32>
    %88 = tpu.matmul %0, %81, %cst_45 {dimension_numbers = #tpu.dot_dimension_numbers<[1], [0], [0], [1], [0, 0, 1, 1], [], []>} : vector<128x128xbf16>, vector<128x128xbf16>, vector<128x128xf32> -> vector<128x128xf32>
    %cst_46 = arith.constant dense<0.000000e+00> : vector<128x128xf32>
    %89 = tpu.matmul %1, %87, %cst_46 {dimension_numbers = #tpu.dot_dimension_numbers<[1], [0], [0], [1], [0, 0, 1, 1], [], []>} : vector<128x128xbf16>, vector<128x128xbf16>, vector<128x128xf32> -> vector<128x128xf32>
    %90 = arith.addf %88, %89 : vector<128x128xf32>
    %91 = vector.broadcast %2 : vector<128x1xf32> to vector<128x128xf32>
    %92 = arith.addf %90, %91 : vector<128x128xf32>
    %cst_47 = arith.constant 0.000000e+00 : f32
    %93 = vector.broadcast %cst_47 : f32 to vector<128x128xf32>
    %94 = arith.maximumf %92, %93 : vector<128x128xf32>
    %95 = vector.broadcast %3 : vector<128x1xf32> to vector<128x128xf32>
    %96 = arith.mulf %94, %95 : vector<128x128xf32>
    %cst_48 = arith.constant dense<0.000000e+00> : vector<128xf32>
    %97 = vector.multi_reduction <add>, %96, %cst_48 [0] : vector<128x128xf32> to vector<128xf32>
    %98 = vector.shape_cast %97 : vector<128xf32> to vector<1x128xf32>
    %99 = vector.broadcast %4 : vector<1x1xf32> to vector<1x128xf32>
    %100 = arith.addf %98, %99 : vector<1x128xf32>
    %cst_49 = arith.constant 0.000000e+00 : f32
    %101 = vector.broadcast %cst_49 : f32 to vector<1x128xf32>
    %102 = arith.subf %101, %100 : vector<1x128xf32>
    %103 = math.exp %102 : vector<1x128xf32>
    %cst_50 = arith.constant 1.000000e+00 : f32
    %104 = vector.broadcast %cst_50 : f32 to vector<1x128xf32>
    %105 = arith.addf %104, %103 : vector<1x128xf32>
    %106 = tpu.reciprocal %105 {approx = true} : vector<1x128xf32> -> vector<1x128xf32>
    %c2 = arith.constant 2 : index
    %c0_51 = arith.constant 0 : index
    %107 = vector.load %arg7[%c2, %c0_51] : memref<8x128xf32, #tpu.memory_space<vmem>>, vector<1x128xf32>
    tpu.vector_store %arg7[%c2, %c0_51], %106 {strides = array<i32>} : memref<8x128xf32, #tpu.memory_space<vmem>>, vector<1x128xf32>,
    %c0_52 = arith.constant 0 : index
    %c384 = arith.constant 384 : index
    %108 = vector.load %arg1[%c0_52, %c384] : memref<2x1024xi32, #tpu.memory_space<vmem>>, vector<1x128xi32>
    %c1_53 = arith.constant 1 : index
    %c384_54 = arith.constant 384 : index
    %109 = vector.load %arg1[%c1_53, %c384_54] : memref<2x1024xi32, #tpu.memory_space<vmem>>, vector<1x128xi32>
    %110 = vector.broadcast %108 : vector<1x128xi32> to vector<128x128xi32>
    %111 = arith.cmpi eq, %5, %110 : vector<128x128xi32>
    %cst_55 = arith.constant 1.000000e+00 : f32
    %cst_56 = arith.constant 0.000000e+00 : f32
    %112 = vector.broadcast %cst_55 : f32 to vector<128x128xf32>
    %113 = vector.broadcast %cst_56 : f32 to vector<128x128xf32>
    %114 = arith.select %111, %112, %113 : vector<128x128xi1>, vector<128x128xf32>
    %115 = arith.truncf %114 : vector<128x128xf32> to vector<128x128xbf16>
    %116 = vector.broadcast %109 : vector<1x128xi32> to vector<128x128xi32>
    %117 = arith.cmpi eq, %5, %116 : vector<128x128xi32>
    %cst_57 = arith.constant 1.000000e+00 : f32
    %cst_58 = arith.constant 0.000000e+00 : f32
    %118 = vector.broadcast %cst_57 : f32 to vector<128x128xf32>
    %119 = vector.broadcast %cst_58 : f32 to vector<128x128xf32>
    %120 = arith.select %117, %118, %119 : vector<128x128xi1>, vector<128x128xf32>
    %121 = arith.truncf %120 : vector<128x128xf32> to vector<128x128xbf16>
    %cst_59 = arith.constant dense<0.000000e+00> : vector<128x128xf32>
    %122 = tpu.matmul %0, %115, %cst_59 {dimension_numbers = #tpu.dot_dimension_numbers<[1], [0], [0], [1], [0, 0, 1, 1], [], []>} : vector<128x128xbf16>, vector<128x128xbf16>, vector<128x128xf32> -> vector<128x128xf32>
    %cst_60 = arith.constant dense<0.000000e+00> : vector<128x128xf32>
    %123 = tpu.matmul %1, %121, %cst_60 {dimension_numbers = #tpu.dot_dimension_numbers<[1], [0], [0], [1], [0, 0, 1, 1], [], []>} : vector<128x128xbf16>, vector<128x128xbf16>, vector<128x128xf32> -> vector<128x128xf32>
    %124 = arith.addf %122, %123 : vector<128x128xf32>
    %125 = vector.broadcast %2 : vector<128x1xf32> to vector<128x128xf32>
    %126 = arith.addf %124, %125 : vector<128x128xf32>
    %cst_61 = arith.constant 0.000000e+00 : f32
    %127 = vector.broadcast %cst_61 : f32 to vector<128x128xf32>
    %128 = arith.maximumf %126, %127 : vector<128x128xf32>
    %129 = vector.broadcast %3 : vector<128x1xf32> to vector<128x128xf32>
    %130 = arith.mulf %128, %129 : vector<128x128xf32>
    %cst_62 = arith.constant dense<0.000000e+00> : vector<128xf32>
    %131 = vector.multi_reduction <add>, %130, %cst_62 [0] : vector<128x128xf32> to vector<128xf32>
    %132 = vector.shape_cast %131 : vector<128xf32> to vector<1x128xf32>
    %133 = vector.broadcast %4 : vector<1x1xf32> to vector<1x128xf32>
    %134 = arith.addf %132, %133 : vector<1x128xf32>
    %cst_63 = arith.constant 0.000000e+00 : f32
    %135 = vector.broadcast %cst_63 : f32 to vector<1x128xf32>
    %136 = arith.subf %135, %134 : vector<1x128xf32>
    %137 = math.exp %136 : vector<1x128xf32>
    %cst_64 = arith.constant 1.000000e+00 : f32
    %138 = vector.broadcast %cst_64 : f32 to vector<1x128xf32>
    %139 = arith.addf %138, %137 : vector<1x128xf32>
    %140 = tpu.reciprocal %139 {approx = true} : vector<1x128xf32> -> vector<1x128xf32>
    %c3 = arith.constant 3 : index
    %c0_65 = arith.constant 0 : index
    %141 = vector.load %arg7[%c3, %c0_65] : memref<8x128xf32, #tpu.memory_space<vmem>>, vector<1x128xf32>
    tpu.vector_store %arg7[%c3, %c0_65], %140 {strides = array<i32>} : memref<8x128xf32, #tpu.memory_space<vmem>>, vector<1x128xf32>,
    %c0_66 = arith.constant 0 : index
    %c512 = arith.constant 512 : index
    %142 = vector.load %arg1[%c0_66, %c512] : memref<2x1024xi32, #tpu.memory_space<vmem>>, vector<1x128xi32>
    %c1_67 = arith.constant 1 : index
    %c512_68 = arith.constant 512 : index
    %143 = vector.load %arg1[%c1_67, %c512_68] : memref<2x1024xi32, #tpu.memory_space<vmem>>, vector<1x128xi32>
    %144 = vector.broadcast %142 : vector<1x128xi32> to vector<128x128xi32>
    %145 = arith.cmpi eq, %5, %144 : vector<128x128xi32>
    %cst_69 = arith.constant 1.000000e+00 : f32
    %cst_70 = arith.constant 0.000000e+00 : f32
    %146 = vector.broadcast %cst_69 : f32 to vector<128x128xf32>
    %147 = vector.broadcast %cst_70 : f32 to vector<128x128xf32>
    %148 = arith.select %145, %146, %147 : vector<128x128xi1>, vector<128x128xf32>
    %149 = arith.truncf %148 : vector<128x128xf32> to vector<128x128xbf16>
    %150 = vector.broadcast %143 : vector<1x128xi32> to vector<128x128xi32>
    %151 = arith.cmpi eq, %5, %150 : vector<128x128xi32>
    %cst_71 = arith.constant 1.000000e+00 : f32
    %cst_72 = arith.constant 0.000000e+00 : f32
    %152 = vector.broadcast %cst_71 : f32 to vector<128x128xf32>
    %153 = vector.broadcast %cst_72 : f32 to vector<128x128xf32>
    %154 = arith.select %151, %152, %153 : vector<128x128xi1>, vector<128x128xf32>
    %155 = arith.truncf %154 : vector<128x128xf32> to vector<128x128xbf16>
    %cst_73 = arith.constant dense<0.000000e+00> : vector<128x128xf32>
    %156 = tpu.matmul %0, %149, %cst_73 {dimension_numbers = #tpu.dot_dimension_numbers<[1], [0], [0], [1], [0, 0, 1, 1], [], []>} : vector<128x128xbf16>, vector<128x128xbf16>, vector<128x128xf32> -> vector<128x128xf32>
    %cst_74 = arith.constant dense<0.000000e+00> : vector<128x128xf32>
    %157 = tpu.matmul %1, %155, %cst_74 {dimension_numbers = #tpu.dot_dimension_numbers<[1], [0], [0], [1], [0, 0, 1, 1], [], []>} : vector<128x128xbf16>, vector<128x128xbf16>, vector<128x128xf32> -> vector<128x128xf32>
    %158 = arith.addf %156, %157 : vector<128x128xf32>
    %159 = vector.broadcast %2 : vector<128x1xf32> to vector<128x128xf32>
    %160 = arith.addf %158, %159 : vector<128x128xf32>
    %cst_75 = arith.constant 0.000000e+00 : f32
    %161 = vector.broadcast %cst_75 : f32 to vector<128x128xf32>
    %162 = arith.maximumf %160, %161 : vector<128x128xf32>
    %163 = vector.broadcast %3 : vector<128x1xf32> to vector<128x128xf32>
    %164 = arith.mulf %162, %163 : vector<128x128xf32>
    %cst_76 = arith.constant dense<0.000000e+00> : vector<128xf32>
    %165 = vector.multi_reduction <add>, %164, %cst_76 [0] : vector<128x128xf32> to vector<128xf32>
    %166 = vector.shape_cast %165 : vector<128xf32> to vector<1x128xf32>
    %167 = vector.broadcast %4 : vector<1x1xf32> to vector<1x128xf32>
    %168 = arith.addf %166, %167 : vector<1x128xf32>
    %cst_77 = arith.constant 0.000000e+00 : f32
    %169 = vector.broadcast %cst_77 : f32 to vector<1x128xf32>
    %170 = arith.subf %169, %168 : vector<1x128xf32>
    %171 = math.exp %170 : vector<1x128xf32>
    %cst_78 = arith.constant 1.000000e+00 : f32
    %172 = vector.broadcast %cst_78 : f32 to vector<1x128xf32>
    %173 = arith.addf %172, %171 : vector<1x128xf32>
    %174 = tpu.reciprocal %173 {approx = true} : vector<1x128xf32> -> vector<1x128xf32>
    %c4 = arith.constant 4 : index
    %c0_79 = arith.constant 0 : index
    %175 = vector.load %arg7[%c4, %c0_79] : memref<8x128xf32, #tpu.memory_space<vmem>>, vector<1x128xf32>
    tpu.vector_store %arg7[%c4, %c0_79], %174 {strides = array<i32>} : memref<8x128xf32, #tpu.memory_space<vmem>>, vector<1x128xf32>,
    %c0_80 = arith.constant 0 : index
    %c640 = arith.constant 640 : index
    %176 = vector.load %arg1[%c0_80, %c640] : memref<2x1024xi32, #tpu.memory_space<vmem>>, vector<1x128xi32>
    %c1_81 = arith.constant 1 : index
    %c640_82 = arith.constant 640 : index
    %177 = vector.load %arg1[%c1_81, %c640_82] : memref<2x1024xi32, #tpu.memory_space<vmem>>, vector<1x128xi32>
    %178 = vector.broadcast %176 : vector<1x128xi32> to vector<128x128xi32>
    %179 = arith.cmpi eq, %5, %178 : vector<128x128xi32>
    %cst_83 = arith.constant 1.000000e+00 : f32
    %cst_84 = arith.constant 0.000000e+00 : f32
    %180 = vector.broadcast %cst_83 : f32 to vector<128x128xf32>
    %181 = vector.broadcast %cst_84 : f32 to vector<128x128xf32>
    %182 = arith.select %179, %180, %181 : vector<128x128xi1>, vector<128x128xf32>
    %183 = arith.truncf %182 : vector<128x128xf32> to vector<128x128xbf16>
    %184 = vector.broadcast %177 : vector<1x128xi32> to vector<128x128xi32>
    %185 = arith.cmpi eq, %5, %184 : vector<128x128xi32>
    %cst_85 = arith.constant 1.000000e+00 : f32
    %cst_86 = arith.constant 0.000000e+00 : f32
    %186 = vector.broadcast %cst_85 : f32 to vector<128x128xf32>
    %187 = vector.broadcast %cst_86 : f32 to vector<128x128xf32>
    %188 = arith.select %185, %186, %187 : vector<128x128xi1>, vector<128x128xf32>
    %189 = arith.truncf %188 : vector<128x128xf32> to vector<128x128xbf16>
    %cst_87 = arith.constant dense<0.000000e+00> : vector<128x128xf32>
    %190 = tpu.matmul %0, %183, %cst_87 {dimension_numbers = #tpu.dot_dimension_numbers<[1], [0], [0], [1], [0, 0, 1, 1], [], []>} : vector<128x128xbf16>, vector<128x128xbf16>, vector<128x128xf32> -> vector<128x128xf32>
    %cst_88 = arith.constant dense<0.000000e+00> : vector<128x128xf32>
    %191 = tpu.matmul %1, %189, %cst_88 {dimension_numbers = #tpu.dot_dimension_numbers<[1], [0], [0], [1], [0, 0, 1, 1], [], []>} : vector<128x128xbf16>, vector<128x128xbf16>, vector<128x128xf32> -> vector<128x128xf32>
    %192 = arith.addf %190, %191 : vector<128x128xf32>
    %193 = vector.broadcast %2 : vector<128x1xf32> to vector<128x128xf32>
    %194 = arith.addf %192, %193 : vector<128x128xf32>
    %cst_89 = arith.constant 0.000000e+00 : f32
    %195 = vector.broadcast %cst_89 : f32 to vector<128x128xf32>
    %196 = arith.maximumf %194, %195 : vector<128x128xf32>
    %197 = vector.broadcast %3 : vector<128x1xf32> to vector<128x128xf32>
    %198 = arith.mulf %196, %197 : vector<128x128xf32>
    %cst_90 = arith.constant dense<0.000000e+00> : vector<128xf32>
    %199 = vector.multi_reduction <add>, %198, %cst_90 [0] : vector<128x128xf32> to vector<128xf32>
    %200 = vector.shape_cast %199 : vector<128xf32> to vector<1x128xf32>
    %201 = vector.broadcast %4 : vector<1x1xf32> to vector<1x128xf32>
    %202 = arith.addf %200, %201 : vector<1x128xf32>
    %cst_91 = arith.constant 0.000000e+00 : f32
    %203 = vector.broadcast %cst_91 : f32 to vector<1x128xf32>
    %204 = arith.subf %203, %202 : vector<1x128xf32>
    %205 = math.exp %204 : vector<1x128xf32>
    %cst_92 = arith.constant 1.000000e+00 : f32
    %206 = vector.broadcast %cst_92 : f32 to vector<1x128xf32>
    %207 = arith.addf %206, %205 : vector<1x128xf32>
    %208 = tpu.reciprocal %207 {approx = true} : vector<1x128xf32> -> vector<1x128xf32>
    %c5 = arith.constant 5 : index
    %c0_93 = arith.constant 0 : index
    %209 = vector.load %arg7[%c5, %c0_93] : memref<8x128xf32, #tpu.memory_space<vmem>>, vector<1x128xf32>
    tpu.vector_store %arg7[%c5, %c0_93], %208 {strides = array<i32>} : memref<8x128xf32, #tpu.memory_space<vmem>>, vector<1x128xf32>,
    %c0_94 = arith.constant 0 : index
    %c768 = arith.constant 768 : index
    %210 = vector.load %arg1[%c0_94, %c768] : memref<2x1024xi32, #tpu.memory_space<vmem>>, vector<1x128xi32>
    %c1_95 = arith.constant 1 : index
    %c768_96 = arith.constant 768 : index
    %211 = vector.load %arg1[%c1_95, %c768_96] : memref<2x1024xi32, #tpu.memory_space<vmem>>, vector<1x128xi32>
    %212 = vector.broadcast %210 : vector<1x128xi32> to vector<128x128xi32>
    %213 = arith.cmpi eq, %5, %212 : vector<128x128xi32>
    %cst_97 = arith.constant 1.000000e+00 : f32
    %cst_98 = arith.constant 0.000000e+00 : f32
    %214 = vector.broadcast %cst_97 : f32 to vector<128x128xf32>
    %215 = vector.broadcast %cst_98 : f32 to vector<128x128xf32>
    %216 = arith.select %213, %214, %215 : vector<128x128xi1>, vector<128x128xf32>
    %217 = arith.truncf %216 : vector<128x128xf32> to vector<128x128xbf16>
    %218 = vector.broadcast %211 : vector<1x128xi32> to vector<128x128xi32>
    %219 = arith.cmpi eq, %5, %218 : vector<128x128xi32>
    %cst_99 = arith.constant 1.000000e+00 : f32
    %cst_100 = arith.constant 0.000000e+00 : f32
    %220 = vector.broadcast %cst_99 : f32 to vector<128x128xf32>
    %221 = vector.broadcast %cst_100 : f32 to vector<128x128xf32>
    %222 = arith.select %219, %220, %221 : vector<128x128xi1>, vector<128x128xf32>
    %223 = arith.truncf %222 : vector<128x128xf32> to vector<128x128xbf16>
    %cst_101 = arith.constant dense<0.000000e+00> : vector<128x128xf32>
    %224 = tpu.matmul %0, %217, %cst_101 {dimension_numbers = #tpu.dot_dimension_numbers<[1], [0], [0], [1], [0, 0, 1, 1], [], []>} : vector<128x128xbf16>, vector<128x128xbf16>, vector<128x128xf32> -> vector<128x128xf32>
    %cst_102 = arith.constant dense<0.000000e+00> : vector<128x128xf32>
    %225 = tpu.matmul %1, %223, %cst_102 {dimension_numbers = #tpu.dot_dimension_numbers<[1], [0], [0], [1], [0, 0, 1, 1], [], []>} : vector<128x128xbf16>, vector<128x128xbf16>, vector<128x128xf32> -> vector<128x128xf32>
    %226 = arith.addf %224, %225 : vector<128x128xf32>
    %227 = vector.broadcast %2 : vector<128x1xf32> to vector<128x128xf32>
    %228 = arith.addf %226, %227 : vector<128x128xf32>
    %cst_103 = arith.constant 0.000000e+00 : f32
    %229 = vector.broadcast %cst_103 : f32 to vector<128x128xf32>
    %230 = arith.maximumf %228, %229 : vector<128x128xf32>
    %231 = vector.broadcast %3 : vector<128x1xf32> to vector<128x128xf32>
    %232 = arith.mulf %230, %231 : vector<128x128xf32>
    %cst_104 = arith.constant dense<0.000000e+00> : vector<128xf32>
    %233 = vector.multi_reduction <add>, %232, %cst_104 [0] : vector<128x128xf32> to vector<128xf32>
    %234 = vector.shape_cast %233 : vector<128xf32> to vector<1x128xf32>
    %235 = vector.broadcast %4 : vector<1x1xf32> to vector<1x128xf32>
    %236 = arith.addf %234, %235 : vector<1x128xf32>
    %cst_105 = arith.constant 0.000000e+00 : f32
    %237 = vector.broadcast %cst_105 : f32 to vector<1x128xf32>
    %238 = arith.subf %237, %236 : vector<1x128xf32>
    %239 = math.exp %238 : vector<1x128xf32>
    %cst_106 = arith.constant 1.000000e+00 : f32
    %240 = vector.broadcast %cst_106 : f32 to vector<1x128xf32>
    %241 = arith.addf %240, %239 : vector<1x128xf32>
    %242 = tpu.reciprocal %241 {approx = true} : vector<1x128xf32> -> vector<1x128xf32>
    %c6 = arith.constant 6 : index
    %c0_107 = arith.constant 0 : index
    %243 = vector.load %arg7[%c6, %c0_107] : memref<8x128xf32, #tpu.memory_space<vmem>>, vector<1x128xf32>
    tpu.vector_store %arg7[%c6, %c0_107], %242 {strides = array<i32>} : memref<8x128xf32, #tpu.memory_space<vmem>>, vector<1x128xf32>,
    %c0_108 = arith.constant 0 : index
    %c896 = arith.constant 896 : index
    %244 = vector.load %arg1[%c0_108, %c896] : memref<2x1024xi32, #tpu.memory_space<vmem>>, vector<1x128xi32>
    %c1_109 = arith.constant 1 : index
    %c896_110 = arith.constant 896 : index
    %245 = vector.load %arg1[%c1_109, %c896_110] : memref<2x1024xi32, #tpu.memory_space<vmem>>, vector<1x128xi32>
    %246 = vector.broadcast %244 : vector<1x128xi32> to vector<128x128xi32>
    %247 = arith.cmpi eq, %5, %246 : vector<128x128xi32>
    %cst_111 = arith.constant 1.000000e+00 : f32
    %cst_112 = arith.constant 0.000000e+00 : f32
    %248 = vector.broadcast %cst_111 : f32 to vector<128x128xf32>
    %249 = vector.broadcast %cst_112 : f32 to vector<128x128xf32>
    %250 = arith.select %247, %248, %249 : vector<128x128xi1>, vector<128x128xf32>
    %251 = arith.truncf %250 : vector<128x128xf32> to vector<128x128xbf16>
    %252 = vector.broadcast %245 : vector<1x128xi32> to vector<128x128xi32>
    %253 = arith.cmpi eq, %5, %252 : vector<128x128xi32>
    %cst_113 = arith.constant 1.000000e+00 : f32
    %cst_114 = arith.constant 0.000000e+00 : f32
    %254 = vector.broadcast %cst_113 : f32 to vector<128x128xf32>
    %255 = vector.broadcast %cst_114 : f32 to vector<128x128xf32>
    %256 = arith.select %253, %254, %255 : vector<128x128xi1>, vector<128x128xf32>
    %257 = arith.truncf %256 : vector<128x128xf32> to vector<128x128xbf16>
    %cst_115 = arith.constant dense<0.000000e+00> : vector<128x128xf32>
    %258 = tpu.matmul %0, %251, %cst_115 {dimension_numbers = #tpu.dot_dimension_numbers<[1], [0], [0], [1], [0, 0, 1, 1], [], []>} : vector<128x128xbf16>, vector<128x128xbf16>, vector<128x128xf32> -> vector<128x128xf32>
    %cst_116 = arith.constant dense<0.000000e+00> : vector<128x128xf32>
    %259 = tpu.matmul %1, %257, %cst_116 {dimension_numbers = #tpu.dot_dimension_numbers<[1], [0], [0], [1], [0, 0, 1, 1], [], []>} : vector<128x128xbf16>, vector<128x128xbf16>, vector<128x128xf32> -> vector<128x128xf32>
    %260 = arith.addf %258, %259 : vector<128x128xf32>
    %261 = vector.broadcast %2 : vector<128x1xf32> to vector<128x128xf32>
    %262 = arith.addf %260, %261 : vector<128x128xf32>
    %cst_117 = arith.constant 0.000000e+00 : f32
    %263 = vector.broadcast %cst_117 : f32 to vector<128x128xf32>
    %264 = arith.maximumf %262, %263 : vector<128x128xf32>
    %265 = vector.broadcast %3 : vector<128x1xf32> to vector<128x128xf32>
    %266 = arith.mulf %264, %265 : vector<128x128xf32>
    %cst_118 = arith.constant dense<0.000000e+00> : vector<128xf32>
    %267 = vector.multi_reduction <add>, %266, %cst_118 [0] : vector<128x128xf32> to vector<128xf32>
    %268 = vector.shape_cast %267 : vector<128xf32> to vector<1x128xf32>
    %269 = vector.broadcast %4 : vector<1x1xf32> to vector<1x128xf32>
    %270 = arith.addf %268, %269 : vector<1x128xf32>
    %cst_119 = arith.constant 0.000000e+00 : f32
    %271 = vector.broadcast %cst_119 : f32 to vector<1x128xf32>
    %272 = arith.subf %271, %270 : vector<1x128xf32>
    %273 = math.exp %272 : vector<1x128xf32>
    %cst_120 = arith.constant 1.000000e+00 : f32
    %274 = vector.broadcast %cst_120 : f32 to vector<1x128xf32>
    %275 = arith.addf %274, %273 : vector<1x128xf32>
    %276 = tpu.reciprocal %275 {approx = true} : vector<1x128xf32> -> vector<1x128xf32>
    %c7 = arith.constant 7 : index
    %c0_121 = arith.constant 0 : index
    %277 = vector.load %arg7[%c7, %c0_121] : memref<8x128xf32, #tpu.memory_space<vmem>>, vector<1x128xf32>
    tpu.vector_store %arg7[%c7, %c0_121], %276 {strides = array<i32>} : memref<8x128xf32, #tpu.memory_space<vmem>>, vector<1x128xf32>,
    return
  }
  func.func @transform_0(%arg0: i32) -> (i32, i32) {
    %c0_i32 = arith.constant 0 : i32
    %c0_i32_0 = arith.constant 0 : i32
    return %c0_i32, %arg0 : i32, i32
  }
  func.func @transform_1(%arg0: i32) -> (i32, i32) {
    %c0_i32 = arith.constant 0 : i32
    %c0_i32_0 = arith.constant 0 : i32
    %c0_i32_1 = arith.constant 0 : i32
    return %c0_i32, %c0_i32_0 : i32, i32
  }
  func.func @transform_2(%arg0: i32) -> (i32, i32) {
    %c0_i32 = arith.constant 0 : i32
    %c0_i32_0 = arith.constant 0 : i32
    %c0_i32_1 = arith.constant 0 : i32
    return %c0_i32, %c0_i32_0 : i32, i32
  }
  func.func @transform_3(%arg0: i32) -> (i32, i32) {
    %c0_i32 = arith.constant 0 : i32
    %c0_i32_0 = arith.constant 0 : i32
    %c0_i32_1 = arith.constant 0 : i32
    return %c0_i32, %c0_i32_0 : i32, i32
  }
  func.func @transform_4(%arg0: i32) -> (i32, i32) {
    %c0_i32 = arith.constant 0 : i32
    %c0_i32_0 = arith.constant 0 : i32
    %c0_i32_1 = arith.constant 0 : i32
    return %c0_i32, %c0_i32_0 : i32, i32
  }
  func.func @transform_5(%arg0: i32) -> (i32, i32) {
    %c0_i32 = arith.constant 0 : i32
    %c0_i32_0 = arith.constant 0 : i32
    %c0_i32_1 = arith.constant 0 : i32
    return %c0_i32, %c0_i32_0 : i32, i32
  }
  func.func @transform_6(%arg0: i32) -> (i32, i32) {
    %c0_i32 = arith.constant 0 : i32
    %c0_i32_0 = arith.constant 0 : i32
    return %arg0, %c0_i32 : i32, i32
  }
}

</mosaic_0001>

<bundles_post_ra>
// kernel: tpu_custom_call.1
= control target key start
LH: loop header
LB: loop body
LE: loop exit
PB: predicated region body
PF: predicated region fallthrough
CT: control target
= control target key end

     0   :  { %s7568_s0 = inlined_call_operand.vmem [shape: s32[2,2048], index: 0, kind: input, shape index: {}]   ;;  %s7569_s1 = inlined_call_operand.vmem [shape: bf16[128,128], index: 1, kind: input, shape index: {}]   ;;  %s7570_s2 = inlined_call_operand.vmem [shape: bf16[128,128], index: 2, kind: input, shape index: {}]   ;;  %s7571_s3 = inlined_call_operand.vmem [shape: f32[128,1], index: 3, kind: input, shape index: {}]   ;;  %s7572_s4 = inlined_call_operand.vmem [shape: f32[128,1], index: 4, kind: input, shape index: {}]   ;;  %s7573_s5 = inlined_call_operand.<no memory space> [shape: f32[1,1], index: 5, kind: input, shape index: {}]   ;;  %s7574_s6 = inlined_call_operand.hbm [shape: f32[16,128], index: 6, kind: output, shape index: {}]  }
   0x1   :  { %v11_v0 = vstv %s7573_s5 }
   0x2   :  { %12 = vst [vmem:[#allocation2] sm:$0x1] %v11_v0 }
   0x3   :  { %13 = vsyncpa [#allocation4], 0 }
   0x4   :  { %15 = vsyncpa [#allocation4 + $0x1], 0  ;;  %s4832_s23 = smov 0   ;;  %s4834_s24 = smov 0  }
   0x5   :  { %s4836_s25 = smov 0   ;;  %s4838_s26 = smov 0  }
   0x6 LB: > { %s4853_s5 = sadd.s32 4294967295, %s4789_s26   ;;  %s3555_s27 = sadd.s32 4294967294, %s4789_s26   ;;  %s4789_s26 = sphi %s4838_s26, %s7843_s26   ;;  %s4785_s25 = sphi %s4836_s25, %s7842_s25   ;;  %s4781_s24 = sphi %s4834_s24, %s7841_s24   ;;  %s4777_s23 = sphi %s4832_s23, %s7840_s23  }
   0x7   : > { %s4857_s28 = sadd.s32 1, %s4789_s26   ;;  %s159_s29 = sadd.s32 1, %s4785_s25 }
   0x8   : > { %s156_s30 = ssub.s32 %s4789_s26, %s4857_s28  ;;  %p169_p0 = scmp.ne.s32.totalorder %s4785_s25, %s4781_s24 }
   0x9   : > { %p157_p1 = scmp.eq.s32.totalorder %s156_s30, 0  ;;  %p170_p2 = scmp.eq.s32.totalorder %s4853_s5, 1 }
   0xa   : > { %p175_p3 = scmp.ne.s32.totalorder %s4781_s24, %s4777_s23  ;;  %p176_p4 = scmp.eq.s32.totalorder %s3555_s27, 1 }
   0xb   : > { %s4868_s7 = scalar_select %p157_p1, %s4785_s25, %s159_s29  }
   0xc   : > { %p4870_p5 = por %p170_p2, %p169_p0  ;;  %p4874_p6 = por %p176_p4, %p175_p3 }
   0xd   : > { %p3558_p7 = scmp.ge.s32.totalorder %s4789_s26, 1  ;;  %p218_p8 = scmp.lt.s32.totalorder %s4789_s26, 3 }
   0xf   : > { %p219_p9 = pnand %p3558_p7, %p218_p8 }
  0x11   : > { %222 = sbr.rel (%p219_p9) target bundleno = 586 (0x24a), region = 44 }
  0x16   : > { %s3560_s10 = sshll.u32 %s4853_s5, 3  ;;  %v320_v1 = vlaneseq  ;;  %v4884_v2 = vld [vmem:[%s7570_s2] sm:$0xff]   ;;  %v7575_v13 = vmov 1.0|1.0   ;;  %v4792_v20 = vmov 0   ;;  %v289_v33 = vld [vmem:[%s7571_s3 + $0x10] sm:$0xff] }
  0x17   : > { %p249_p10 = scmp.lt.s32.totalorder %s3560_s10, 15  ;;  %v4889_v3 = vld [vmem:[%s7569_s1] sm:$0xff]   ;;  %4126 = vmatprep.mubr.bf16.mxu0 %v4884_v2  ;;  %4663 = vset.pattern.permute.xlu0 %v4792_v20  ;;  %v288_v36 = vld [vmem:[%s7571_s3 + $0x8] sm:$0xff]  ;;  %v290_v38 = vld [vmem:[%s7571_s3 + $0x18] sm:$0xff]  ;;  %s245_s22 = sand.u32 1, %s4781_s24  }
  0x18   : > { %v4891_v4 = vshrl.u32 %v320_v1, 7  ;;  %4158 = vmatprep.mubr.bf16.mxu1 %v4889_v3  ;;  %4664 = vset.pattern.permute.xlu1 %v4792_v20  ;;  %v287_v32 = vld [vmem:[%s7571_s3] sm:$0xff]  ;;  %v304_v43 = vld [vmem:[%s7572_s4 + $0x8] sm:$0xff]  ;;  %v305_v49 = vld [vmem:[%s7572_s4 + $0x10] sm:$0xff]  ;;  %s3559_s27 = sshll.u32 %s245_s22, 3  ;;  %s3851_s30 = sshll.u32 %s4853_s5, 7 }
  0x19   : > { %s7845_s10 = smov (!%p249_p10, %s3560_s10), 15  ;;  %719 = vperm.xlu0 %4663, %v287_v32   ;;  %729 = vperm.xlu1 %4664, %v289_v33   ;;  %v303_v42 = vld [vmem:[%s7572_s4] sm:$0xff]  ;;  %v5182_v45 = vld [vmem:[%s7570_s2 + $0x8] sm:$0xff]   ;;  %v5226_v51 = vld [vmem:[%s7570_s2 + $0x10] sm:$0xff]   ;;  %s7341_s29 = scalar_lea.vmem [#allocation3], %s3559_s27 }
  0x1a   : > { %v4896_v5 = vadd.s32 112, %v4891_v4  ;;  %v4899_v6 = vadd.s32 120, %v4891_v4  ;;  %s3561_s15 = sshll.u32 %s7845_s10, 1  ;;  %v4902_v7 = vadd.s32 96, %v4891_v4  ;;  %v4905_v8 = vadd.s32 104, %v4891_v4  ;;  %v291_v47 = vld [vmem:[%s7571_s3 + $0x20] sm:$0xff]  ;;  %s7530_s13 = scalar_lea.hbm %s7574_s6, %s3851_s30 }
  0x1b   : > { %s4910_s18 = scalar_lea.vmem %s7568_s0, %s3561_s15  ;;  %v4913_v9 = vadd.s32 80, %v4891_v4  ;;  %v4916_v10 = vadd.s32 88, %v4891_v4  ;;  %v4946_v14 = vadd.s32 64, %v4891_v4  ;;  %v4949_v15 = vadd.s32 72, %v4891_v4  ;;  %v5201_v48 = vld [vmem:[%s7569_s1 + $0x8] sm:$0xff]   ;;  %v5236_v53 = vld [vmem:[%s7569_s1 + $0x10] sm:$0xff]  }
  0x1c   : > { %v4919_v11 = vld [vmem:[%s4910_s18 + $0x1] ss:$0 sm:$0xff]  ;;  %v4922_v12 = vld [vmem:[%s4910_s18] ss:$0 sm:$0xff]  ;;  %v4979_v18 = vadd.s32 48, %v4891_v4  ;;  %v4982_v19 = vadd.s32 56, %v4891_v4 }
  0x1d   : > { %vm401_vm0 = vcmp.eq.s32.totalorder %v4896_v5, %v4919_v11  ;;  %vm402_vm1 = vcmp.eq.s32.totalorder %v4899_v6, %v4919_v11  ;;  %vm357_vm2 = vcmp.eq.s32.totalorder %v4896_v5, %v4922_v12  ;;  %vm358_vm3 = vcmp.eq.s32.totalorder %v4899_v6, %v4922_v12  ;;  %v5124_v37 = vld [vmem:[%s4910_s18 + $0x3] ss:$0 sm:$0xff]  ;;  %v5136_v39 = vld [vmem:[%s4910_s18 + $0x2] ss:$0 sm:$0xff]  ;;  %724 = vperm.xlu0 %4663, %v288_v36   ;;  %v292_v54 = vld [vmem:[%s7571_s3 + $0x28] sm:$0xff]  ;;  %s3496_s10 = sshll.u32 %s7341_s29, 4  ;;  %s3497_s10 = int_to_ptr.vmem [resolvable:$true] %s3496_s10 }
  0x1e   : > { %vm3572_vm4 = vmpackc.low %vm402_vm1, %vm401_vm0  ;;  %vm399_vm5 = vcmp.eq.s32.totalorder %v4902_v7, %v4919_v11  ;;  %vm400_vm6 = vcmp.eq.s32.totalorder %v4905_v8, %v4919_v11  ;;  %vm355_vm7 = vcmp.eq.s32.totalorder %v4902_v7, %v4922_v12  ;;  %vm356_vm8 = vcmp.eq.s32.totalorder %v4905_v8, %v4922_v12  ;;  %734 = vperm.xlu1 %4664, %v290_v38   ;;  %v306_v55 = vld [vmem:[%s7572_s4 + $0x18] sm:$0xff]  ;;  %v293_v60 = vld [vmem:[%s7571_s3 + $0x30] sm:$0xff]  ;;  %s3483_s14 = scalar_lea.sflag [#allocation4], %s245_s22  ;;  %s4729_s15 = scalar_lea.vmem %s3497_s10, 128 }
  0x1f   : > { %4110 = vmatprep.subr.msk.bf16.mxu0 %vm3572_vm4, %v7575_v13  ;;  %vm3596_vm9 = vmpackc.low %vm358_vm3, %vm357_vm2  ;;  %vm397_vm10 = vcmp.eq.s32.totalorder %v4913_v9, %v4919_v11  ;;  %vm398_vm11 = vcmp.eq.s32.totalorder %v4916_v10, %v4919_v11  ;;  %vm353_vm13 = vcmp.eq.s32.totalorder %v4913_v9, %v4922_v12  ;;  %vm354_vm14 = vcmp.eq.s32.totalorder %v4916_v10, %v4922_v12  ;;  %v5274_v57 = vld [vmem:[%s7570_s2 + $0x18] sm:$0xff]   ;;  %v5315_v62 = vld [vmem:[%s7570_s2 + $0x20] sm:$0xff]   ;;  %p4730_p11 = scmp.ne.s32.totalorder %s3497_s10, %s4729_s15  ;;  %s4793_s16 = smov [#allocation3]  }
  0x20   : > { %4142 = vmatprep.subr.msk.bf16.mxu1 %vm3596_vm9, %v7575_v13  ;;  %4111 = vmatpush3.bf16.msk.msra.mxu0 %vm3572_vm4, %v7575_v13  ;;  %vm3574_vm12 = vmpackc.low %vm400_vm6, %vm399_vm5  ;;  %vm395_vm2 = vcmp.eq.s32.totalorder %v4946_v14, %v4919_v11  ;;  %vm396_vm3 = vcmp.eq.s32.totalorder %v4949_v15, %v4919_v11  ;;  %vm351_vm4 = vcmp.eq.s32.totalorder %v4946_v14, %v4922_v12  ;;  %v5009_v23 = vadd.s32 32, %v4891_v4  ;;  %v5290_v59 = vld [vmem:[%s7569_s1 + $0x18] sm:$0xff]   ;;  %v5325_v0 = vld [vmem:[%s7569_s1 + $0x20] sm:$0xff]   ;;  %s4733_s17 = sshll.u32 %s4793_s16, 4  ;;  %s4734_s17 = int_to_ptr.vmem [resolvable:$false] %s4733_s17 }
  0x21   : > { %4143 = vmatpush3.bf16.msk.msra.mxu1 %vm3596_vm9, %v7575_v13  ;;  %4112 = vmatprep.subr.msk.bf16.mxu0 %vm3574_vm12, %v7575_v13  ;;  %vm3598_vm15 = vmpackc.low %vm356_vm8, %vm355_vm7  ;;  %vm352_vm5 = vcmp.eq.s32.totalorder %v4949_v15, %v4922_v12  ;;  %vm393_vm8 = vcmp.eq.s32.totalorder %v4979_v18, %v4919_v11  ;;  %vm394_vm9 = vcmp.eq.s32.totalorder %v4982_v19, %v4919_v11  ;;  %v5012_v24 = vadd.s32 40, %v4891_v4  ;;  %v307_v1 = vld [vmem:[%s7572_s4 + $0x20] sm:$0xff]  ;;  %v5363_v16 = vld [vmem:[%s7570_s2 + $0x28] sm:$0xff]   ;;  %p4731_p12 = pnand %p4730_p11, %p4870_p5  ;;  %s4735_s5 = scalar_lea.vmem %s4734_s17, 256 }
  0x22   : > { %4144 = vmatprep.subr.msk.bf16.mxu1 %vm3598_vm15, %v7575_v13  ;;  %vm4966_vm0 = vmpackc.low %vm398_vm11, %vm397_vm10  ;;  %vm349_vm10 = vcmp.eq.s32.totalorder %v4979_v18, %v4922_v12  ;;  %vm350_vm11 = vcmp.eq.s32.totalorder %v4982_v19, %v4922_v12  ;;  %v5043_v27 = vadd.s32 16, %v4891_v4  ;;  %v5046_v28 = vadd.s32 24, %v4891_v4  ;;  %831 = vperm.xlu0 %4663, %v303_v42   ;;  %v5379_v20 = vld [vmem:[%s7569_s1 + $0x28] sm:$0xff]   ;;  %v5404_v25 = vld [vmem:[%s7570_s2 + $0x30] sm:$0xff]   ;;  %p4736_p0 = scmp.lt.s32.totalorder %s3497_s10, %s4734_s17  ;;  %p4737_p1 = scmp.lt.s32.totalorder %s4735_s5, %s4729_s15 }
  0x23   : > { %vm4970_vm1 = vmpackc.low %vm354_vm14, %vm353_vm13  ;;  %vm391_vm14 = vcmp.eq.s32.totalorder %v5009_v23, %v4919_v11  ;;  %v5077_v31 = vadd.s32 8, %v4891_v4  ;;  %836 = vperm.xlu1 %4664, %v304_v43   ;;  %v308_v21 = vld [vmem:[%s7572_s4 + $0x28] sm:$0xff]  ;;  %v5414_v29 = vld [vmem:[%s7569_s1 + $0x30] sm:$0xff]   ;;  %p4732_p13 = pneg %p4731_p12 }
  0x24   : > { %4113 = vmatpush3.bf16.msk.msra.mxu0 %vm3574_vm12, %v7575_v13  ;;  %vm4996_vm6 = vmpackc.low %vm396_vm3, %vm395_vm2  ;;  %v295_v30 = vld [vmem:[%s7571_s3 + $0x40] sm:$0xff]  ;;  %v309_v32 = vld [vmem:[%s7572_s4 + $0x30] sm:$0xff]  ;;  %p4738_p2 = por %p4737_p1, %p4736_p0 }
  0x25   : > { %4145 = vmatpush3.bf16.msk.msra.mxu1 %vm3598_vm15, %v7575_v13  ;;  %4114 = vmatprep.subr.msk.bf16.mxu0 %vm4966_vm0, %v7575_v13  ;;  %vm5000_vm7 = vmpackc.low %vm352_vm5, %vm351_vm4  ;;  %vm392_vm15 = vcmp.eq.s32.totalorder %v5012_v24, %v4919_v11  ;;  %vm389_vm4 = vcmp.eq.s32.totalorder %v5043_v27, %v4919_v11  ;;  %vm390_vm5 = vcmp.eq.s32.totalorder %v5046_v28, %v4919_v11  ;;  %v5452_v34 = vld [vmem:[%s7570_s2 + $0x38] sm:$0xff]   ;;  %v5475_v38 = vld [vmem:[%s4910_s18 + $0x5] ss:$0 sm:$0xff] }
  0x26   : > { %4146 = vmatprep.subr.msk.bf16.mxu1 %vm4970_vm1, %v7575_v13  ;;  %vm5030_vm12 = vmpackc.low %vm394_vm9, %vm393_vm8  ;;  %739 = vperm.xlu0 %4663, %v291_v47   ;;  %v5468_v36 = vld [vmem:[%s7569_s1 + $0x38] sm:$0xff]   ;;  %v5487_v40 = vld [vmem:[%s4910_s18 + $0x4] ss:$0 sm:$0xff]  ;;  %p4739_p3 = pnand %p4738_p2, %p4732_p13 }
  0x27   : > { %vm5034_vm13 = vmpackc.low %vm350_vm11, %vm349_vm10  ;;  %vm387_vm10 = vcmp.eq.s32.totalorder %v4891_v4, %v4919_v11  ;;  %vm388_vm11 = vcmp.eq.s32.totalorder %v5077_v31, %v4919_v11  ;;  %841 = vperm.xlu1 %4664, %v305_v49   ;;  %v294_v11 = vld [vmem:[%s7571_s3 + $0x38] sm:$0xff]  ;;  %v297_v43 = vld [vmem:[%s7571_s3 + $0x50] sm:$0xff] }
  0x28   : > { %4115 = vmatpush3.bf16.msk.msra.mxu0 %vm4966_vm0, %v7575_v13  ;;  %vm347_vm0 = vcmp.eq.s32.totalorder %v5009_v23, %v4922_v12  ;;  %vm5064_vm2 = vmpackc.low %vm392_vm15, %vm391_vm14  ;;  %v310_v42 = vld [vmem:[%s7572_s4 + $0x38] sm:$0xff]  ;;  %v311_v47 = vld [vmem:[%s7572_s4 + $0x40] sm:$0xff] }
  0x29   : > { %4147 = vmatpush3.bf16.msk.msra.mxu1 %vm4970_vm1, %v7575_v13  ;;  %4116 = vmatprep.subr.msk.bf16.mxu0 %vm4996_vm6, %v7575_v13  ;;  %vm348_vm1 = vcmp.eq.s32.totalorder %v5012_v24, %v4922_v12  ;;  %vm5101_vm8 = vmpackc.low %vm390_vm5, %vm389_vm4  ;;  %v298_v52 = vld [vmem:[%s7571_s3 + $0x58] sm:$0xff]  ;;  %v299_v58 = vld [vmem:[%s7571_s3 + $0x60] sm:$0xff] }
  0x2a   : > { %4148 = vmatprep.subr.msk.bf16.mxu1 %vm5000_vm7, %v7575_v13  ;;  %vm5068_vm3 = vmpackc.low %vm348_vm1, %vm347_vm0  ;;  %vm1026_vm0 = vcmp.eq.s32.totalorder %v4896_v5, %v5124_v37  ;;  %vm1027_vm1 = vcmp.eq.s32.totalorder %v4899_v6, %v5124_v37  ;;  %744 = vperm.xlu0 %4663, %v292_v54   ;;  %v312_v54 = vld [vmem:[%s7572_s4 + $0x48] sm:$0xff]  ;;  %v313_v63 = vld [vmem:[%s7572_s4 + $0x50] sm:$0xff] }
  0x2b   : > { %vm5141_vm14 = vmpackc.low %vm388_vm11, %vm387_vm10  ;;  %846 = vperm.xlu1 %4664, %v306_v55   ;;  %v314_v17 = vld [vmem:[%s7572_s4 + $0x58] sm:$0xff]  ;;  %v301_v26 = vld [vmem:[%s7571_s3 + $0x70] sm:$0xff] }
  0x2c   : > { %4117 = vmatpush3.bf16.msk.msra.mxu0 %vm4996_vm6, %v7575_v13  ;;  %vm345_vm6 = vcmp.eq.s32.totalorder %v5043_v27, %v4922_v12  ;;  %vm5175_vm4 = vmpackc.low %vm1027_vm1, %vm1026_vm0  ;;  %v5757_v35 = vld [vmem:[%s4910_s18 + $0x7] ss:$0 sm:$0xff]  ;;  %v316_v41 = vld [vmem:[%s7572_s4 + $0x68] sm:$0xff] }
  0x2d   : > { %4149 = vmatpush3.bf16.msk.msra.mxu1 %vm5000_vm7, %v7575_v13  ;;  %4118 = vmatprep.subr.msk.bf16.mxu0 %vm5030_vm12, %v7575_v13  ;;  %vm346_vm7 = vcmp.eq.s32.totalorder %v5046_v28, %v4922_v12  ;;  %v6280_v46 = vld [vmem:[%s4910_s18 + $0xa] ss:$0 sm:$0xff]  ;;  %v6698_v44 = vld [vmem:[%s7570_s2 + $0x18] sm:$0xff]   ;;  %v6746_v50 = vld [vmem:[%s7569_s1 + $0x20] sm:$0xff]  }
  0x2e   : > { %4150 = vmatprep.subr.msk.bf16.mxu1 %vm5034_vm13, %v7575_v13  ;;  %vm5105_vm9 = vmpackc.low %vm346_vm7, %vm345_vm6  ;;  %vm1024_vm6 = vcmp.eq.s32.totalorder %v4902_v7, %v5124_v37  ;;  %vm1025_vm7 = vcmp.eq.s32.totalorder %v4905_v8, %v5124_v37  ;;  %749 = vperm.xlu0 %4663, %v293_v60   ;;  %7787 = vst [vmem:[#allocation7_spill] sm:$0xff] %v6746_v50  ;;  %v6851_v60 = vld [vmem:[%s4910_s18 + $0xf] ss:$0 sm:$0xff]  ;;  %v6890_v22 = vld [vmem:[%s7569_s1 + $0x38] sm:$0xff]  }
  0x2f   : > { %vm5219_vm10 = vmpackc.low %vm1025_vm7, %vm1024_vm6  ;;  %851 = vperm.xlu1 %4664, %v307_v1   ;;  %v300_v1 = vld [vmem:[%s7571_s3 + $0x68] sm:$0xff] }
  0x30   : > { %4119 = vmatpush3.bf16.msk.msra.mxu0 %vm5030_vm12, %v7575_v13  ;;  %vm343_vm12 = vcmp.eq.s32.totalorder %v4891_v4, %v4922_v12 }
  0x31   : > { %4151 = vmatpush3.bf16.msk.msra.mxu1 %vm5034_vm13, %v7575_v13  ;;  %4120 = vmatprep.subr.msk.bf16.mxu0 %vm5064_vm2, %v7575_v13  ;;  %vm344_vm13 = vcmp.eq.s32.totalorder %v5077_v31, %v4922_v12 }
  0x32   : > { %4152 = vmatprep.subr.msk.bf16.mxu1 %vm5068_vm3, %v7575_v13  ;;  %vm5145_vm15 = vmpackc.low %vm344_vm13, %vm343_vm12  ;;  %vm1022_vm12 = vcmp.eq.s32.totalorder %v4913_v9, %v5124_v37  ;;  %vm1023_vm13 = vcmp.eq.s32.totalorder %v4916_v10, %v5124_v37  ;;  %754 = vperm.xlu0 %4663, %v294_v11   ;;  %v6024_v11 = vld [vmem:[%s4910_s18 + $0x8] ss:$0 sm:$0xff] }
  0x33   : > { %vm5266_vm0 = vmpackc.low %vm1023_vm13, %vm1022_vm12  ;;  %856 = vperm.xlu1 %4664, %v308_v21   ;;  %v6062_v21 = vld [vmem:[%s7570_s2] sm:$0xff]  }
  0x34   : > { %4121 = vmatpush3.bf16.msk.msra.mxu0 %vm5064_vm2, %v7575_v13  ;;  %vm982_vm2 = vcmp.eq.s32.totalorder %v4896_v5, %v5136_v39 }
  0x35   : > { %4153 = vmatpush3.bf16.msk.msra.mxu1 %vm5068_vm3, %v7575_v13  ;;  %4122 = vmatprep.subr.msk.bf16.mxu0 %vm5101_vm8, %v7575_v13  ;;  %vm983_vm3 = vcmp.eq.s32.totalorder %v4899_v6, %v5136_v39 }
  0x36   : > { %4154 = vmatprep.subr.msk.bf16.mxu1 %vm5105_vm9, %v7575_v13  ;;  %vm5184_vm5 = vmpackc.low %vm983_vm3, %vm982_vm2  ;;  %vm1020_vm2 = vcmp.eq.s32.totalorder %v4946_v14, %v5124_v37  ;;  %vm1021_vm3 = vcmp.eq.s32.totalorder %v4949_v15, %v5124_v37  ;;  %759 = vperm.xlu0 %4663, %v295_v30   ;;  %v315_v30 = vld [vmem:[%s7572_s4 + $0x60] sm:$0xff] }
  0x37   : > { %vm5308_vm6 = vmpackc.low %vm1021_vm3, %vm1020_vm2  ;;  %861 = vperm.xlu1 %4664, %v309_v32  }
  0x38   : > { %4123 = vmatpush3.bf16.msk.msra.mxu0 %vm5101_vm8, %v7575_v13  ;;  %vm980_vm8 = vcmp.eq.s32.totalorder %v4902_v7, %v5136_v39 }
  0x39   : > { %4155 = vmatpush3.bf16.msk.msra.mxu1 %vm5105_vm9, %v7575_v13  ;;  %4124 = vmatprep.subr.msk.bf16.mxu0 %vm5141_vm14, %v7575_v13  ;;  %vm981_vm9 = vcmp.eq.s32.totalorder %v4905_v8, %v5136_v39 }
  0x3a   : > { %4156 = vmatprep.subr.msk.bf16.mxu1 %vm5145_vm15, %v7575_v13  ;;  %vm5229_vm11 = vmpackc.low %vm981_vm9, %vm980_vm8  ;;  %vm1018_vm8 = vcmp.eq.s32.totalorder %v4979_v18, %v5124_v37  ;;  %vm1019_vm9 = vcmp.eq.s32.totalorder %v4982_v19, %v5124_v37 }
  0x3b   : > { %vm5355_vm12 = vmpackc.low %vm1019_vm9, %vm1018_vm8  ;;  %866 = vperm.xlu1 %4664, %v310_v42   ;;  %v317_v42 = vld [vmem:[%s7572_s4 + $0x70] sm:$0xff] }
  0x3c   : > { %4125 = vmatpush3.bf16.msk.msra.mxu0 %vm5141_vm14, %v7575_v13  ;;  %vm978_vm14 = vcmp.eq.s32.totalorder %v4913_v9, %v5136_v39 }
  0x3d   : > { %4157 = vmatpush3.bf16.msk.msra.mxu1 %vm5145_vm15, %v7575_v13  ;;  %4174 = vmatprep.subr.msk.bf16.mxu0 %vm5175_vm4, %v7575_v13  ;;  %vm979_vm15 = vcmp.eq.s32.totalorder %v4916_v10, %v5136_v39 }
  0x3e   : > { %4206 = vmatprep.subr.msk.bf16.mxu1 %vm5184_vm5, %v7575_v13  ;;  %vm5276_vm1 = vmpackc.low %vm979_vm15, %vm978_vm14  ;;  %vm1016_vm14 = vcmp.eq.s32.totalorder %v5009_v23, %v5124_v37  ;;  %vm1017_vm15 = vcmp.eq.s32.totalorder %v5012_v24, %v5124_v37 }
  0x3f   : > { %4127 = vmatmul.mubr.bf16.vlgmr.msra.gmra.mxu0 %v5182_v45  ;;  %vm5397_vm2 = vmpackc.low %vm1017_vm15, %vm1016_vm14  ;;  %871 = vperm.xlu1 %4664, %v311_v47   ;;  %v319_v47 = vld [vmem:[#allocation2] sm:$0x1] }
  0x40   : > { %4159 = vmatmul.mubr.bf16.vlgmr.msra.gmra.mxu1 %v5201_v48  ;;  %4175 = vmatpush3.bf16.msk.msra.mxu0 %vm5175_vm4, %v7575_v13  ;;  %vm976_vm4 = vcmp.eq.s32.totalorder %v4946_v14, %v5136_v39 }
  0x41   : > { %4207 = vmatpush3.bf16.msk.msra.mxu1 %vm5184_vm5, %v7575_v13  ;;  %4176 = vmatprep.subr.msk.bf16.mxu0 %vm5219_vm10, %v7575_v13  ;;  %vm977_vm5 = vcmp.eq.s32.totalorder %v4949_v15, %v5136_v39 }
  0x42   : > { %4208 = vmatprep.subr.msk.bf16.mxu1 %vm5229_vm11, %v7575_v13  ;;  %4130 = vmatprep.mubr.bf16.mxu0 %v5226_v51  ;;  %vm5318_vm7 = vmpackc.low %vm977_vm5, %vm976_vm4  ;;  %vm1014_vm4 = vcmp.eq.s32.totalorder %v5043_v27, %v5124_v37  ;;  %vm1015_vm5 = vcmp.eq.s32.totalorder %v5046_v28, %v5124_v37 }
  0x43   : > { %4162 = vmatprep.mubr.bf16.mxu1 %v5236_v53  ;;  %vm5444_vm8 = vmpackc.low %vm1015_vm5, %vm1014_vm4  ;;  %876 = vperm.xlu1 %4664, %v312_v54  }
  0x44   : > { %4177 = vmatpush3.bf16.msk.msra.mxu0 %vm5219_vm10, %v7575_v13  ;;  %vm974_vm10 = vcmp.eq.s32.totalorder %v4979_v18, %v5136_v39 }
  0x45   : > { %4209 = vmatpush3.bf16.msk.msra.mxu1 %vm5229_vm11, %v7575_v13  ;;  %4178 = vmatprep.subr.msk.bf16.mxu0 %vm5266_vm0, %v7575_v13  ;;  %vm975_vm11 = vcmp.eq.s32.totalorder %v4982_v19, %v5136_v39 }
  0x46   : > { %4210 = vmatprep.subr.msk.bf16.mxu1 %vm5276_vm1, %v7575_v13  ;;  %vm5365_vm13 = vmpackc.low %vm975_vm11, %vm974_vm10  ;;  %vm1012_vm10 = vcmp.eq.s32.totalorder %v4891_v4, %v5124_v37  ;;  %vm1013_vm11 = vcmp.eq.s32.totalorder %v5077_v31, %v5124_v37  ;;  %v296_v37 = vld [vmem:[%s7571_s3 + $0x48] sm:$0xff] }
  0x47   : > { %4131 = vmatmul.mubr.bf16.gmra.mxu0 %v5274_v57  ;;  %vm5492_vm14 = vmpackc.low %vm1013_vm11, %vm1012_vm10  ;;  %764 = vperm.xlu0 %4663, %v296_v37   ;;  %v302_v37 = vld [vmem:[%s7571_s3 + $0x78] sm:$0xff] }
  0x48   : > { %4163 = vmatmul.mubr.bf16.gmra.mxu1 %v5290_v59  ;;  %4179 = vmatpush3.bf16.msk.msra.mxu0 %vm5266_vm0, %v7575_v13  ;;  %vm972_vm0 = vcmp.eq.s32.totalorder %v5009_v23, %v5136_v39 }
  0x49   : > { %4211 = vmatpush3.bf16.msk.msra.mxu1 %vm5276_vm1, %v7575_v13  ;;  %4180 = vmatprep.subr.msk.bf16.mxu0 %vm5308_vm6, %v7575_v13  ;;  %vm973_vm1 = vcmp.eq.s32.totalorder %v5012_v24, %v5136_v39 }
  0x4a   : > { %4212 = vmatprep.subr.msk.bf16.mxu1 %vm5318_vm7, %v7575_v13  ;;  %4134 = vmatprep.mubr.bf16.mxu0 %v5315_v62  ;;  %vm5407_vm3 = vmpackc.low %vm973_vm1, %vm972_vm0  ;;  %vm1386_vm0 = vcmp.eq.s32.totalorder %v4896_v5, %v5475_v38  ;;  %vm1387_vm1 = vcmp.eq.s32.totalorder %v4899_v6, %v5475_v38 }
  0x4b   : > { %4166 = vmatprep.mubr.bf16.mxu1 %v5325_v0  ;;  %vm5529_vm4 = vmpackc.low %vm1387_vm1, %vm1386_vm0  ;;  %769 = vperm.xlu0 %4663, %v297_v43  }
  0x4c   : > { %4181 = vmatpush3.bf16.msk.msra.mxu0 %vm5308_vm6, %v7575_v13  ;;  %vm970_vm6 = vcmp.eq.s32.totalorder %v5043_v27, %v5136_v39  ;;  %881 = vperm.xlu1 %4664, %v313_v63   ;;  %v6862_v63 = vld [vmem:[%s4910_s18 + $0xe] ss:$0 sm:$0xff] }
  0x4d   : > { %4213 = vmatpush3.bf16.msk.msra.mxu1 %vm5318_vm7, %v7575_v13  ;;  %4182 = vmatprep.subr.msk.bf16.mxu0 %vm5355_vm12, %v7575_v13  ;;  %vm971_vm7 = vcmp.eq.s32.totalorder %v5046_v28, %v5136_v39 }
  0x4e   : > { %4214 = vmatprep.subr.msk.bf16.mxu1 %vm5365_vm13, %v7575_v13  ;;  %vm5454_vm9 = vmpackc.low %vm971_vm7, %vm970_vm6  ;;  %vm1384_vm6 = vcmp.eq.s32.totalorder %v4902_v7, %v5475_v38  ;;  %vm1385_vm7 = vcmp.eq.s32.totalorder %v4905_v8, %v5475_v38 }
  0x4f   : > { %4135 = vmatmul.mubr.bf16.gmra.mxu0 %v5363_v16  ;;  %vm5561_vm10 = vmpackc.low %vm1385_vm7, %vm1384_vm6  ;;  %774 = vperm.xlu0 %4663, %v298_v52  }
  0x50   : > { %4167 = vmatmul.mubr.bf16.gmra.mxu1 %v5379_v20  ;;  %4183 = vmatpush3.bf16.msk.msra.mxu0 %vm5355_vm12, %v7575_v13  ;;  %vm968_vm12 = vcmp.eq.s32.totalorder %v4891_v4, %v5136_v39 }
  0x51   : > { %4215 = vmatpush3.bf16.msk.msra.mxu1 %vm5365_vm13, %v7575_v13  ;;  %4184 = vmatprep.subr.msk.bf16.mxu0 %vm5397_vm2, %v7575_v13  ;;  %vm969_vm13 = vcmp.eq.s32.totalorder %v5077_v31, %v5136_v39 }
  0x52   : > { %4216 = vmatprep.subr.msk.bf16.mxu1 %vm5407_vm3, %v7575_v13  ;;  %4138 = vmatprep.mubr.bf16.mxu0 %v5404_v25  ;;  %vm5497_vm15 = vmpackc.low %vm969_vm13, %vm968_vm12  ;;  %vm1382_vm12 = vcmp.eq.s32.totalorder %v4913_v9, %v5475_v38  ;;  %vm1383_vm13 = vcmp.eq.s32.totalorder %v4916_v10, %v5475_v38 }
  0x53   : > { %4170 = vmatprep.mubr.bf16.mxu1 %v5414_v29  ;;  %vm5598_vm0 = vmpackc.low %vm1383_vm13, %vm1382_vm12  ;;  %779 = vperm.xlu0 %4663, %v299_v58   ;;  %v6832_v58 = vld [vmem:[%s7569_s1 + $0x30] sm:$0xff]  }
  0x54   : > { %4185 = vmatpush3.bf16.msk.msra.mxu0 %vm5397_vm2, %v7575_v13  ;;  %vm1342_vm2 = vcmp.eq.s32.totalorder %v4896_v5, %v5487_v40  ;;  %886 = vperm.xlu1 %4664, %v314_v17  }
  0x55   : > { %4217 = vmatpush3.bf16.msk.msra.mxu1 %vm5407_vm3, %v7575_v13  ;;  %4186 = vmatprep.subr.msk.bf16.mxu0 %vm5444_vm8, %v7575_v13  ;;  %vm1343_vm3 = vcmp.eq.s32.totalorder %v4899_v6, %v5487_v40 }
  0x56   : > { %4218 = vmatprep.subr.msk.bf16.mxu1 %vm5454_vm9, %v7575_v13  ;;  %vm5534_vm5 = vmpackc.low %vm1343_vm3, %vm1342_vm2  ;;  %vm1380_vm2 = vcmp.eq.s32.totalorder %v4946_v14, %v5475_v38  ;;  %vm1381_vm3 = vcmp.eq.s32.totalorder %v4949_v15, %v5475_v38 }
  0x57   : > { %4139 = vmatmul.mubr.bf16.gmra.mxu0 %v5452_v34  ;;  %vm5630_vm6 = vmpackc.low %vm1381_vm3, %vm1380_vm2  ;;  %784 = vperm.xlu0 %4663, %v300_v1   ;;  %v6015_v1 = vld [vmem:[%s4910_s18 + $0x9] ss:$0 sm:$0xff] }
  0x58   : > { %4171 = vmatmul.mubr.bf16.gmra.mxu1 %v5468_v36  ;;  %4187 = vmatpush3.bf16.msk.msra.mxu0 %vm5444_vm8, %v7575_v13  ;;  %vm1340_vm8 = vcmp.eq.s32.totalorder %v4902_v7, %v5487_v40 }
  0x59   : > { %4219 = vmatpush3.bf16.msk.msra.mxu1 %vm5454_vm9, %v7575_v13  ;;  %4188 = vmatprep.subr.msk.bf16.mxu0 %vm5492_vm14, %v7575_v13  ;;  %vm1341_vm9 = vcmp.eq.s32.totalorder %v4905_v8, %v5487_v40 }
  0x5a   : > { %4220 = vmatprep.subr.msk.bf16.mxu1 %vm5497_vm15, %v7575_v13  ;;  %4190 = vmatprep.mubr.bf16.mxu0 %v4884_v2  ;;  %vm5566_vm11 = vmpackc.low %vm1341_vm9, %vm1340_vm8  ;;  %vm1378_vm8 = vcmp.eq.s32.totalorder %v4979_v18, %v5475_v38  ;;  %vm1379_vm9 = vcmp.eq.s32.totalorder %v4982_v19, %v5475_v38 }
  0x5b   : > { %4222 = vmatprep.mubr.bf16.mxu1 %v4889_v3  ;;  %vm5667_vm12 = vmpackc.low %vm1379_vm9, %vm1378_vm8  ;;  %789 = vperm.xlu0 %4663, %v301_v26   ;;  %v6072_v26 = vld [vmem:[%s7569_s1] sm:$0xff]  }
  0x5c   : > { %4189 = vmatpush3.bf16.msk.msra.mxu0 %vm5492_vm14, %v7575_v13  ;;  %vm1338_vm14 = vcmp.eq.s32.totalorder %v4913_v9, %v5487_v40  ;;  %891 = vperm.xlu1 %4664, %v315_v30   ;;  %v6612_v30 = vld [vmem:[%s7570_s2 + $0x8] sm:$0xff]  }
  0x5d   : > { %4221 = vmatpush3.bf16.msk.msra.mxu1 %vm5497_vm15, %v7575_v13  ;;  %4238 = vmatprep.subr.msk.bf16.mxu0 %vm5529_vm4, %v7575_v13  ;;  %vm1339_vm15 = vcmp.eq.s32.totalorder %v4916_v10, %v5487_v40 }
  0x5e   : > { %4270 = vmatprep.subr.msk.bf16.mxu1 %vm5534_vm5, %v7575_v13  ;;  %vm5603_vm1 = vmpackc.low %vm1339_vm15, %vm1338_vm14  ;;  %vm1376_vm14 = vcmp.eq.s32.totalorder %v5009_v23, %v5475_v38  ;;  %vm1377_vm15 = vcmp.eq.s32.totalorder %v5012_v24, %v5475_v38 }
  0x5f   : > { %4191 = vmatmul.mubr.bf16.vlgmr.msra.gmra.mxu0 %v5182_v45  ;;  %vm5699_vm2 = vmpackc.low %vm1377_vm15, %vm1376_vm14  ;;  %794 = vperm.xlu0 %4663, %v302_v37   ;;  %v6650_v37 = vld [vmem:[%s7570_s2 + $0x10] sm:$0xff]  }
  0x60   : > { %4223 = vmatmul.mubr.bf16.vlgmr.msra.gmra.mxu1 %v5201_v48  ;;  %4239 = vmatpush3.bf16.msk.msra.mxu0 %vm5529_vm4, %v7575_v13  ;;  %vm1336_vm4 = vcmp.eq.s32.totalorder %v4946_v14, %v5487_v40 }
  0x61   : > { %4271 = vmatpush3.bf16.msk.msra.mxu1 %vm5534_vm5, %v7575_v13  ;;  %4240 = vmatprep.subr.msk.bf16.mxu0 %vm5561_vm10, %v7575_v13  ;;  %vm1337_vm5 = vcmp.eq.s32.totalorder %v4949_v15, %v5487_v40 }
  0x62   : > { %4272 = vmatprep.subr.msk.bf16.mxu1 %vm5566_vm11, %v7575_v13  ;;  %4194 = vmatprep.mubr.bf16.mxu0 %v5226_v51  ;;  %vm5635_vm7 = vmpackc.low %vm1337_vm5, %vm1336_vm4  ;;  %vm1374_vm4 = vcmp.eq.s32.totalorder %v5043_v27, %v5475_v38  ;;  %vm1375_vm5 = vcmp.eq.s32.totalorder %v5046_v28, %v5475_v38 }
  0x63   : > { %4226 = vmatprep.mubr.bf16.mxu1 %v5236_v53  ;;  %vm5736_vm8 = vmpackc.low %vm1375_vm5, %vm1374_vm4  ;;  %896 = vperm.xlu1 %4664, %v316_v41  }
  0x64   : > { %4241 = vmatpush3.bf16.msk.msra.mxu0 %vm5561_vm10, %v7575_v13  ;;  %vm1334_vm10 = vcmp.eq.s32.totalorder %v4979_v18, %v5487_v40  ;;  %901 = vperm.xlu0 %4663, %v317_v42  }
  0x65   : > { %4273 = vmatpush3.bf16.msk.msra.mxu1 %vm5566_vm11, %v7575_v13  ;;  %4242 = vmatprep.subr.msk.bf16.mxu0 %vm5598_vm0, %v7575_v13  ;;  %vm1335_vm11 = vcmp.eq.s32.totalorder %v4982_v19, %v5487_v40 }
  0x66   : > { %4274 = vmatprep.subr.msk.bf16.mxu1 %vm5603_vm1, %v7575_v13  ;;  %vm5672_vm13 = vmpackc.low %vm1335_vm11, %vm1334_vm10  ;;  %vm1372_vm10 = vcmp.eq.s32.totalorder %v4891_v4, %v5475_v38  ;;  %vm1373_vm11 = vcmp.eq.s32.totalorder %v5077_v31, %v5475_v38  ;;  %v5769_v38 = vld [vmem:[%s4910_s18 + $0x6] ss:$0 sm:$0xff] }
  0x67   : > { %4195 = vmatmul.mubr.bf16.gmra.mxu0 %v5274_v57  ;;  %vm5774_vm14 = vmpackc.low %vm1373_vm11, %vm1372_vm10 }
  0x68   : > { %4227 = vmatmul.mubr.bf16.gmra.mxu1 %v5290_v59  ;;  %4243 = vmatpush3.bf16.msk.msra.mxu0 %vm5598_vm0, %v7575_v13  ;;  %vm1332_vm0 = vcmp.eq.s32.totalorder %v5009_v23, %v5487_v40 }
  0x69   : > { %4275 = vmatpush3.bf16.msk.msra.mxu1 %vm5603_vm1, %v7575_v13  ;;  %4244 = vmatprep.subr.msk.bf16.mxu0 %vm5630_vm6, %v7575_v13  ;;  %vm1333_vm1 = vcmp.eq.s32.totalorder %v5012_v24, %v5487_v40 }
  0x6a   : > { %4276 = vmatprep.subr.msk.bf16.mxu1 %vm5635_vm7, %v7575_v13  ;;  %4198 = vmatprep.mubr.bf16.mxu0 %v5315_v62  ;;  %vm5704_vm3 = vmpackc.low %vm1333_vm1, %vm1332_vm0  ;;  %vm1746_vm0 = vcmp.eq.s32.totalorder %v4896_v5, %v5757_v35  ;;  %vm1747_vm1 = vcmp.eq.s32.totalorder %v4899_v6, %v5757_v35 }
  0x6b   : > { %4230 = vmatprep.mubr.bf16.mxu1 %v5325_v0  ;;  %vm5811_vm4 = vmpackc.low %vm1747_vm1, %vm1746_vm0  ;;  %948 = vperm.xlu0 %4663, %v319_v47   ;;  %v6736_v47 = vld [vmem:[%s7570_s2 + $0x20] sm:$0xff]  }
  0x6c   : > { %4245 = vmatpush3.bf16.msk.msra.mxu0 %vm5630_vm6, %v7575_v13  ;;  %vm1330_vm6 = vcmp.eq.s32.totalorder %v5043_v27, %v5487_v40 }
  0x6d   : > { %4277 = vmatpush3.bf16.msk.msra.mxu1 %vm5635_vm7, %v7575_v13  ;;  %4246 = vmatprep.subr.msk.bf16.mxu0 %vm5667_vm12, %v7575_v13  ;;  %vm1331_vm7 = vcmp.eq.s32.totalorder %v5046_v28, %v5487_v40 }
  0x6e   : > { %4278 = vmatprep.subr.msk.bf16.mxu1 %vm5672_vm13, %v7575_v13  ;;  %vm5741_vm9 = vmpackc.low %vm1331_vm7, %vm1330_vm6  ;;  %vm1744_vm6 = vcmp.eq.s32.totalorder %v4902_v7, %v5757_v35  ;;  %vm1745_vm7 = vcmp.eq.s32.totalorder %v4905_v8, %v5757_v35 }
  0x6f   : > { %4199 = vmatmul.mubr.bf16.gmra.mxu0 %v5363_v16  ;;  %vm5843_vm10 = vmpackc.low %vm1745_vm7, %vm1744_vm6 }
  0x70   : > { %4231 = vmatmul.mubr.bf16.gmra.mxu1 %v5379_v20  ;;  %4247 = vmatpush3.bf16.msk.msra.mxu0 %vm5667_vm12, %v7575_v13  ;;  %vm1328_vm12 = vcmp.eq.s32.totalorder %v4891_v4, %v5487_v40 }
  0x71   : > { %4279 = vmatpush3.bf16.msk.msra.mxu1 %vm5672_vm13, %v7575_v13  ;;  %4248 = vmatprep.subr.msk.bf16.mxu0 %vm5699_vm2, %v7575_v13  ;;  %vm1329_vm13 = vcmp.eq.s32.totalorder %v5077_v31, %v5487_v40  ;;  %v6660_v40 = vld [vmem:[%s7569_s1 + $0x10] sm:$0xff]  }
  0x72   : > { %4280 = vmatprep.subr.msk.bf16.mxu1 %vm5704_vm3, %v7575_v13  ;;  %4202 = vmatprep.mubr.bf16.mxu0 %v5404_v25  ;;  %vm5779_vm15 = vmpackc.low %vm1329_vm13, %vm1328_vm12  ;;  %vm1742_vm12 = vcmp.eq.s32.totalorder %v4913_v9, %v5757_v35  ;;  %vm1743_vm13 = vcmp.eq.s32.totalorder %v4916_v10, %v5757_v35 }
  0x73   : > { %4234 = vmatprep.mubr.bf16.mxu1 %v5414_v29  ;;  %vm5874_vm0 = vmpackc.low %vm1743_vm13, %vm1742_vm12 }
  0x74   : > { %4249 = vmatpush3.bf16.msk.msra.mxu0 %vm5699_vm2, %v7575_v13  ;;  %vm1702_vm2 = vcmp.eq.s32.totalorder %v4896_v5, %v5769_v38 }
  0x75   : > { %4281 = vmatpush3.bf16.msk.msra.mxu1 %vm5704_vm3, %v7575_v13  ;;  %4250 = vmatprep.subr.msk.bf16.mxu0 %vm5736_vm8, %v7575_v13  ;;  %vm1703_vm3 = vcmp.eq.s32.totalorder %v4899_v6, %v5769_v38 }
  0x76   : > { %4282 = vmatprep.subr.msk.bf16.mxu1 %vm5741_vm9, %v7575_v13  ;;  %vm5816_vm5 = vmpackc.low %vm1703_vm3, %vm1702_vm2  ;;  %vm1740_vm2 = vcmp.eq.s32.totalorder %v4946_v14, %v5757_v35  ;;  %vm1741_vm3 = vcmp.eq.s32.totalorder %v4949_v15, %v5757_v35 }
  0x77   : > { %4203 = vmatmul.mubr.bf16.gmra.mxu0 %v5452_v34  ;;  %vm5903_vm6 = vmpackc.low %vm1741_vm3, %vm1740_vm2 }
  0x78   : > { %4235 = vmatmul.mubr.bf16.gmra.mxu1 %v5468_v36  ;;  %4251 = vmatpush3.bf16.msk.msra.mxu0 %vm5736_vm8, %v7575_v13  ;;  %vm1700_vm8 = vcmp.eq.s32.totalorder %v4902_v7, %v5769_v38 }
  0x79   : > { %4283 = vmatpush3.bf16.msk.msra.mxu1 %vm5741_vm9, %v7575_v13  ;;  %4252 = vmatprep.subr.msk.bf16.mxu0 %vm5774_vm14, %v7575_v13  ;;  %vm1701_vm9 = vcmp.eq.s32.totalorder %v4905_v8, %v5769_v38 }
  0x7a   : > { %4284 = vmatprep.subr.msk.bf16.mxu1 %vm5779_vm15, %v7575_v13  ;;  %4254 = vmatprep.mubr.bf16.mxu0 %v4884_v2  ;;  %v318_v2 = vld [vmem:[%s7572_s4 + $0x78] sm:$0xff]  ;;  %vm5848_vm11 = vmpackc.low %vm1701_vm9, %vm1700_vm8  ;;  %vm1738_vm8 = vcmp.eq.s32.totalorder %v4979_v18, %v5757_v35  ;;  %vm1739_vm9 = vcmp.eq.s32.totalorder %v4982_v19, %v5757_v35 }
  0x7b   : > { %4286 = vmatprep.mubr.bf16.mxu1 %v4889_v3  ;;  %906 = vperm.xlu1 %4664, %v318_v2   ;;  %vm5934_vm12 = vmpackc.low %vm1739_vm9, %vm1738_vm8  ;;  %v6271_v3 = vld [vmem:[%s4910_s18 + $0xb] ss:$0 sm:$0xff] }
  0x7c   : > { %4253 = vmatpush3.bf16.msk.msra.mxu0 %vm5774_vm14, %v7575_v13  ;;  %vm1698_vm14 = vcmp.eq.s32.totalorder %v4913_v9, %v5769_v38 }
  0x7d   : > { %4285 = vmatpush3.bf16.msk.msra.mxu1 %vm5779_vm15, %v7575_v13  ;;  %4302 = vmatprep.subr.msk.bf16.mxu0 %vm5811_vm4, %v7575_v13  ;;  %vm1699_vm15 = vcmp.eq.s32.totalorder %v4916_v10, %v5769_v38 }
  0x7e   : > { %4334 = vmatprep.subr.msk.bf16.mxu1 %vm5816_vm5, %v7575_v13  ;;  %vm5879_vm1 = vmpackc.low %vm1699_vm15, %vm1698_vm14  ;;  %vm1736_vm14 = vcmp.eq.s32.totalorder %v5009_v23, %v5757_v35  ;;  %vm1737_vm15 = vcmp.eq.s32.totalorder %v5012_v24, %v5757_v35 }
  0x7f   : > { %4255 = vmatmul.mubr.bf16.vlgmr.msra.gmra.mxu0 %v5182_v45  ;;  %vm5963_vm2 = vmpackc.low %vm1737_vm15, %vm1736_vm14 }
  0x80   : > { %4287 = vmatmul.mubr.bf16.vlgmr.msra.gmra.mxu1 %v5201_v48  ;;  %4303 = vmatpush3.bf16.msk.msra.mxu0 %vm5811_vm4, %v7575_v13  ;;  %vm1696_vm4 = vcmp.eq.s32.totalorder %v4946_v14, %v5769_v38 }
  0x81   : > { %4335 = vmatpush3.bf16.msk.msra.mxu1 %vm5816_vm5, %v7575_v13  ;;  %4304 = vmatprep.subr.msk.bf16.mxu0 %vm5843_vm10, %v7575_v13  ;;  %vm1697_vm5 = vcmp.eq.s32.totalorder %v4949_v15, %v5769_v38 }
  0x82   : > { %4336 = vmatprep.subr.msk.bf16.mxu1 %vm5848_vm11, %v7575_v13  ;;  %4258 = vmatprep.mubr.bf16.mxu0 %v5226_v51  ;;  %vm5908_vm7 = vmpackc.low %vm1697_vm5, %vm1696_vm4  ;;  %vm1734_vm4 = vcmp.eq.s32.totalorder %v5043_v27, %v5757_v35  ;;  %vm1735_vm5 = vcmp.eq.s32.totalorder %v5046_v28, %v5757_v35 }
  0x83   : > { %4290 = vmatprep.mubr.bf16.mxu1 %v5236_v53  ;;  %vm5994_vm8 = vmpackc.low %vm1735_vm5, %vm1734_vm4 }
  0x84   : > { %4305 = vmatpush3.bf16.msk.msra.mxu0 %vm5843_vm10, %v7575_v13  ;;  %vm1694_vm10 = vcmp.eq.s32.totalorder %v4979_v18, %v5769_v38 }
  0x85   : > { %4337 = vmatpush3.bf16.msk.msra.mxu1 %vm5848_vm11, %v7575_v13  ;;  %4306 = vmatprep.subr.msk.bf16.mxu0 %vm5874_vm0, %v7575_v13  ;;  %vm1695_vm11 = vcmp.eq.s32.totalorder %v4982_v19, %v5769_v38 }
  0x86   : > { %4338 = vmatprep.subr.msk.bf16.mxu1 %vm5879_vm1, %v7575_v13  ;;  %vm5939_vm13 = vmpackc.low %vm1695_vm11, %vm1694_vm10  ;;  %vm1732_vm10 = vcmp.eq.s32.totalorder %v4891_v4, %v5757_v35  ;;  %vm1733_vm11 = vcmp.eq.s32.totalorder %v5077_v31, %v5757_v35  ;;  %v6628_v35 = vld [vmem:[%s7569_s1 + $0x8] sm:$0xff]  }
  0x87   : > { %4259 = vmatmul.mubr.bf16.gmra.mxu0 %v5274_v57  ;;  %vm6029_vm14 = vmpackc.low %vm1733_vm11, %vm1732_vm10 }
  0x88   : > { %4291 = vmatmul.mubr.bf16.gmra.mxu1 %v5290_v59  ;;  %4307 = vmatpush3.bf16.msk.msra.mxu0 %vm5874_vm0, %v7575_v13  ;;  %vm1692_vm0 = vcmp.eq.s32.totalorder %v5009_v23, %v5769_v38 }
  0x89   : > { %4339 = vmatpush3.bf16.msk.msra.mxu1 %vm5879_vm1, %v7575_v13  ;;  %4308 = vmatprep.subr.msk.bf16.mxu0 %vm5903_vm6, %v7575_v13  ;;  %vm1693_vm1 = vcmp.eq.s32.totalorder %v5012_v24, %v5769_v38 }
  0x8a   : > { %4340 = vmatprep.subr.msk.bf16.mxu1 %vm5908_vm7, %v7575_v13  ;;  %4262 = vmatprep.mubr.bf16.mxu0 %v5315_v62  ;;  %vm5968_vm3 = vmpackc.low %vm1693_vm1, %vm1692_vm0  ;;  %vm2106_vm0 = vcmp.eq.s32.totalorder %v4896_v5, %v6015_v1  ;;  %vm2107_vm1 = vcmp.eq.s32.totalorder %v4899_v6, %v6015_v1 }
  0x8b   : > { %4294 = vmatprep.mubr.bf16.mxu1 %v5325_v0  ;;  %vm6065_vm4 = vmpackc.low %vm2107_vm1, %vm2106_vm0 }
  0x8c   : > { %4309 = vmatpush3.bf16.msk.msra.mxu0 %vm5903_vm6, %v7575_v13  ;;  %vm1690_vm6 = vcmp.eq.s32.totalorder %v5043_v27, %v5769_v38 }
  0x8d   : > { %4341 = vmatpush3.bf16.msk.msra.mxu1 %vm5908_vm7, %v7575_v13  ;;  %4310 = vmatprep.subr.msk.bf16.mxu0 %vm5934_vm12, %v7575_v13  ;;  %vm1691_vm7 = vcmp.eq.s32.totalorder %v5046_v28, %v5769_v38 }
  0x8e   : > { %4342 = vmatprep.subr.msk.bf16.mxu1 %vm5939_vm13, %v7575_v13  ;;  %vm5999_vm9 = vmpackc.low %vm1691_vm7, %vm1690_vm6  ;;  %vm2104_vm6 = vcmp.eq.s32.totalorder %v4902_v7, %v6015_v1  ;;  %vm2105_vm7 = vcmp.eq.s32.totalorder %v4905_v8, %v6015_v1 }
  0x8f   : > { %4263 = vmatmul.mubr.bf16.gmra.mxu0 %v5363_v16  ;;  %vm6099_vm10 = vmpackc.low %vm2105_vm7, %vm2104_vm6 }
  0x90   : > { %4295 = vmatmul.mubr.bf16.gmra.mxu1 %v5379_v20  ;;  %4311 = vmatpush3.bf16.msk.msra.mxu0 %vm5934_vm12, %v7575_v13  ;;  %vm1688_vm12 = vcmp.eq.s32.totalorder %v4891_v4, %v5769_v38 }
  0x91   : > { %4343 = vmatpush3.bf16.msk.msra.mxu1 %vm5939_vm13, %v7575_v13  ;;  %4312 = vmatprep.subr.msk.bf16.mxu0 %vm5963_vm2, %v7575_v13  ;;  %vm1689_vm13 = vcmp.eq.s32.totalorder %v5077_v31, %v5769_v38 }
  0x92   : > { %4344 = vmatprep.subr.msk.bf16.mxu1 %vm5968_vm3, %v7575_v13  ;;  %4266 = vmatprep.mubr.bf16.mxu0 %v5404_v25  ;;  %vm6034_vm15 = vmpackc.low %vm1689_vm13, %vm1688_vm12  ;;  %vm2102_vm12 = vcmp.eq.s32.totalorder %v4913_v9, %v6015_v1  ;;  %vm2103_vm13 = vcmp.eq.s32.totalorder %v4916_v10, %v6015_v1 }
  0x93   : > { %4298 = vmatprep.mubr.bf16.mxu1 %v5414_v29  ;;  %vm6130_vm0 = vmpackc.low %vm2103_vm13, %vm2102_vm12 }
  0x94   : > { %4313 = vmatpush3.bf16.msk.msra.mxu0 %vm5963_vm2, %v7575_v13  ;;  %vm2062_vm2 = vcmp.eq.s32.totalorder %v4896_v5, %v6024_v11  ;;  %v6449_v56 = vpop.permute.xlu0 %719 }
  0x95   : > { %4345 = vmatpush3.bf16.msk.msra.mxu1 %vm5968_vm3, %v7575_v13  ;;  %4314 = vmatprep.subr.msk.bf16.mxu0 %vm5994_vm8, %v7575_v13  ;;  %vm2063_vm3 = vcmp.eq.s32.totalorder %v4899_v6, %v6024_v11 }
  0x96   : > { %4346 = vmatprep.subr.msk.bf16.mxu1 %vm5999_vm9, %v7575_v13  ;;  %vm6075_vm5 = vmpackc.low %vm2063_vm3, %vm2062_vm2  ;;  %vm2100_vm2 = vcmp.eq.s32.totalorder %v4946_v14, %v6015_v1  ;;  %vm2101_vm3 = vcmp.eq.s32.totalorder %v4949_v15, %v6015_v1 }
  0x97   : > { %4267 = vmatmul.mubr.bf16.gmra.mxu0 %v5452_v34  ;;  %vm6159_vm6 = vmpackc.low %vm2101_vm3, %vm2100_vm2 }
  0x98   : > { %4299 = vmatmul.mubr.bf16.gmra.mxu1 %v5468_v36  ;;  %4315 = vmatpush3.bf16.msk.msra.mxu0 %vm5994_vm8, %v7575_v13  ;;  %vm2060_vm8 = vcmp.eq.s32.totalorder %v4902_v7, %v6024_v11 }
  0x99   : > { %4347 = vmatpush3.bf16.msk.msra.mxu1 %vm5999_vm9, %v7575_v13  ;;  %4316 = vmatprep.subr.msk.bf16.mxu0 %vm6029_vm14, %v7575_v13  ;;  %vm2061_vm9 = vcmp.eq.s32.totalorder %v4905_v8, %v6024_v11 }
  0x9a   : > { %4348 = vmatprep.subr.msk.bf16.mxu1 %vm6034_vm15, %v7575_v13  ;;  %4318 = vmatprep.mubr.bf16.mxu0 %v6062_v21  ;;  %vm6104_vm11 = vmpackc.low %vm2061_vm9, %vm2060_vm8  ;;  %vm2098_vm8 = vcmp.eq.s32.totalorder %v4979_v18, %v6015_v1  ;;  %vm2099_vm9 = vcmp.eq.s32.totalorder %v4982_v19, %v6015_v1 }
  0x9b   : > { %4350 = vmatprep.mubr.bf16.mxu1 %v6072_v26  ;;  %vm6190_vm12 = vmpackc.low %vm2099_vm9, %vm2098_vm8 }
  0x9c   : > { %4317 = vmatpush3.bf16.msk.msra.mxu0 %vm6029_vm14, %v7575_v13  ;;  %vm2058_vm14 = vcmp.eq.s32.totalorder %v4913_v9, %v6024_v11 }
  0x9d   : > { %4349 = vmatpush3.bf16.msk.msra.mxu1 %vm6034_vm15, %v7575_v13  ;;  %4366 = vmatprep.subr.msk.bf16.mxu0 %vm6065_vm4, %v7575_v13  ;;  %vm2059_vm15 = vcmp.eq.s32.totalorder %v4916_v10, %v6024_v11 }
  0x9e   : > { %4398 = vmatprep.subr.msk.bf16.mxu1 %vm6075_vm5, %v7575_v13  ;;  %vm6135_vm1 = vmpackc.low %vm2059_vm15, %vm2058_vm14  ;;  %vm2096_vm14 = vcmp.eq.s32.totalorder %v5009_v23, %v6015_v1  ;;  %vm2097_vm15 = vcmp.eq.s32.totalorder %v5012_v24, %v6015_v1 }
  0x9f   : > { %4319 = vmatmul.mubr.bf16.vlgmr.msra.gmra.mxu0 %v5182_v45  ;;  %vm6219_vm2 = vmpackc.low %vm2097_vm15, %vm2096_vm14 }
  0xa0   : > { %4351 = vmatmul.mubr.bf16.vlgmr.msra.gmra.mxu1 %v5201_v48  ;;  %4367 = vmatpush3.bf16.msk.msra.mxu0 %vm6065_vm4, %v7575_v13  ;;  %vm2056_vm4 = vcmp.eq.s32.totalorder %v4946_v14, %v6024_v11 }
  0xa1   : > { %4399 = vmatpush3.bf16.msk.msra.mxu1 %vm6075_vm5, %v7575_v13  ;;  %4368 = vmatprep.subr.msk.bf16.mxu0 %vm6099_vm10, %v7575_v13  ;;  %vm2057_vm5 = vcmp.eq.s32.totalorder %v4949_v15, %v6024_v11 }
  0xa2   : > { %4400 = vmatprep.subr.msk.bf16.mxu1 %vm6104_vm11, %v7575_v13  ;;  %4322 = vmatprep.mubr.bf16.mxu0 %v5226_v51  ;;  %vm6164_vm7 = vmpackc.low %vm2057_vm5, %vm2056_vm4  ;;  %vm2094_vm4 = vcmp.eq.s32.totalorder %v5043_v27, %v6015_v1  ;;  %vm2095_vm5 = vcmp.eq.s32.totalorder %v5046_v28, %v6015_v1 }
  0xa3   : > { %4354 = vmatprep.mubr.bf16.mxu1 %v5236_v53  ;;  %vm6250_vm8 = vmpackc.low %vm2095_vm5, %vm2094_vm4 }
  0xa4   : > { %4369 = vmatpush3.bf16.msk.msra.mxu0 %vm6099_vm10, %v7575_v13  ;;  %vm2054_vm10 = vcmp.eq.s32.totalorder %v4979_v18, %v6024_v11 }
  0xa5   : > { %4401 = vmatpush3.bf16.msk.msra.mxu1 %vm6104_vm11, %v7575_v13  ;;  %4370 = vmatprep.subr.msk.bf16.mxu0 %vm6130_vm0, %v7575_v13  ;;  %vm2055_vm11 = vcmp.eq.s32.totalorder %v4982_v19, %v6024_v11 }
  0xa6   : > { %4402 = vmatprep.subr.msk.bf16.mxu1 %vm6135_vm1, %v7575_v13  ;;  %vm6195_vm13 = vmpackc.low %vm2055_vm11, %vm2054_vm10  ;;  %vm2092_vm10 = vcmp.eq.s32.totalorder %v4891_v4, %v6015_v1  ;;  %vm2093_vm11 = vcmp.eq.s32.totalorder %v5077_v31, %v6015_v1  ;;  %v6874_v1 = vld [vmem:[%s7570_s2 + $0x38] sm:$0xff]  }
  0xa7   : > { %4323 = vmatmul.mubr.bf16.gmra.mxu0 %v5274_v57  ;;  %vm6285_vm14 = vmpackc.low %vm2093_vm11, %vm2092_vm10 }
  0xa8   : > { %4355 = vmatmul.mubr.bf16.gmra.mxu1 %v5290_v59  ;;  %4371 = vmatpush3.bf16.msk.msra.mxu0 %vm6130_vm0, %v7575_v13  ;;  %vm2052_vm0 = vcmp.eq.s32.totalorder %v5009_v23, %v6024_v11 }
  0xa9   : > { %4403 = vmatpush3.bf16.msk.msra.mxu1 %vm6135_vm1, %v7575_v13  ;;  %4372 = vmatprep.subr.msk.bf16.mxu0 %vm6159_vm6, %v7575_v13  ;;  %vm2053_vm1 = vcmp.eq.s32.totalorder %v5012_v24, %v6024_v11 }
  0xaa   : > { %4404 = vmatprep.subr.msk.bf16.mxu1 %vm6164_vm7, %v7575_v13  ;;  %4326 = vmatprep.mubr.bf16.mxu0 %v5315_v62  ;;  %vm6224_vm3 = vmpackc.low %vm2053_vm1, %vm2052_vm0  ;;  %vm2466_vm0 = vcmp.eq.s32.totalorder %v4896_v5, %v6271_v3  ;;  %vm2467_vm1 = vcmp.eq.s32.totalorder %v4899_v6, %v6271_v3 }
  0xab   : > { %4358 = vmatprep.mubr.bf16.mxu1 %v5325_v0  ;;  %vm6316_vm4 = vmpackc.low %vm2467_vm1, %vm2466_vm0 }
  0xac   : > { %4373 = vmatpush3.bf16.msk.msra.mxu0 %vm6159_vm6, %v7575_v13  ;;  %vm2050_vm6 = vcmp.eq.s32.totalorder %v5043_v27, %v6024_v11 }
  0xad   : > { %4405 = vmatpush3.bf16.msk.msra.mxu1 %vm6164_vm7, %v7575_v13  ;;  %4374 = vmatprep.subr.msk.bf16.mxu0 %vm6190_vm12, %v7575_v13  ;;  %vm2051_vm7 = vcmp.eq.s32.totalorder %v5046_v28, %v6024_v11 }
  0xae   : > { %4406 = vmatprep.subr.msk.bf16.mxu1 %vm6195_vm13, %v7575_v13  ;;  %vm6255_vm9 = vmpackc.low %vm2051_vm7, %vm2050_vm6  ;;  %vm2464_vm6 = vcmp.eq.s32.totalorder %v4902_v7, %v6271_v3  ;;  %vm2465_vm7 = vcmp.eq.s32.totalorder %v4905_v8, %v6271_v3 }
  0xaf   : > { %4327 = vmatmul.mubr.bf16.gmra.mxu0 %v5363_v16  ;;  %vm6345_vm10 = vmpackc.low %vm2465_vm7, %vm2464_vm6 }
  0xb0   : > { %4359 = vmatmul.mubr.bf16.gmra.mxu1 %v5379_v20  ;;  %4375 = vmatpush3.bf16.msk.msra.mxu0 %vm6190_vm12, %v7575_v13  ;;  %vm2048_vm12 = vcmp.eq.s32.totalorder %v4891_v4, %v6024_v11 }
  0xb1   : > { %4407 = vmatpush3.bf16.msk.msra.mxu1 %vm6195_vm13, %v7575_v13  ;;  %4376 = vmatprep.subr.msk.bf16.mxu0 %vm6219_vm2, %v7575_v13  ;;  %vm2049_vm13 = vcmp.eq.s32.totalorder %v5077_v31, %v6024_v11 }
  0xb2   : > { %4408 = vmatprep.subr.msk.bf16.mxu1 %vm6224_vm3, %v7575_v13  ;;  %4330 = vmatprep.mubr.bf16.mxu0 %v5404_v25  ;;  %vm6290_vm15 = vmpackc.low %vm2049_vm13, %vm2048_vm12  ;;  %vm2462_vm12 = vcmp.eq.s32.totalorder %v4913_v9, %v6271_v3  ;;  %vm2463_vm13 = vcmp.eq.s32.totalorder %v4916_v10, %v6271_v3 }
  0xb3   : > { %4362 = vmatprep.mubr.bf16.mxu1 %v5414_v29  ;;  %vm6376_vm0 = vmpackc.low %vm2463_vm13, %vm2462_vm12 }
  0xb4   : > { %4377 = vmatpush3.bf16.msk.msra.mxu0 %vm6219_vm2, %v7575_v13  ;;  %vm2422_vm2 = vcmp.eq.s32.totalorder %v4896_v5, %v6280_v46 }
  0xb5   : > { %4409 = vmatpush3.bf16.msk.msra.mxu1 %vm6224_vm3, %v7575_v13  ;;  %4378 = vmatprep.subr.msk.bf16.mxu0 %vm6250_vm8, %v7575_v13  ;;  %vm2423_vm3 = vcmp.eq.s32.totalorder %v4899_v6, %v6280_v46 }
  0xb6   : > { %4410 = vmatprep.subr.msk.bf16.mxu1 %vm6255_vm9, %v7575_v13  ;;  %vm6321_vm5 = vmpackc.low %vm2423_vm3, %vm2422_vm2  ;;  %vm2460_vm2 = vcmp.eq.s32.totalorder %v4946_v14, %v6271_v3  ;;  %vm2461_vm3 = vcmp.eq.s32.totalorder %v4949_v15, %v6271_v3 }
  0xb7   : > { %4331 = vmatmul.mubr.bf16.gmra.mxu0 %v5452_v34  ;;  %vm6405_vm6 = vmpackc.low %vm2461_vm3, %vm2460_vm2 }
  0xb8   : > { %4363 = vmatmul.mubr.bf16.gmra.mxu1 %v5468_v36  ;;  %4379 = vmatpush3.bf16.msk.msra.mxu0 %vm6250_vm8, %v7575_v13  ;;  %vm2420_vm8 = vcmp.eq.s32.totalorder %v4902_v7, %v6280_v46 }
  0xb9   : > { %4411 = vmatpush3.bf16.msk.msra.mxu1 %vm6255_vm9, %v7575_v13  ;;  %4380 = vmatprep.subr.msk.bf16.mxu0 %vm6285_vm14, %v7575_v13  ;;  %vm2421_vm9 = vcmp.eq.s32.totalorder %v4905_v8, %v6280_v46 }
  0xba   : > { %4412 = vmatprep.subr.msk.bf16.mxu1 %vm6290_vm15, %v7575_v13  ;;  %4382 = vmatprep.mubr.bf16.mxu0 %v6062_v21  ;;  %vm6350_vm11 = vmpackc.low %vm2421_vm9, %vm2420_vm8  ;;  %vm2458_vm8 = vcmp.eq.s32.totalorder %v4979_v18, %v6271_v3  ;;  %vm2459_vm9 = vcmp.eq.s32.totalorder %v4982_v19, %v6271_v3 }
  0xbb   : > { %4414 = vmatprep.mubr.bf16.mxu1 %v6072_v26  ;;  %vm6436_vm12 = vmpackc.low %vm2459_vm9, %vm2458_vm8 }
  0xbc   : > { %4381 = vmatpush3.bf16.msk.msra.mxu0 %vm6285_vm14, %v7575_v13  ;;  %vm2418_vm14 = vcmp.eq.s32.totalorder %v4913_v9, %v6280_v46 }
  0xbd   : > { %4413 = vmatpush3.bf16.msk.msra.mxu1 %vm6290_vm15, %v7575_v13  ;;  %4430 = vmatprep.subr.msk.bf16.mxu0 %vm6316_vm4, %v7575_v13  ;;  %vm2419_vm15 = vcmp.eq.s32.totalorder %v4916_v10, %v6280_v46 }
  0xbe   : > { %4462 = vmatprep.subr.msk.bf16.mxu1 %vm6321_vm5, %v7575_v13  ;;  %vm6381_vm1 = vmpackc.low %vm2419_vm15, %vm2418_vm14  ;;  %vm2456_vm14 = vcmp.eq.s32.totalorder %v5009_v23, %v6271_v3  ;;  %vm2457_vm15 = vcmp.eq.s32.totalorder %v5012_v24, %v6271_v3 }
  0xbf   : > { %4383 = vmatmul.mubr.bf16.vlgmr.msra.gmra.mxu0 %v5182_v45  ;;  %vm6469_vm2 = vmpackc.low %vm2457_vm15, %vm2456_vm14  ;;  %v6782_v45 = vld [vmem:[%s7570_s2 + $0x28] sm:$0xff]  }
  0xc0   : > { %4415 = vmatmul.mubr.bf16.vlgmr.msra.gmra.mxu1 %v5201_v48  ;;  %4431 = vmatpush3.bf16.msk.msra.mxu0 %vm6316_vm4, %v7575_v13  ;;  %vm2416_vm4 = vcmp.eq.s32.totalorder %v4946_v14, %v6280_v46 }
  0xc1   : > { %4463 = vmatpush3.bf16.msk.msra.mxu1 %vm6321_vm5, %v7575_v13  ;;  %4432 = vmatprep.subr.msk.bf16.mxu0 %vm6345_vm10, %v7575_v13  ;;  %vm2417_vm5 = vcmp.eq.s32.totalorder %v4949_v15, %v6280_v46 }
  0xc2   : > { %4464 = vmatprep.subr.msk.bf16.mxu1 %vm6350_vm11, %v7575_v13  ;;  %4386 = vmatprep.mubr.bf16.mxu0 %v5226_v51  ;;  %vm6410_vm7 = vmpackc.low %vm2417_vm5, %vm2416_vm4  ;;  %vm2454_vm4 = vcmp.eq.s32.totalorder %v5043_v27, %v6271_v3  ;;  %vm2455_vm5 = vcmp.eq.s32.totalorder %v5046_v28, %v6271_v3 }
  0xc3   : > { %4418 = vmatprep.mubr.bf16.mxu1 %v5236_v53  ;;  %vm6502_vm8 = vmpackc.low %vm2455_vm5, %vm2454_vm4  ;;  %v6798_v53 = vld [vmem:[%s7569_s1 + $0x28] sm:$0xff]  }
  0xc4   : > { %4433 = vmatpush3.bf16.msk.msra.mxu0 %vm6345_vm10, %v7575_v13  ;;  %vm2414_vm10 = vcmp.eq.s32.totalorder %v4979_v18, %v6280_v46 }
  0xc5   : > { %4465 = vmatpush3.bf16.msk.msra.mxu1 %vm6350_vm11, %v7575_v13  ;;  %4434 = vmatprep.subr.msk.bf16.mxu0 %vm6376_vm0, %v7575_v13  ;;  %vm2415_vm11 = vcmp.eq.s32.totalorder %v4982_v19, %v6280_v46 }
  0xc6   : > { %4466 = vmatprep.subr.msk.bf16.mxu1 %vm6381_vm1, %v7575_v13  ;;  %vm6441_vm13 = vmpackc.low %vm2415_vm11, %vm2414_vm10  ;;  %vm2452_vm10 = vcmp.eq.s32.totalorder %v4891_v4, %v6271_v3  ;;  %vm2453_vm11 = vcmp.eq.s32.totalorder %v5077_v31, %v6271_v3  ;;  %v6712_v3 = vld [vmem:[%s7569_s1 + $0x18] sm:$0xff]  }
  0xc7   : > { %4387 = vmatmul.mubr.bf16.gmra.mxu0 %v5274_v57  ;;  %vm6539_vm14 = vmpackc.low %vm2453_vm11, %vm2452_vm10 }
  0xc8   : > { %4419 = vmatmul.mubr.bf16.gmra.mxu1 %v5290_v59  ;;  %4435 = vmatpush3.bf16.msk.msra.mxu0 %vm6376_vm0, %v7575_v13  ;;  %vm2412_vm0 = vcmp.eq.s32.totalorder %v5009_v23, %v6280_v46  ;;  %v6822_v59 = vld [vmem:[%s7570_s2 + $0x30] sm:$0xff]  }
  0xc9   : > { %4467 = vmatpush3.bf16.msk.msra.mxu1 %vm6381_vm1, %v7575_v13  ;;  %4436 = vmatprep.subr.msk.bf16.mxu0 %vm6405_vm6, %v7575_v13  ;;  %vm2413_vm1 = vcmp.eq.s32.totalorder %v5012_v24, %v6280_v46 }
  0xca   : > { %4468 = vmatprep.subr.msk.bf16.mxu1 %vm6410_vm7, %v7575_v13  ;;  %4390 = vmatprep.mubr.bf16.mxu0 %v5315_v62  ;;  %v6464_v62 = vpop.permute.xlu1 %729  ;;  %vm6474_vm3 = vmpackc.low %vm2413_vm1, %vm2412_vm0 }
  0xcb   : > { %4422 = vmatprep.mubr.bf16.mxu1 %v5325_v0 }
  0xcc   : > { %4437 = vmatpush3.bf16.msk.msra.mxu0 %vm6405_vm6, %v7575_v13  ;;  %vm2410_vm6 = vcmp.eq.s32.totalorder %v5043_v27, %v6280_v46 }
  0xcd   : > { %4469 = vmatpush3.bf16.msk.msra.mxu1 %vm6410_vm7, %v7575_v13  ;;  %4438 = vmatprep.subr.msk.bf16.mxu0 %vm6436_vm12, %v7575_v13  ;;  %vm2411_vm7 = vcmp.eq.s32.totalorder %v5046_v28, %v6280_v46 }
  0xce   : > { %4470 = vmatprep.subr.msk.bf16.mxu1 %vm6441_vm13, %v7575_v13  ;;  %vm6507_vm9 = vmpackc.low %vm2411_vm7, %vm2410_vm6  ;;  %v6515_v61 = vpop.permute.xlu1 %734 }
  0xcf   : > { %4391 = vmatmul.mubr.bf16.gmra.mxu0 %v5363_v16  ;;  %v6496_v16 = vpop.permute.xlu0 %724 }
  0xd0   : > { %4423 = vmatmul.mubr.bf16.gmra.mxu1 %v5379_v20  ;;  %4439 = vmatpush3.bf16.msk.msra.mxu0 %vm6436_vm12, %v7575_v13  ;;  %7760 = vst [vmem:[#allocation6_spill] sm:$0xff] %v6496_v16  ;;  %vm2408_vm12 = vcmp.eq.s32.totalorder %v4891_v4, %v6280_v46 }
  0xd1   : > { %4471 = vmatpush3.bf16.msk.msra.mxu1 %vm6441_vm13, %v7575_v13  ;;  %4440 = vmatprep.subr.msk.bf16.mxu0 %vm6469_vm2, %v7575_v13  ;;  %vm2409_vm13 = vcmp.eq.s32.totalorder %v5077_v31, %v6280_v46 }
  0xd2   : > { %4472 = vmatprep.subr.msk.bf16.mxu1 %vm6474_vm3, %v7575_v13  ;;  %4394 = vmatprep.mubr.bf16.mxu0 %v5404_v25  ;;  %v6525_v25 = vld [vmem:[%s4910_s18 + $0xd] ss:$0 sm:$0xff]  ;;  %vm6544_vm15 = vmpackc.low %vm2409_vm13, %vm2408_vm12 }
  0xd3   : > { %4426 = vmatprep.mubr.bf16.mxu1 %v5414_v29  ;;  %v6534_v29 = vld [vmem:[%s4910_s18 + $0xc] ss:$0 sm:$0xff]  ;;  %vm2826_vm0 = vcmp.eq.s32.totalorder %v4896_v5, %v6525_v25  ;;  %vm2827_vm1 = vcmp.eq.s32.totalorder %v4899_v6, %v6525_v25  ;;  %v6552_v11 = vpop.permute.xlu0 %831  ;;  %vm2824_vm6 = vcmp.eq.s32.totalorder %v4902_v7, %v6525_v25  ;;  %vm2825_vm7 = vcmp.eq.s32.totalorder %v4905_v8, %v6525_v25 }
  0xd4   : > { %4441 = vmatpush3.bf16.msk.msra.mxu0 %vm6469_vm2, %v7575_v13  ;;  %vm2782_vm2 = vcmp.eq.s32.totalorder %v4896_v5, %v6534_v29  ;;  %vm6574_vm4 = vmpackc.low %vm2827_vm1, %vm2826_vm0  ;;  %vm2822_vm12 = vcmp.eq.s32.totalorder %v4913_v9, %v6525_v25  ;;  %vm2823_vm13 = vcmp.eq.s32.totalorder %v4916_v10, %v6525_v25 }
  0xd5   : > { %4473 = vmatpush3.bf16.msk.msra.mxu1 %vm6474_vm3, %v7575_v13  ;;  %4442 = vmatprep.subr.msk.bf16.mxu0 %vm6502_vm8, %v7575_v13  ;;  %vm2783_vm3 = vcmp.eq.s32.totalorder %v4899_v6, %v6534_v29  ;;  %vm6605_vm10 = vmpackc.low %vm2825_vm7, %vm2824_vm6 }
  0xd6   : > { %4474 = vmatprep.subr.msk.bf16.mxu1 %vm6507_vm9, %v7575_v13  ;;  %vm6579_vm5 = vmpackc.low %vm2783_vm3, %vm2782_vm2  ;;  %vm2820_vm2 = vcmp.eq.s32.totalorder %v4946_v14, %v6525_v25  ;;  %vm2821_vm3 = vcmp.eq.s32.totalorder %v4949_v15, %v6525_v25 }
  0xd7   : > { %4395 = vmatmul.mubr.bf16.gmra.mxu0 %v5452_v34  ;;  %v6568_v34 = vpop.permute.xlu1 %836  ;;  %v6600_v17 = vpop.permute.xlu0 %739  ;;  %vm6653_vm0 = vmpackc.low %vm2823_vm13, %vm2822_vm12 }
  0xd8   : > { %4427 = vmatmul.mubr.bf16.gmra.mxu1 %v5468_v36  ;;  %4443 = vmatpush3.bf16.msk.msra.mxu0 %vm6502_vm8, %v7575_v13  ;;  %vm2780_vm8 = vcmp.eq.s32.totalorder %v4902_v7, %v6534_v29  ;;  %vm6691_vm6 = vmpackc.low %vm2821_vm3, %vm2820_vm2 }
  0xd9   : > { %4475 = vmatpush3.bf16.msk.msra.mxu1 %vm6507_vm9, %v7575_v13  ;;  %4444 = vmatprep.subr.msk.bf16.mxu0 %vm6539_vm14, %v7575_v13  ;;  %vm2781_vm9 = vcmp.eq.s32.totalorder %v4905_v8, %v6534_v29 }
  0xda   : > { %4476 = vmatprep.subr.msk.bf16.mxu1 %vm6544_vm15, %v7575_v13  ;;  %4446 = vmatprep.mubr.bf16.mxu0 %v6062_v21  ;;  %vm6615_vm11 = vmpackc.low %vm2781_vm9, %vm2780_vm8  ;;  %vm2818_vm8 = vcmp.eq.s32.totalorder %v4979_v18, %v6525_v25  ;;  %vm2819_vm9 = vcmp.eq.s32.totalorder %v4982_v19, %v6525_v25 }
  0xdb   : > { %4478 = vmatprep.mubr.bf16.mxu1 %v6072_v26  ;;  %v6623_v33 = vpop.permute.xlu1 %841  ;;  %v6671_v41 = vpop.permute.xlu0 %744  ;;  %vm6739_vm12 = vmpackc.low %vm2819_vm9, %vm2818_vm8 }
  0xdc   : > { %4445 = vmatpush3.bf16.msk.msra.mxu0 %vm6539_vm14, %v7575_v13  ;;  %vm2778_vm14 = vcmp.eq.s32.totalorder %v4913_v9, %v6534_v29 }
  0xdd   : > { %4477 = vmatpush3.bf16.msk.msra.mxu1 %vm6544_vm15, %v7575_v13  ;;  %4494 = vmatprep.subr.msk.bf16.mxu0 %vm6574_vm4, %v7575_v13  ;;  %vm2779_vm15 = vcmp.eq.s32.totalorder %v4916_v10, %v6534_v29 }
  0xde   : > { %4526 = vmatprep.subr.msk.bf16.mxu1 %vm6579_vm5, %v7575_v13  ;;  %vm6663_vm1 = vmpackc.low %vm2779_vm15, %vm2778_vm14  ;;  %vm2816_vm14 = vcmp.eq.s32.totalorder %v5009_v23, %v6525_v25  ;;  %vm2817_vm15 = vcmp.eq.s32.totalorder %v5012_v24, %v6525_v25 }
  0xdf   : > { %4447 = vmatmul.mubr.bf16.vlgmr.msra.gmra.mxu0 %v6612_v30  ;;  %v6686_v42 = vpop.permute.xlu1 %846  ;;  %v6728_v46 = vpop.permute.xlu0 %749  ;;  %vm6775_vm2 = vmpackc.low %vm2817_vm15, %vm2816_vm14 }
  0xe0   : > { %4479 = vmatmul.mubr.bf16.vlgmr.msra.gmra.mxu1 %v6628_v35  ;;  %4495 = vmatpush3.bf16.msk.msra.mxu0 %vm6574_vm4, %v7575_v13  ;;  %vm2776_vm4 = vcmp.eq.s32.totalorder %v4946_v14, %v6534_v29 }
  0xe1   : > { %4527 = vmatpush3.bf16.msk.msra.mxu1 %vm6579_vm5, %v7575_v13  ;;  %4496 = vmatprep.subr.msk.bf16.mxu0 %vm6605_vm10, %v7575_v13  ;;  %vm2777_vm5 = vcmp.eq.s32.totalorder %v4949_v15, %v6534_v29 }
  0xe2   : > { %4528 = vmatprep.subr.msk.bf16.mxu1 %vm6615_vm11, %v7575_v13  ;;  %4450 = vmatprep.mubr.bf16.mxu0 %v6650_v37  ;;  %vm6701_vm7 = vmpackc.low %vm2777_vm5, %vm2776_vm4  ;;  %vm2814_vm4 = vcmp.eq.s32.totalorder %v5043_v27, %v6525_v25  ;;  %vm2815_vm5 = vcmp.eq.s32.totalorder %v5046_v28, %v6525_v25 }
  0xe3   : > { %4482 = vmatprep.mubr.bf16.mxu1 %v6660_v40  ;;  %v6757_v54 = vpop.permute.xlu1 %851  ;;  %v6793_v51 = vpop.permute.xlu0 %754  ;;  %vm6825_vm8 = vmpackc.low %vm2815_vm5, %vm2814_vm4 }
  0xe4   : > { %4497 = vmatpush3.bf16.msk.msra.mxu0 %vm6605_vm10, %v7575_v13  ;;  %vm2774_vm10 = vcmp.eq.s32.totalorder %v4979_v18, %v6534_v29 }
  0xe5   : > { %4529 = vmatpush3.bf16.msk.msra.mxu1 %vm6615_vm11, %v7575_v13  ;;  %4498 = vmatprep.subr.msk.bf16.mxu0 %vm6653_vm0, %v7575_v13  ;;  %vm2775_vm11 = vcmp.eq.s32.totalorder %v4982_v19, %v6534_v29 }
  0xe6   : > { %4530 = vmatprep.subr.msk.bf16.mxu1 %vm6663_vm1, %v7575_v13  ;;  %vm6749_vm13 = vmpackc.low %vm2775_vm11, %vm2774_vm10  ;;  %vm2812_vm10 = vcmp.eq.s32.totalorder %v4891_v4, %v6525_v25  ;;  %vm2813_vm11 = vcmp.eq.s32.totalorder %v5077_v31, %v6525_v25 }
  0xe7   : > { %4451 = vmatmul.mubr.bf16.gmra.mxu0 %v6698_v44  ;;  %v6814_v57 = vpop.permute.xlu1 %856  ;;  %v6859_v25 = vpop.permute.xlu0 %759  ;;  %vm6867_vm14 = vmpackc.low %vm2813_vm11, %vm2812_vm10 }
  0xe8   : > { %4483 = vmatmul.mubr.bf16.gmra.mxu1 %v6712_v3  ;;  %4499 = vmatpush3.bf16.msk.msra.mxu0 %vm6653_vm0, %v7575_v13  ;;  %vm2772_vm0 = vcmp.eq.s32.totalorder %v5009_v23, %v6534_v29 }
  0xe9   : > { %4531 = vmatpush3.bf16.msk.msra.mxu1 %vm6663_vm1, %v7575_v13  ;;  %4500 = vmatprep.subr.msk.bf16.mxu0 %vm6691_vm6, %v7575_v13  ;;  %vm2773_vm1 = vcmp.eq.s32.totalorder %v5012_v24, %v6534_v29 }
  0xea   : > { %4532 = vmatprep.subr.msk.bf16.mxu1 %vm6701_vm7, %v7575_v13  ;;  %4454 = vmatprep.mubr.bf16.mxu0 %v6736_v47  ;;  %vm6785_vm3 = vmpackc.low %vm2773_vm1, %vm2772_vm0  ;;  %vm3186_vm0 = vcmp.eq.s32.totalorder %v4896_v5, %v6851_v60  ;;  %vm3187_vm1 = vcmp.eq.s32.totalorder %v4899_v6, %v6851_v60 }
  0xeb   : > { %4486 = vmatprep.mubr.bf16.mxu1 %v6746_v50  ;;  %v6885_v12 = vpop.permute.xlu1 %861  ;;  %vm6910_vm4 = vmpackc.low %vm3187_vm1, %vm3186_vm0 }
  0xec   : > { %4501 = vmatpush3.bf16.msk.msra.mxu0 %vm6691_vm6, %v7575_v13  ;;  %vm2770_vm6 = vcmp.eq.s32.totalorder %v5043_v27, %v6534_v29 }
  0xed   : > { %4533 = vmatpush3.bf16.msk.msra.mxu1 %vm6701_vm7, %v7575_v13  ;;  %4502 = vmatprep.subr.msk.bf16.mxu0 %vm6739_vm12, %v7575_v13  ;;  %vm2771_vm7 = vcmp.eq.s32.totalorder %v5046_v28, %v6534_v29 }
  0xee   : > { %4534 = vmatprep.subr.msk.bf16.mxu1 %vm6749_vm13, %v7575_v13  ;;  %vm6835_vm9 = vmpackc.low %vm2771_vm7, %vm2770_vm6  ;;  %vm3184_vm6 = vcmp.eq.s32.totalorder %v4902_v7, %v6851_v60  ;;  %vm3185_vm7 = vcmp.eq.s32.totalorder %v4905_v8, %v6851_v60 }
  0xef   : > { %4455 = vmatmul.mubr.bf16.gmra.mxu0 %v6782_v45  ;;  %v6938_v38 = vpop.permute.xlu1 %866  ;;  %vm6943_vm10 = vmpackc.low %vm3185_vm7, %vm3184_vm6 }
  0xf0   : > { %4487 = vmatmul.mubr.bf16.gmra.mxu1 %v6798_v53  ;;  %4503 = vmatpush3.bf16.msk.msra.mxu0 %vm6739_vm12, %v7575_v13  ;;  %vm2768_vm12 = vcmp.eq.s32.totalorder %v4891_v4, %v6534_v29 }
  0xf1   : > { %4535 = vmatpush3.bf16.msk.msra.mxu1 %vm6749_vm13, %v7575_v13  ;;  %4504 = vmatprep.subr.msk.bf16.mxu0 %vm6775_vm2, %v7575_v13  ;;  %vm2769_vm13 = vcmp.eq.s32.totalorder %v5077_v31, %v6534_v29 }
  0xf2   : > { %4536 = vmatprep.subr.msk.bf16.mxu1 %vm6785_vm3, %v7575_v13  ;;  %4458 = vmatprep.mubr.bf16.mxu0 %v6822_v59  ;;  %vm6877_vm15 = vmpackc.low %vm2769_vm13, %vm2768_vm12  ;;  %vm3182_vm12 = vcmp.eq.s32.totalorder %v4913_v9, %v6851_v60  ;;  %vm3183_vm13 = vcmp.eq.s32.totalorder %v4916_v10, %v6851_v60 }
  0xf3   : > { %4490 = vmatprep.mubr.bf16.mxu1 %v6832_v58  ;;  %vm6976_vm0 = vmpackc.low %vm3183_vm13, %vm3182_vm12  ;;  %v6985_v20 = vpop.permute.xlu1 %871  ;;  %vm3176_vm13 = vcmp.eq.s32.totalorder %v5009_v23, %v6851_v60 }
  0xf4   : > { %4505 = vmatpush3.bf16.msk.msra.mxu0 %vm6775_vm2, %v7575_v13  ;;  %vm3142_vm2 = vcmp.eq.s32.totalorder %v4896_v5, %v6862_v63 }
  0xf5   : > { %4537 = vmatpush3.bf16.msk.msra.mxu1 %vm6785_vm3, %v7575_v13  ;;  %4506 = vmatprep.subr.msk.bf16.mxu0 %vm6825_vm8, %v7575_v13  ;;  %vm3143_vm3 = vcmp.eq.s32.totalorder %v4899_v6, %v6862_v63  ;;  %v6919_v6 = vpop.permute.xlu0 %764 }
  0xf6   : > { %4538 = vmatprep.subr.msk.bf16.mxu1 %vm6835_vm9, %v7575_v13  ;;  %vm6915_vm5 = vmpackc.low %vm3143_vm3, %vm3142_vm2  ;;  %vm3180_vm2 = vcmp.eq.s32.totalorder %v4946_v14, %v6851_v60  ;;  %vm3181_vm3 = vcmp.eq.s32.totalorder %v4949_v15, %v6851_v60 }
  0xf7   : > { %4459 = vmatmul.mubr.bf16.gmra.mxu0 %v6874_v1  ;;  %vm7008_vm6 = vmpackc.low %vm3181_vm3, %vm3180_vm2  ;;  %vm3174_vm3 = vcmp.eq.s32.totalorder %v5043_v27, %v6851_v60 }
  0xf8   : > { %4491 = vmatmul.mubr.bf16.gmra.mxu1 %v6890_v22  ;;  %4507 = vmatpush3.bf16.msk.msra.mxu0 %vm6825_vm8, %v7575_v13  ;;  %vm3140_vm8 = vcmp.eq.s32.totalorder %v4902_v7, %v6862_v63 }
  0xf9   : > { %4539 = vmatpush3.bf16.msk.msra.mxu1 %vm6835_vm9, %v7575_v13  ;;  %4508 = vmatprep.subr.msk.bf16.mxu0 %vm6867_vm14, %v7575_v13  ;;  %vm3141_vm9 = vcmp.eq.s32.totalorder %v4905_v8, %v6862_v63  ;;  %v6970_v49 = vpop.permute.xlu0 %769 }
  0xfa   : > { %4540 = vmatprep.subr.msk.bf16.mxu1 %vm6877_vm15, %v7575_v13  ;;  %4510 = vmatprep.mubr.bf16.mxu0 %v6062_v21  ;;  %vm6948_vm11 = vmpackc.low %vm3141_vm9, %vm3140_vm8  ;;  %vm3178_vm8 = vcmp.eq.s32.totalorder %v4979_v18, %v6851_v60  ;;  %vm3179_vm9 = vcmp.eq.s32.totalorder %v4982_v19, %v6851_v60 }
  0xfb   : > { %4542 = vmatprep.mubr.bf16.mxu1 %v6072_v26  ;;  %vm7055_vm12 = vmpackc.low %vm3179_vm9, %vm3178_vm8  ;;  %vm3172_vm8 = vcmp.eq.s32.totalorder %v4891_v4, %v6851_v60 }
  0xfc   : > { %4509 = vmatpush3.bf16.msk.msra.mxu0 %vm6867_vm14, %v7575_v13  ;;  %vm3138_vm14 = vcmp.eq.s32.totalorder %v4913_v9, %v6862_v63  ;;  %v7043_v9 = vpop.permute.xlu1 %876 }
  0xfd   : > { %4541 = vmatpush3.bf16.msk.msra.mxu1 %vm6877_vm15, %v7575_v13  ;;  %4558 = vmatprep.subr.msk.bf16.mxu0 %vm6910_vm4, %v7575_v13  ;;  %vm3139_vm15 = vcmp.eq.s32.totalorder %v4916_v10, %v6862_v63  ;;  %v7014_v8 = vpop.permute.xlu0 %774 }
  0xfe   : > { %4590 = vmatprep.subr.msk.bf16.mxu1 %vm6915_vm5, %v7575_v13  ;;  %vm6981_vm1 = vmpackc.low %vm3139_vm15, %vm3138_vm14  ;;  %7816 = vst [vmem:[#allocation8_spill] sm:$0xff] %v7014_v8  ;;  %vm3177_vm15 = vcmp.eq.s32.totalorder %v5012_v24, %v6851_v60 }
  0xff   : > { %v4128_v7 = vpop.f32.mrf.mxu0  ;;  %4511 = vmatmul.mubr.bf16.vlgmr.msra.gmra.mxu0 %v6612_v30  ;;  %vm7101_vm2 = vmpackc.low %vm3177_vm15, %vm3176_vm13  ;;  %vm3129_vm13 = vcmp.eq.s32.totalorder %v5077_v31, %v6862_v63 }
 0x100   : > { %v4160_v43 = vpop.f32.mrf.mxu1  ;;  %4543 = vmatmul.mubr.bf16.vlgmr.msra.gmra.mxu1 %v6628_v35  ;;  %4559 = vmatpush3.bf16.msk.msra.mxu0 %vm6910_vm4, %v7575_v13  ;;  %vm3136_vm4 = vcmp.eq.s32.totalorder %v4946_v14, %v6862_v63 }
 0x101   : > { %4591 = vmatpush3.bf16.msk.msra.mxu1 %vm6915_vm5, %v7575_v13  ;;  %v509_v2 = vpop.f32.mrf.mxu0  ;;  %4560 = vmatprep.subr.msk.bf16.mxu0 %vm6943_vm10, %v7575_v13  ;;  %v663_v10 = vadd.f32 %v4160_v43, %v4128_v7  ;;  %vm3137_vm5 = vcmp.eq.s32.totalorder %v4949_v15, %v6862_v63  ;;  %v7087_v7 = vpop.permute.xlu0 %779 }
 0x102   : > { %v654_v52 = vpop.f32.mrf.mxu1  ;;  %4592 = vmatprep.subr.msk.bf16.mxu1 %vm6948_vm11, %v7575_v13  ;;  %4514 = vmatprep.mubr.bf16.mxu0 %v6650_v37  ;;  %vm7019_vm7 = vmpackc.low %vm3137_vm5, %vm3136_vm4  ;;  %vm3175_vm4 = vcmp.eq.s32.totalorder %v5046_v28, %v6851_v60 }
 0x103   : > { %v655_v55 = vadd.f32 %v654_v52, %v509_v2  ;;  %v4129_v48 = vpop.f32.mrf.mxu0  ;;  %4546 = vmatprep.mubr.bf16.mxu1 %v6660_v40  ;;  %v799_v15 = vadd.f32 %v6464_v62, %v663_v10  ;;  %vm7153_vm9 = vmpackc.low %vm3175_vm4, %vm3174_vm3 }
 0x104   : > { %v4161_v29 = vpop.f32.mrf.mxu1  ;;  %4561 = vmatpush3.bf16.msk.msra.mxu0 %vm6943_vm10, %v7575_v13  ;;  %vm3134_vm10 = vcmp.eq.s32.totalorder %v4979_v18, %v6862_v63 }
 0x105   : > { %v797_v36 = vadd.f32 %v6449_v56, %v655_v55  ;;  %v666_v32 = vadd.f32 %v4161_v29, %v4129_v48  ;;  %4593 = vmatpush3.bf16.msk.msra.mxu1 %vm6948_vm11, %v7575_v13  ;;  %v512_v5 = vpop.f32.mrf.mxu0  ;;  %4562 = vmatprep.subr.msk.bf16.mxu0 %vm6976_vm0, %v7575_v13  ;;  %vm3135_vm11 = vcmp.eq.s32.totalorder %v4982_v19, %v6862_v63 }
 0x106   : > { %v657_v39 = vpop.f32.mrf.mxu1  ;;  %4594 = vmatprep.subr.msk.bf16.mxu1 %vm6981_vm1, %v7575_v13  ;;  %vm7068_vm14 = vmpackc.low %vm3135_vm11, %vm3134_vm10  ;;  %vm3173_vm10 = vcmp.eq.s32.totalorder %v5077_v31, %v6851_v60 }
 0x107   : > { %v658_v43 = vadd.f32 %v657_v39, %v512_v5  ;;  %v4132_v2 = vpop.f32.mrf.mxu0  ;;  %4515 = vmatmul.mubr.bf16.gmra.mxu0 %v6698_v44  ;;  %v813_v14 = vmax.f32 %v797_v36, 0.0  ;;  %v800_v55 = vadd.f32 %v6515_v61, %v666_v32  ;;  %v815_v36 = vmax.f32 %v799_v15, 0.0 }
 0x108   : > { %v4164_v10 = vpop.f32.mrf.mxu1  ;;  %4547 = vmatmul.mubr.bf16.gmra.mxu1 %v6712_v3  ;;  %4563 = vmatpush3.bf16.msk.msra.mxu0 %vm6976_vm0, %v7575_v13  ;;  %vm3132_vm0 = vcmp.eq.s32.totalorder %v5009_v23, %v6862_v63 }
 0x109   : > { %v798_v48 = vadd.f32 %v6496_v16, %v658_v43  ;;  %4595 = vmatpush3.bf16.msk.msra.mxu1 %vm6981_vm1, %v7575_v13  ;;  %v525_v29 = vpop.f32.mrf.mxu0  ;;  %4564 = vmatprep.subr.msk.bf16.mxu0 %vm7008_vm6, %v7575_v13  ;;  %v679_v16 = vadd.f32 %v4164_v10, %v4132_v2  ;;  %vm3133_vm1 = vcmp.eq.s32.totalorder %v5012_v24, %v6862_v63  ;;  %v816_v19 = vmax.f32 %v800_v55, 0.0 }
 0x10a   : > { %v670_v5 = vpop.f32.mrf.mxu1  ;;  %4596 = vmatprep.subr.msk.bf16.mxu1 %vm7019_vm7, %v7575_v13  ;;  %4518 = vmatprep.mubr.bf16.mxu0 %v6736_v47  ;;  %v909_v18 = vmul.f32 %v6552_v11, %v813_v14  ;;  %v911_v14 = vmul.f32 %v6623_v33, %v815_v36  ;;  %vm7119_vm5 = vmpackc.low %vm3133_vm1, %vm3132_vm0 }
 0x10b   : > { %v814_v32 = vmax.f32 %v798_v48, 0.0  ;;  %v671_v39 = vadd.f32 %v670_v5, %v525_v29  ;;  %v4133_v43 = vpop.f32.mrf.mxu0  ;;  %4550 = vmatprep.mubr.bf16.mxu1 %v6746_v50  ;;  %v7823_v48 = vmov 1.0|1.0   ;;  %v803_v36 = vadd.f32 %v6728_v46, %v679_v16 }
 0x10c   : > { %v4165_v15 = vpop.f32.mrf.mxu1  ;;  %4565 = vmatpush3.bf16.msk.msra.mxu0 %vm7008_vm6, %v7823_v48  ;;  %vm3130_vm6 = vcmp.eq.s32.totalorder %v5043_v27, %v6862_v63  ;;  %v912_v23 = vmul.f32 %v6686_v42, %v816_v19 }
 0x10d   : > { %v910_v29 = vmul.f32 %v6568_v34, %v814_v32  ;;  %v801_v5 = vadd.f32 %v6600_v17, %v671_v39  ;;  %4597 = vmatpush3.bf16.msk.msra.mxu1 %vm7019_vm7, %v7823_v48  ;;  %v528_v2 = vpop.f32.mrf.mxu0  ;;  %4566 = vmatprep.subr.msk.bf16.mxu0 %vm7055_vm12, %v7823_v48  ;;  %v682_v10 = vadd.f32 %v4165_v15, %v4133_v43  ;;  %v7111_v43 = vpop.permute.xlu1 %881 }
 0x10e   : > { %v673_v50 = vpop.f32.mrf.mxu1  ;;  %4598 = vmatprep.subr.msk.bf16.mxu1 %vm7068_vm14, %v7823_v48  ;;  %vm3131_vm7 = vcmp.eq.s32.totalorder %v5046_v28, %v6862_v63 }
 0x10f   : > { %v925_v55 = vadd.f32 %v910_v29, %v909_v18  ;;  %v817_v32 = vmax.f32 %v801_v5, 0.0  ;;  %v4136_v39 = vpop.f32.mrf.mxu0  ;;  %4519 = vmatmul.mubr.bf16.gmra.mxu0 %v6782_v45  ;;  %v674_v18 = vadd.f32 %v673_v50, %v528_v2  ;;  %v804_v16 = vadd.f32 %v6793_v51, %v682_v10  ;;  %vm7169_vm11 = vmpackc.low %vm3131_vm7, %vm3130_vm6 }
 0x110   : > { %v4168_v29 = vpop.f32.mrf.mxu1  ;;  %4551 = vmatmul.mubr.bf16.gmra.mxu1 %v6798_v53  ;;  %4567 = vmatpush3.bf16.msk.msra.mxu0 %vm7055_vm12, %v7823_v48  ;;  %vm3128_vm12 = vcmp.eq.s32.totalorder %v4891_v4, %v6862_v63 }
 0x111   : > { %v926_v24 = vadd.f32 %v925_v55, %v911_v14  ;;  %4599 = vmatpush3.bf16.msk.msra.mxu1 %vm7068_vm14, %v7823_v48  ;;  %v541_v5 = vpop.f32.mrf.mxu0  ;;  %4568 = vmatprep.subr.msk.bf16.mxu0 %vm7101_vm2, %v7823_v48  ;;  %v802_v50 = vadd.f32 %v6671_v41, %v674_v18  ;;  %v913_v19 = vmul.f32 %v6757_v54, %v817_v32  ;;  %v7160_v14 = vpop.permute.xlu0 %784  ;;  %v819_v32 = vmax.f32 %v803_v36, 0.0  ;;  %vm7199_vm14 = vmpackc.low %vm3173_vm10, %vm3172_vm8 }
 0x112   : > { %v686_v0 = vpop.f32.mrf.mxu1  ;;  %4600 = vmatprep.subr.msk.bf16.mxu1 %vm7119_vm5, %v7823_v48  ;;  %4522 = vmatprep.mubr.bf16.mxu0 %v6822_v59  ;;  %vm7210_vm15 = vmpackc.low %vm3129_vm13, %vm3128_vm12 }
 0x113   : > { %v927_v2 = vadd.f32 %v926_v24, %v912_v23  ;;  %v687_v10 = vadd.f32 %v686_v0, %v541_v5  ;;  %v4137_v55 = vpop.f32.mrf.mxu0  ;;  %4554 = vmatprep.mubr.bf16.mxu1 %v6832_v58  ;;  %v818_v23 = vmax.f32 %v802_v50, 0.0  ;;  %v695_v24 = vadd.f32 %v4168_v29, %v4136_v39  ;;  %v7184_v0 = vpop.permute.xlu1 %886 }
 0x114   : > { %v4169_v5 = vpop.f32.mrf.mxu1  ;;  %4569 = vmatpush3.bf16.msk.msra.mxu0 %vm7101_vm2, %v7823_v48  ;;  %v820_v39 = vmax.f32 %v804_v16, 0.0  ;;  %v915_v60 = vmul.f32 %v6885_v12, %v819_v32 }
 0x115   : > { %v928_v27 = vadd.f32 %v927_v2, %v913_v19  ;;  %v805_v28 = vadd.f32 %v6859_v25, %v687_v10  ;;  %4601 = vmatpush3.bf16.msk.msra.mxu1 %vm7119_vm5, %v7823_v48  ;;  %v544_v36 = vpop.f32.mrf.mxu0  ;;  %4570 = vmatprep.subr.msk.bf16.mxu0 %vm7153_vm9, %v7823_v48  ;;  %v914_v52 = vmul.f32 %v6814_v57, %v818_v23  ;;  %v7221_v31 = vpop.permute.xlu0 %789 }
 0x116   : > { %v698_v29 = vadd.f32 %v4169_v5, %v4137_v55  ;;  %v689_v50 = vpop.f32.mrf.mxu1  ;;  %4602 = vmatprep.subr.msk.bf16.mxu1 %vm7169_vm11, %v7823_v48  ;;  %v807_v55 = vadd.f32 %v6970_v49, %v695_v24  ;;  %v916_v32 = vmul.f32 %v6938_v38, %v820_v39 }
 0x117   : > { %v690_v19 = vadd.f32 %v689_v50, %v544_v36  ;;  %v4140_v16 = vpop.f32.mrf.mxu0  ;;  %4523 = vmatmul.mubr.bf16.gmra.mxu0 %v6874_v1  ;;  %v929_v10 = vadd.f32 %v928_v27, %v914_v52  ;;  %v821_v23 = vmax.f32 %v805_v28, 0.0  ;;  %v7235_v18 = vpop.permute.xlu1 %891 }
 0x118   : > { %v4172_v5 = vpop.f32.mrf.mxu1  ;;  %4555 = vmatmul.mubr.bf16.gmra.mxu1 %v6890_v22  ;;  %4571 = vmatpush3.bf16.msk.msra.mxu0 %vm7153_vm9, %v7823_v48  ;;  %v808_v27 = vadd.f32 %v7014_v8, %v698_v29 }
 0x119   : > { %v806_v36 = vadd.f32 %v6919_v6, %v690_v19  ;;  %4603 = vmatpush3.bf16.msk.msra.mxu1 %vm7169_vm11, %v7823_v48  ;;  %v557_v63 = vpop.f32.mrf.mxu0  ;;  %4572 = vmatprep.subr.msk.bf16.mxu0 %vm7199_vm14, %v7823_v48  ;;  %v930_v24 = vadd.f32 %v929_v10, %v915_v60  ;;  %v823_v19 = vmax.f32 %v807_v55, 0.0  ;;  %v917_v39 = vmul.f32 %v6985_v20, %v821_v23 }
 0x11a   : > { %v702_v13 = vpop.f32.mrf.mxu1  ;;  %4604 = vmatprep.subr.msk.bf16.mxu1 %vm7210_vm15, %v7823_v48  ;;  %4574 = vmatprep.mubr.bf16.mxu0 %v6062_v21  ;;  %v711_v10 = vadd.f32 %v4172_v5, %v4140_v16  ;;  %v824_v55 = vmax.f32 %v808_v27, 0.0 }
 0x11b   : > { %v822_v28 = vmax.f32 %v806_v36, 0.0  ;;  %v703_v52 = vadd.f32 %v702_v13, %v557_v63  ;;  %v4141_v50 = vpop.f32.mrf.mxu0  ;;  %4606 = vmatprep.mubr.bf16.mxu1 %v6072_v26  ;;  %v931_v60 = vadd.f32 %v930_v24, %v916_v32  ;;  %v7247_v32 = vpop.permute.xlu0 %794  ;;  %v919_v15 = vmul.f32 %v7111_v43, %v823_v19 }
 0x11c   : > { %v4173_v29 = vpop.f32.mrf.mxu1  ;;  %4573 = vmatpush3.bf16.msk.msra.mxu0 %vm7199_vm14, %v7823_v48  ;;  %v811_v13 = vadd.f32 %v7221_v31, %v711_v10 }
 0x11d   : > { %v918_v8 = vmul.f32 %v7043_v9, %v822_v28  ;;  %v809_v21 = vadd.f32 %v7087_v7, %v703_v52  ;;  %4605 = vmatpush3.bf16.msk.msra.mxu1 %vm7210_vm15, %v7823_v48  ;;  %v560_v36 = vpop.f32.mrf.mxu0  ;;  %v932_v26 = vadd.f32 %v931_v60, %v917_v39  ;;  %v714_v63 = vadd.f32 %v4173_v29, %v4141_v50  ;;  %v7254_v48 = vpop.permute.xlu1 %896 }
 0x11e   : > { %v705_v23 = vpop.f32.mrf.mxu1 }
 0x11f   : > { %v706_v16 = vadd.f32 %v705_v23, %v560_v36  ;;  %v4192_v5 = vpop.f32.mrf.mxu0  ;;  %4575 = vmatmul.mubr.bf16.vlgmr.msra.gmra.mxu0 %v6612_v30  ;;  %v933_v24 = vadd.f32 %v932_v26, %v918_v8  ;;  %v825_v28 = vmax.f32 %v809_v21, 0.0  ;;  %v920_v30 = vmul.f32 %v7184_v0, %v824_v55  ;;  %v7262_v23 = vpop.permute.xlu0 %901 }
 0x120   : > { %v4224_v52 = vpop.f32.mrf.mxu1  ;;  %4607 = vmatmul.mubr.bf16.vlgmr.msra.gmra.mxu1 %v6628_v35  ;;  %4578 = vmatprep.mubr.bf16.mxu0 %v6650_v37  ;;  %v812_v8 = vadd.f32 %v7247_v32, %v714_v63  ;;  %v827_v35 = vmax.f32 %v811_v13, 0.0 }
 0x121   : > { %v810_v2 = vadd.f32 %v7160_v14, %v706_v16  ;;  %v1086_v27 = vpop.f32.mrf.mxu0  ;;  %4610 = vmatprep.mubr.bf16.mxu1 %v6660_v40  ;;  %v934_v50 = vadd.f32 %v933_v24, %v919_v15  ;;  %v1192_v60 = vadd.f32 %v4224_v52, %v4192_v5  ;;  %v921_v37 = vmul.f32 %v7235_v18, %v825_v28  ;;  %v7266_v52 = vpop.permute.xlu1 %906 }
 0x122   : > { %v1183_v19 = vpop.f32.mrf.mxu1  ;;  %v828_v63 = vmax.f32 %v812_v8, 0.0 }
 0x123   : > { %v826_v39 = vmax.f32 %v810_v2, 0.0  ;;  %v1184_v10 = vadd.f32 %v1183_v19, %v1086_v27  ;;  %v4193_v29 = vpop.f32.mrf.mxu0  ;;  %v935_v21 = vadd.f32 %v934_v50, %v920_v30  ;;  %v1248_v5 = vadd.f32 %v1192_v60, %v6464_v62  ;;  %v7836_v19 = vld [vmem:[#allocation6_spill] sm:$0xff] }
 0x124   : > { %v4225_v36 = vpop.f32.mrf.mxu1  ;;  %v923_v27 = vmul.f32 %v7262_v23, %v827_v35 }
 0x125   : > { %v922_v26 = vmul.f32 %v7254_v48, %v826_v39  ;;  %v1246_v40 = vadd.f32 %v1184_v10, %v6449_v56  ;;  %v1195_v16 = vadd.f32 %v4225_v36, %v4193_v29  ;;  %v1089_v55 = vpop.f32.mrf.mxu0  ;;  %v936_v15 = vadd.f32 %v935_v21, %v921_v37  ;;  %v7837_v10 = vld [vmem:[#allocation7_spill] sm:$0xff] }
 0x126   : > { %v1186_v24 = vpop.f32.mrf.mxu1  ;;  %v924_v29 = vmul.f32 %v7266_v52, %v828_v63  ;;  %v1264_v21 = vmax.f32 %v1248_v5, 0.0 }
 0x127   : > { %v1187_v13 = vadd.f32 %v1186_v24, %v1089_v55  ;;  %v4196_v2 = vpop.f32.mrf.mxu0  ;;  %4579 = vmatmul.mubr.bf16.gmra.mxu0 %v6698_v44  ;;  %v937_v28 = vadd.f32 %v936_v15, %v922_v26  ;;  %v1262_v30 = vmax.f32 %v1246_v40, 0.0  ;;  %v1249_v8 = vadd.f32 %v1195_v16, %v6515_v61 }
 0x128   : > { %v4228_v50 = vpop.f32.mrf.mxu1  ;;  %4611 = vmatmul.mubr.bf16.gmra.mxu1 %v6712_v3  ;;  %4582 = vmatprep.mubr.bf16.mxu0 %v6736_v47 }
 0x129   : > { %v1247_v39 = vadd.f32 %v1187_v13, %v7836_v19  ;;  %v1102_v60 = vpop.f32.mrf.mxu0  ;;  %4614 = vmatprep.mubr.bf16.mxu1 %v7837_v10  ;;  %v938_v37 = vadd.f32 %v937_v28, %v923_v27  ;;  %v1208_v3 = vadd.f32 %v4228_v50, %v4196_v2  ;;  %v1278_v47 = vmul.f32 %v1262_v30, %v6552_v11 }
 0x12a   : > { %v1199_v44 = vpop.f32.mrf.mxu1  ;;  %v1265_v40 = vmax.f32 %v1249_v8, 0.0  ;;  %v1280_v28 = vmul.f32 %v1264_v21, %v6623_v33 }
 0x12b   : > { %v1263_v36 = vmax.f32 %v1247_v39, 0.0  ;;  %v1200_v35 = vadd.f32 %v1199_v44, %v1102_v60  ;;  %v4197_v26 = vpop.f32.mrf.mxu0  ;;  %v939_v55 = vadd.f32 %v938_v37, %v924_v29  ;;  %v1252_v50 = vadd.f32 %v1208_v3, %v6728_v46 }
 0x12c   : > { %v4229_v15 = vpop.f32.mrf.mxu1  ;;  %v1281_v60 = vmul.f32 %v1265_v40, %v6686_v42  ;;  %v953_v44 = vsub.s32 0, %v4891_v4 }
 0x12d   : > { %v1279_v16 = vmul.f32 %v1263_v36, %v6568_v34  ;;  %v1250_v24 = vadd.f32 %v1200_v35, %v6600_v17  ;;  %v1105_v13 = vpop.f32.mrf.mxu0  ;;  %v940_v10 = vrot.slane %v939_v55, 4  ;;  %v1211_v19 = vadd.f32 %v4229_v15, %v4197_v26  ;;  %v949_v26 = vpop.permute.xlu0 %948 }
 0x12e   : > { %v1202_v63 = vpop.f32.mrf.mxu1  ;;  %v1268_v40 = vmax.f32 %v1252_v50, 0.0 }
 0x12f   : > { %v1294_v5 = vadd.f32 %v1279_v16, %v1278_v47  ;;  %v1266_v27 = vmax.f32 %v1250_v24, 0.0  ;;  %v4200_v39 = vpop.f32.mrf.mxu0  ;;  %4583 = vmatmul.mubr.bf16.gmra.mxu0 %v6782_v45  ;;  %v941_v2 = vadd.f32 %v940_v10, %v939_v55  ;;  %v1203_v30 = vadd.f32 %v1202_v63, %v1105_v13 }
 0x130   : > { %v4232_v8 = vpop.f32.mrf.mxu1  ;;  %4615 = vmatmul.mubr.bf16.gmra.mxu1 %v6798_v53  ;;  %4586 = vmatprep.mubr.bf16.mxu0 %v6822_v59  ;;  %v1253_v45 = vadd.f32 %v1211_v19, %v6793_v51  ;;  %v7291_v13 = vrot.slane %v949_v26, %v953_v44  ;;  %v1284_v50 = vmul.f32 %v1268_v40, %v6885_v12 }
 0x131   : > { %v1295_v29 = vadd.f32 %v1294_v5, %v1280_v28  ;;  %v1118_v37 = vpop.f32.mrf.mxu0  ;;  %4618 = vmatprep.mubr.bf16.mxu1 %v6832_v58  ;;  %v942_v21 = vrot.slane %v941_v2, 2  ;;  %v1251_v36 = vadd.f32 %v1203_v30, %v6671_v41  ;;  %v1282_v55 = vmul.f32 %v1266_v27, %v6757_v54 }
 0x132   : > { %v1215_v35 = vpop.f32.mrf.mxu1  ;;  %v1224_v3 = vadd.f32 %v4232_v8, %v4200_v39  ;;  %v1269_v63 = vmax.f32 %v1253_v45, 0.0 }
 0x133   : > { %v1296_v53 = vadd.f32 %v1295_v29, %v1281_v60  ;;  %v1216_v59 = vadd.f32 %v1215_v35, %v1118_v37  ;;  %v4201_v15 = vpop.f32.mrf.mxu0  ;;  %v943_v47 = vadd.f32 %v942_v21, %v941_v2  ;;  %v1267_v16 = vmax.f32 %v1251_v36, 0.0  ;;  %v7838_v35 = vld [vmem:[#allocation8_spill] sm:$0xff] }
 0x134   : > { %v4233_v24 = vpop.f32.mrf.mxu1  ;;  %v1256_v39 = vadd.f32 %v1224_v3, %v6970_v49  ;;  %v1285_v45 = vmul.f32 %v1269_v63, %v6938_v38 }
 0x135   : > { %v1297_v4 = vadd.f32 %v1296_v53, %v1282_v55  ;;  %v1254_v58 = vadd.f32 %v1216_v59, %v6859_v25  ;;  %v1121_v19 = vpop.f32.mrf.mxu0  ;;  %v944_v10 = vrot.slane %v943_v47, 1  ;;  %v1283_v28 = vmul.f32 %v1267_v16, %v6814_v57 }
 0x136   : > { %v1227_v5 = vadd.f32 %v4233_v24, %v4201_v15  ;;  %v1218_v27 = vpop.f32.mrf.mxu1 }
 0x137   : > { %v1219_v30 = vadd.f32 %v1218_v27, %v1121_v19  ;;  %v4204_v8 = vpop.f32.mrf.mxu0  ;;  %4587 = vmatmul.mubr.bf16.gmra.mxu0 %v6874_v1  ;;  %v945_v2 = vadd.f32 %v944_v10, %v943_v47  ;;  %v1298_v60 = vadd.f32 %v1297_v4, %v1283_v28  ;;  %v1270_v29 = vmax.f32 %v1254_v58, 0.0 }
 0x138   : > { %v4236_v37 = vpop.f32.mrf.mxu1  ;;  %4619 = vmatmul.mubr.bf16.gmra.mxu1 %v6890_v22  ;;  %v1257_v26 = vadd.f32 %v1227_v5, %v7838_v35  ;;  %v1272_v1 = vmax.f32 %v1256_v39, 0.0 }
 0x139   : > { %v1255_v44 = vadd.f32 %v1219_v30, %v6919_v6  ;;  %v1134_v21 = vpop.f32.mrf.mxu0  ;;  %v1299_v36 = vadd.f32 %v1298_v60, %v1284_v50  ;;  %v955_v55 = vadd.f32 %v7291_v13, %v945_v2  ;;  %v1286_v47 = vmul.f32 %v1270_v29, %v6985_v20 }
 0x13a   : > { %v1231_v53 = vpop.f32.mrf.mxu1  ;;  %v1240_v22 = vadd.f32 %v4236_v37, %v4204_v8  ;;  %v1273_v63 = vmax.f32 %v1257_v26, 0.0  ;;  %v1288_v39 = vmul.f32 %v1272_v1, %v7111_v43 }
 0x13b   : > { %v1271_v3 = vmax.f32 %v1255_v44, 0.0  ;;  %v1232_v59 = vadd.f32 %v1231_v53, %v1134_v21  ;;  %v4205_v15 = vpop.f32.mrf.mxu0  ;;  %v1300_v40 = vadd.f32 %v1299_v36, %v1285_v45  ;;  %v956_v16 = vsub.f32 0.0, %v955_v55 }
 0x13c   : > { %v4237_v24 = vpop.f32.mrf.mxu1  ;;  %v1260_v60 = vadd.f32 %v1240_v22, %v7221_v31  ;;  %v1289_v21 = vmul.f32 %v1273_v63, %v7184_v0 }
 0x13d   : > { %v1287_v4 = vmul.f32 %v1271_v3, %v7043_v9  ;;  %v1258_v58 = vadd.f32 %v1232_v59, %v7087_v7  ;;  %v1137_v19 = vpop.f32.mrf.mxu0  ;;  %v1301_v10 = vadd.f32 %v1300_v40, %v1286_v47  ;;  %v957_v28 = vmul.f32 1.442695, %v956_v16 }
 0x13e   : > { %v1243_v5 = vadd.f32 %v4237_v24, %v4205_v15  ;;  %v1234_v27 = vpop.f32.mrf.mxu1  ;;  %v1276_v59 = vmax.f32 %v1260_v60, 0.0  ;;  %v7839_v60 = vld [vmem:[#allocation6_spill] sm:$0xff] }
 0x13f   : > { %v1235_v30 = vadd.f32 %v1234_v27, %v1137_v19  ;;  %v4256_v2 = vpop.f32.mrf.mxu0  ;;  %4681 = vpow2.f32 %v957_v28  ;;  %v1302_v50 = vadd.f32 %v1301_v10, %v1287_v4  ;;  %v1274_v8 = vmax.f32 %v1258_v58, 0.0 }
 0x140   : > { %v4288_v29 = vpop.f32.mrf.mxu1  ;;  %v1261_v36 = vadd.f32 %v1243_v5, %v7247_v32  ;;  %v1292_v27 = vmul.f32 %v1276_v59, %v7262_v23 }
 0x141   : > { %v1259_v37 = vadd.f32 %v1235_v30, %v7160_v14  ;;  %v1446_v44 = vpop.f32.mrf.mxu0  ;;  %v1303_v45 = vadd.f32 %v1302_v50, %v1288_v39  ;;  %v1552_v53 = vadd.f32 %v4288_v29, %v4256_v2  ;;  %v1290_v15 = vmul.f32 %v1274_v8, %v7235_v18 }
 0x142   : > { %v1543_v26 = vpop.f32.mrf.mxu1  ;;  %v1277_v19 = vmax.f32 %v1261_v36, 0.0 }
 0x143   : > { %v1275_v55 = vmax.f32 %v1259_v37, 0.0  ;;  %v1544_v1 = vadd.f32 %v1543_v26, %v1446_v44  ;;  %v4257_v3 = vpop.f32.mrf.mxu0  ;;  %v1304_v47 = vadd.f32 %v1303_v45, %v1289_v21  ;;  %v1608_v63 = vadd.f32 %v1552_v53, %v6464_v62 }
 0x144   : > { %v4289_v40 = vpop.f32.mrf.mxu1  ;;  %v1293_v37 = vmul.f32 %v1277_v19, %v7266_v52 }
 0x145   : > { %v1291_v16 = vmul.f32 %v1275_v55, %v7254_v48  ;;  %v1606_v22 = vadd.f32 %v1544_v1, %v6449_v56  ;;  %v1555_v24 = vadd.f32 %v4289_v40, %v4257_v3  ;;  %v1449_v4 = vpop.f32.mrf.mxu0  ;;  %v1305_v58 = vadd.f32 %v1304_v47, %v1290_v15 }
 0x146   : > { %v1546_v10 = vpop.f32.mrf.mxu1  ;;  %v1624_v45 = vmax.f32 %v1608_v63, 0.0 }
 0x147   : > { %v1547_v28 = vadd.f32 %v1546_v10, %v1449_v4  ;;  %v4260_v5 = vpop.f32.mrf.mxu0  ;;  %v1306_v39 = vadd.f32 %v1305_v58, %v1291_v16  ;;  %v1622_v2 = vmax.f32 %v1606_v22, 0.0  ;;  %v1609_v50 = vadd.f32 %v1555_v24, %v6515_v61 }
 0x148   : > { %v4292_v30 = vpop.f32.mrf.mxu1  ;;  %v1640_v10 = vmul.f32 %v1624_v45, %v6623_v33 }
 0x149   : > { %v1607_v8 = vadd.f32 %v1547_v28, %v7839_v60  ;;  %v1462_v29 = vpop.f32.mrf.mxu0  ;;  %v1307_v44 = vadd.f32 %v1306_v39, %v1292_v27  ;;  %v1568_v1 = vadd.f32 %v4292_v30, %v4260_v5  ;;  %v1638_v15 = vmul.f32 %v1622_v2, %v6552_v11 }
 0x14a   : > { %v1559_v21 = vpop.f32.mrf.mxu1  ;;  %v1625_v47 = vmax.f32 %v1609_v50, 0.0 }
 0x14b   : > { %v1623_v36 = vmax.f32 %v1607_v8, 0.0  ;;  %v1560_v26 = vadd.f32 %v1559_v21, %v1462_v29  ;;  %v4261_v55 = vpop.f32.mrf.mxu0  ;;  %v1308_v53 = vadd.f32 %v1307_v44, %v1293_v37  ;;  %v1612_v39 = vadd.f32 %v1568_v1, %v6728_v46 }
 0x14c   : > { %v4293_v3 = vpop.f32.mrf.mxu1  ;;  %v4682_v59 = vpop.eup %4681  ;;  %v1641_v50 = vmul.f32 %v1625_v47, %v6686_v42 }
 0x14d   : > { %v1639_v40 = vmul.f32 %v1623_v36, %v6568_v34  ;;  %v1610_v16 = vadd.f32 %v1560_v26, %v6600_v17  ;;  %v1465_v22 = vpop.f32.mrf.mxu0  ;;  %v959_v24 = vadd.f32 1.0, %v4682_v59  ;;  %v1309_v4 = vrot.slane %v1308_v53, 4 }
 0x14e   : > { %v1571_v58 = vadd.f32 %v4293_v3, %v4261_v55  ;;  %v1562_v19 = vpop.f32.mrf.mxu1  ;;  %v1628_v59 = vmax.f32 %v1612_v39, 0.0 }
 0x14f   : > { %v1654_v63 = vadd.f32 %v1639_v40, %v1638_v15  ;;  %v1626_v28 = vmax.f32 %v1610_v16, 0.0  ;;  %v4264_v27 = vpop.f32.mrf.mxu0  ;;  %4683 = vrcp.f32 %v959_v24  ;;  %v1310_v5 = vadd.f32 %v1309_v4, %v1308_v53 }
 0x150   : > { %v1563_v30 = vadd.f32 %v1562_v19, %v1465_v22  ;;  %v4296_v2 = vpop.f32.mrf.mxu1  ;;  %v1613_v44 = vadd.f32 %v1571_v58, %v6793_v51  ;;  %v1644_v39 = vmul.f32 %v1628_v59, %v6885_v12 }
 0x151   : > { %v1655_v8 = vadd.f32 %v1654_v63, %v1640_v10  ;;  %v1478_v29 = vpop.f32.mrf.mxu0  ;;  %v1311_v37 = vrot.slane %v1310_v5, 2  ;;  %v1642_v36 = vmul.f32 %v1626_v28, %v6757_v54  ;;  %v1584_v55 = vadd.f32 %v4296_v2, %v4264_v27 }
 0x152   : > { %v1611_v21 = vadd.f32 %v1563_v30, %v6671_v41  ;;  %v1575_v45 = vpop.f32.mrf.mxu1  ;;  %v1629_v4 = vmax.f32 %v1613_v44, 0.0 }
 0x153   : > { %v1656_v26 = vadd.f32 %v1655_v8, %v1641_v50  ;;  %v1576_v53 = vadd.f32 %v1575_v45, %v1478_v29  ;;  %v4265_v3 = vpop.f32.mrf.mxu0  ;;  %v1312_v1 = vadd.f32 %v1311_v37, %v1310_v5  ;;  %v1616_v63 = vadd.f32 %v1584_v55, %v6970_v49 }
 0x154   : > { %v1627_v15 = vmax.f32 %v1611_v21, 0.0  ;;  %v4297_v40 = vpop.f32.mrf.mxu1  ;;  %v1645_v44 = vmul.f32 %v1629_v4, %v6938_v38 }
 0x155   : > { %v1657_v47 = vadd.f32 %v1656_v26, %v1642_v36  ;;  %v1614_v16 = vadd.f32 %v1576_v53, %v6859_v25  ;;  %v1481_v22 = vpop.f32.mrf.mxu0  ;;  %v1313_v24 = vrot.slane %v1312_v1, 1  ;;  %v1587_v19 = vadd.f32 %v4297_v40, %v4265_v3 }
 0x156   : > { %v1643_v58 = vmul.f32 %v1627_v15, %v6814_v57  ;;  %v1578_v10 = vpop.f32.mrf.mxu1  ;;  %v1632_v26 = vmax.f32 %v1616_v63, 0.0 }
 0x157   : > { %v1579_v28 = vadd.f32 %v1578_v10, %v1481_v22  ;;  %v4268_v27 = vpop.f32.mrf.mxu0  ;;  %v1314_v5 = vadd.f32 %v1313_v24, %v1312_v1  ;;  %v1630_v2 = vmax.f32 %v1614_v16, 0.0  ;;  %v1617_v45 = vadd.f32 %v1587_v19, %v7838_v35 }
 0x158   : > { %v1658_v30 = vadd.f32 %v1657_v47, %v1643_v58  ;;  %v4300_v50 = vpop.f32.mrf.mxu1 }
 0x159   : > { %v1615_v8 = vadd.f32 %v1579_v28, %v6919_v6  ;;  %v1494_v29 = vpop.f32.mrf.mxu0  ;;  %v1315_v37 = vadd.f32 %v1314_v5, %v7291_v13  ;;  %v1646_v59 = vmul.f32 %v1630_v2, %v6985_v20  ;;  %v1600_v40 = vadd.f32 %v4300_v50, %v4268_v27 }
 0x15a   : > { %v1659_v21 = vadd.f32 %v1658_v30, %v1644_v39  ;;  %v1591_v36 = vpop.f32.mrf.mxu1  ;;  %v1633_v19 = vmax.f32 %v1617_v45, 0.0  ;;  %v1648_v5 = vmul.f32 %v1632_v26, %v7111_v43 }
 0x15b   : > { %v1631_v55 = vmax.f32 %v1615_v8, 0.0  ;;  %v1592_v53 = vadd.f32 %v1591_v36, %v1494_v29  ;;  %v4269_v3 = vpop.f32.mrf.mxu0  ;;  %v1316_v1 = vsub.f32 0.0, %v1315_v37  ;;  %v1620_v2 = vadd.f32 %v1600_v40, %v7221_v31 }
 0x15c   : > { %v1660_v15 = vadd.f32 %v1659_v21, %v1645_v44  ;;  %v4301_v47 = vpop.f32.mrf.mxu1  ;;  %v4684_v16 = vpop.eup %4683  ;;  %v1649_v44 = vmul.f32 %v1633_v19, %v7184_v0 }
 0x15d   : > { %v1647_v22 = vmul.f32 %v1631_v55, %v7043_v9  ;;  %v1618_v24 = vadd.f32 %v1592_v53, %v7087_v7  ;;  %v1497_v4 = vpop.f32.mrf.mxu0  ;;  %v1317_v58 = vmul.f32 1.442695, %v1316_v1  ;;  %v1603_v28 = vadd.f32 %v4301_v47, %v4269_v3  ;;  %961 = vst [vmem:[%s7341_s29] sm:$0x1] %v4684_v16 }
 0x15e   : > { %v1661_v10 = vadd.f32 %v1660_v15, %v1646_v59  ;;  %v1594_v63 = vpop.f32.mrf.mxu1  ;;  %v1636_v1 = vmax.f32 %v1620_v2, 0.0 }
 0x15f   : > { %v1595_v39 = vadd.f32 %v1594_v63, %v1497_v4  ;;  %v4320_v27 = vpop.f32.mrf.mxu0  ;;  %4685 = vpow2.f32 %v1317_v58  ;;  %v1634_v50 = vmax.f32 %v1618_v24, 0.0  ;;  %v1621_v45 = vadd.f32 %v1603_v28, %v7247_v32 }
 0x160   : > { %v1662_v30 = vadd.f32 %v1661_v10, %v1647_v22  ;;  %v4352_v8 = vpop.f32.mrf.mxu1 }
 0x161   : > { %v1619_v29 = vadd.f32 %v1595_v39, %v7160_v14  ;;  %v1806_v37 = vpop.f32.mrf.mxu0  ;;  %v1912_v53 = vadd.f32 %v4352_v8, %v4320_v27  ;;  %v1650_v59 = vmul.f32 %v1634_v50, %v7235_v18  ;;  %v1637_v58 = vmax.f32 %v1621_v45, 0.0 }
 0x162   : > { %v1663_v21 = vadd.f32 %v1662_v30, %v1648_v5  ;;  %v1903_v36 = vpop.f32.mrf.mxu1  ;;  %v1652_v5 = vmul.f32 %v1636_v1, %v7262_v23 }
 0x163   : > { %v1635_v55 = vmax.f32 %v1619_v29, 0.0  ;;  %v1904_v26 = vadd.f32 %v1903_v36, %v1806_v37  ;;  %v4321_v3 = vpop.f32.mrf.mxu0  ;;  %v1968_v19 = vadd.f32 %v1912_v53, %v6464_v62  ;;  %v1653_v29 = vmul.f32 %v1637_v58, %v7266_v52 }
 0x164   : > { %v1664_v15 = vadd.f32 %v1663_v21, %v1649_v44  ;;  %v4353_v40 = vpop.f32.mrf.mxu1 }
 0x165   : > { %v1651_v47 = vmul.f32 %v1635_v55, %v7254_v48  ;;  %v1966_v16 = vadd.f32 %v1904_v26, %v6449_v56  ;;  %v1915_v22 = vadd.f32 %v4353_v40, %v4321_v3  ;;  %v1809_v24 = vpop.f32.mrf.mxu0  ;;  %v1984_v21 = vmax.f32 %v1968_v19, 0.0 }
 0x166   : > { %v1665_v4 = vadd.f32 %v1664_v15, %v1650_v59  ;;  %v1906_v10 = vpop.f32.mrf.mxu1 }
 0x167   : > { %v1907_v28 = vadd.f32 %v1906_v10, %v1809_v24  ;;  %v4324_v63 = vpop.f32.mrf.mxu0  ;;  %v1982_v30 = vmax.f32 %v1966_v16, 0.0  ;;  %v1969_v2 = vadd.f32 %v1915_v22, %v6515_v61  ;;  %v2000_v10 = vmul.f32 %v1984_v21, %v6623_v33 }
 0x168   : > { %v1666_v39 = vadd.f32 %v1665_v4, %v1651_v47  ;;  %v4356_v27 = vpop.f32.mrf.mxu1 }
 0x169   : > { %v1967_v50 = vadd.f32 %v1907_v28, %v7839_v60  ;;  %v1822_v8 = vpop.f32.mrf.mxu0  ;;  %v1928_v26 = vadd.f32 %v4356_v27, %v4324_v63  ;;  %v1998_v59 = vmul.f32 %v1982_v30, %v6552_v11  ;;  %v1985_v15 = vmax.f32 %v1969_v2, 0.0 }
 0x16a   : > { %v1667_v37 = vadd.f32 %v1666_v39, %v1652_v5  ;;  %v1919_v44 = vpop.f32.mrf.mxu1 }
 0x16b   : > { %v1983_v45 = vmax.f32 %v1967_v50, 0.0  ;;  %v1920_v36 = vadd.f32 %v1919_v44, %v1822_v8  ;;  %v4325_v55 = vpop.f32.mrf.mxu0  ;;  %v1972_v39 = vadd.f32 %v1928_v26, %v6728_v46  ;;  %v2001_v2 = vmul.f32 %v1985_v15, %v6686_v42 }
 0x16c   : > { %v1668_v53 = vadd.f32 %v1667_v37, %v1653_v29  ;;  %v4357_v3 = vpop.f32.mrf.mxu1  ;;  %v4686_v1 = vpop.eup %4685 }
 0x16d   : > { %v1999_v40 = vmul.f32 %v1983_v45, %v6568_v34  ;;  %v1970_v47 = vadd.f32 %v1920_v36, %v6600_v17  ;;  %v1825_v16 = vpop.f32.mrf.mxu0  ;;  %v1319_v22 = vadd.f32 1.0, %v4686_v1  ;;  %v1931_v4 = vadd.f32 %v4357_v3, %v4325_v55 }
 0x16e   : > { %v1669_v24 = vrot.slane %v1668_v53, 4  ;;  %v1922_v58 = vpop.f32.mrf.mxu1  ;;  %v1988_v26 = vmax.f32 %v1972_v39, 0.0 }
 0x16f   : > { %v2014_v19 = vadd.f32 %v1999_v40, %v1998_v59  ;;  %v1986_v28 = vmax.f32 %v1970_v47, 0.0  ;;  %v4328_v5 = vpop.f32.mrf.mxu0  ;;  %4687 = vrcp.f32 %v1319_v22  ;;  %v1923_v27 = vadd.f32 %v1922_v58, %v1825_v16 }
 0x170   : > { %v1670_v63 = vadd.f32 %v1669_v24, %v1668_v53  ;;  %v4360_v30 = vpop.f32.mrf.mxu1  ;;  %v1973_v37 = vadd.f32 %v1931_v4, %v6793_v51 }
 0x171   : > { %v2015_v50 = vadd.f32 %v2014_v19, %v2000_v10  ;;  %v1838_v8 = vpop.f32.mrf.mxu0  ;;  %v1971_v44 = vadd.f32 %v1923_v27, %v6671_v41  ;;  %v2002_v21 = vmul.f32 %v1986_v28, %v6757_v54  ;;  %v1944_v55 = vadd.f32 %v4360_v30, %v4328_v5 }
 0x172   : > { %v1671_v29 = vrot.slane %v1670_v63, 2  ;;  %v1935_v45 = vpop.f32.mrf.mxu1  ;;  %v1989_v24 = vmax.f32 %v1973_v37, 0.0 }
 0x173   : > { %v2016_v36 = vadd.f32 %v2015_v50, %v2001_v2  ;;  %v1936_v3 = vadd.f32 %v1935_v45, %v1838_v8  ;;  %v4329_v53 = vpop.f32.mrf.mxu0  ;;  %v1987_v59 = vmax.f32 %v1971_v44, 0.0  ;;  %v1976_v19 = vadd.f32 %v1944_v55, %v6970_v49 }
 0x174   : > { %v1672_v1 = vadd.f32 %v1671_v29, %v1670_v63  ;;  %v4361_v40 = vpop.f32.mrf.mxu1  ;;  %v2004_v63 = vmul.f32 %v1988_v26, %v6885_v12  ;;  %v2005_v37 = vmul.f32 %v1989_v24, %v6938_v38 }
 0x175   : > { %v2017_v47 = vadd.f32 %v2016_v36, %v2002_v21  ;;  %v1974_v15 = vadd.f32 %v1936_v3, %v6859_v25  ;;  %v1841_v16 = vpop.f32.mrf.mxu0  ;;  %v2003_v4 = vmul.f32 %v1987_v59, %v6814_v57  ;;  %v1947_v58 = vadd.f32 %v4361_v40, %v4329_v53 }
 0x176   : > { %v1673_v22 = vrot.slane %v1672_v1, 1  ;;  %v1938_v10 = vpop.f32.mrf.mxu1  ;;  %v1992_v36 = vmax.f32 %v1976_v19, 0.0 }
 0x177   : > { %v1939_v28 = vadd.f32 %v1938_v10, %v1841_v16  ;;  %v4332_v5 = vpop.f32.mrf.mxu0  ;;  %v2018_v39 = vadd.f32 %v2017_v47, %v2003_v4  ;;  %v1990_v30 = vmax.f32 %v1974_v15, 0.0  ;;  %v1977_v45 = vadd.f32 %v1947_v58, %v7838_v35 }
 0x178   : > { %v1674_v27 = vadd.f32 %v1673_v22, %v1672_v1  ;;  %v4364_v2 = vpop.f32.mrf.mxu1 }
 0x179   : > { %v1975_v50 = vadd.f32 %v1939_v28, %v6919_v6  ;;  %v1854_v8 = vpop.f32.mrf.mxu0  ;;  %v2019_v44 = vadd.f32 %v2018_v39, %v2004_v63  ;;  %v2006_v26 = vmul.f32 %v1990_v30, %v6985_v20  ;;  %v1960_v40 = vadd.f32 %v4364_v2, %v4332_v5 }
 0x17a   : > { %v1675_v29 = vadd.f32 %v1674_v27, %v7291_v13  ;;  %v1951_v21 = vpop.f32.mrf.mxu1  ;;  %v1993_v10 = vmax.f32 %v1977_v45, 0.0  ;;  %v2008_v27 = vmul.f32 %v1992_v36, %v7111_v43 }
 0x17b   : > { %v1991_v55 = vmax.f32 %v1975_v50, 0.0  ;;  %v1952_v3 = vadd.f32 %v1951_v21, %v1854_v8  ;;  %v4333_v53 = vpop.f32.mrf.mxu0  ;;  %v2020_v59 = vadd.f32 %v2019_v44, %v2005_v37  ;;  %v1980_v5 = vadd.f32 %v1960_v40, %v7221_v31 }
 0x17c   : > { %v1676_v1 = vsub.f32 0.0, %v1675_v29  ;;  %v4365_v47 = vpop.f32.mrf.mxu1  ;;  %v4688_v15 = vpop.eup %4687  ;;  %v2009_v37 = vmul.f32 %v1993_v10, %v7184_v0 }
 0x17d   : > { %v2007_v16 = vmul.f32 %v1991_v55, %v7043_v9  ;;  %v1978_v22 = vadd.f32 %v1952_v3, %v7087_v7  ;;  %v1857_v24 = vpop.f32.mrf.mxu0  ;;  %v2021_v58 = vadd.f32 %v2020_v59, %v2006_v26  ;;  %v1963_v19 = vadd.f32 %v4365_v47, %v4333_v53  ;;  %1321 = vst [vmem:[%s7341_s29 + $0x1] sm:$0x1] %v4688_v15 }
 0x17e   : > { %v1677_v4 = vmul.f32 1.442695, %v1676_v1  ;;  %v1954_v28 = vpop.f32.mrf.mxu1  ;;  %v1996_v1 = vmax.f32 %v1980_v5, 0.0 }
 0x17f   : > { %v1955_v63 = vadd.f32 %v1954_v28, %v1857_v24  ;;  %v4384_v39 = vpop.f32.mrf.mxu0  ;;  %v2022_v30 = vadd.f32 %v2021_v58, %v2007_v16  ;;  %v1994_v2 = vmax.f32 %v1978_v22, 0.0  ;;  %v1981_v45 = vadd.f32 %v1963_v19, %v7247_v32 }
 0x180   : > { %4689 = vpow2.f32 %v1677_v4  ;;  %v4416_v50 = vpop.f32.mrf.mxu1 }
 0x181   : > { %v1979_v8 = vadd.f32 %v1955_v63, %v7160_v14  ;;  %v2166_v29 = vpop.f32.mrf.mxu0  ;;  %v2023_v44 = vadd.f32 %v2022_v30, %v2008_v27  ;;  %v2272_v3 = vadd.f32 %v4416_v50, %v4384_v39  ;;  %v2010_v26 = vmul.f32 %v1994_v2, %v7235_v18 }
 0x182   : > { %v2263_v21 = vpop.f32.mrf.mxu1  ;;  %v1997_v4 = vmax.f32 %v1981_v45, 0.0  ;;  %v2012_v27 = vmul.f32 %v1996_v1, %v7262_v23 }
 0x183   : > { %v1995_v55 = vmax.f32 %v1979_v8, 0.0  ;;  %v2264_v36 = vadd.f32 %v2263_v21, %v2166_v29  ;;  %v4385_v53 = vpop.f32.mrf.mxu0  ;;  %v2024_v59 = vadd.f32 %v2023_v44, %v2009_v37  ;;  %v2328_v10 = vadd.f32 %v2272_v3, %v6464_v62 }
 0x184   : > { %v4417_v40 = vpop.f32.mrf.mxu1  ;;  %v2013_v8 = vmul.f32 %v1997_v4, %v7266_v52 }
 0x185   : > { %v2011_v47 = vmul.f32 %v1995_v55, %v7254_v48  ;;  %v2326_v15 = vadd.f32 %v2264_v36, %v6449_v56  ;;  %v2275_v16 = vadd.f32 %v4417_v40, %v4385_v53  ;;  %v2169_v22 = vpop.f32.mrf.mxu0  ;;  %v2025_v24 = vadd.f32 %v2024_v59, %v2010_v26 }
 0x186   : > { %v2266_v58 = vpop.f32.mrf.mxu1  ;;  %v2344_v44 = vmax.f32 %v2328_v10, 0.0 }
 0x187   : > { %v2267_v19 = vadd.f32 %v2266_v58, %v2169_v22  ;;  %v4388_v28 = vpop.f32.mrf.mxu0  ;;  %v2026_v63 = vadd.f32 %v2025_v24, %v2011_v47  ;;  %v2342_v30 = vmax.f32 %v2326_v15, 0.0  ;;  %v2329_v5 = vadd.f32 %v2275_v16, %v6515_v61 }
 0x188   : > { %v4420_v39 = vpop.f32.mrf.mxu1  ;;  %v2360_v58 = vmul.f32 %v2344_v44, %v6623_v33 }
 0x189   : > { %v2327_v2 = vadd.f32 %v2267_v19, %v7839_v60  ;;  %v2182_v50 = vpop.f32.mrf.mxu0  ;;  %v2027_v29 = vadd.f32 %v2026_v63, %v2012_v27  ;;  %v2288_v36 = vadd.f32 %v4420_v39, %v4388_v28  ;;  %v2358_v26 = vmul.f32 %v2342_v30, %v6552_v11 }
 0x18a   : > { %v2279_v37 = vpop.f32.mrf.mxu1  ;;  %v2345_v59 = vmax.f32 %v2329_v5, 0.0 }
 0x18b   : > { %v2343_v45 = vmax.f32 %v2327_v2, 0.0  ;;  %v2280_v21 = vadd.f32 %v2279_v37, %v2182_v50  ;;  %v4389_v55 = vpop.f32.mrf.mxu0  ;;  %v2028_v3 = vadd.f32 %v2027_v29, %v2013_v8  ;;  %v2332_v63 = vadd.f32 %v2288_v36, %v6728_v46 }
 0x18c   : > { %v4421_v53 = vpop.f32.mrf.mxu1  ;;  %v2361_v5 = vmul.f32 %v2345_v59, %v6686_v42 }
 0x18d   : > { %v4690_v1 = vpop.eup %4689  ;;  %v2359_v40 = vmul.f32 %v2343_v45, %v6568_v34  ;;  %v2330_v47 = vadd.f32 %v2280_v21, %v6600_v17  ;;  %v2185_v15 = vpop.f32.mrf.mxu0  ;;  %v2029_v22 = vrot.slane %v2028_v3, 4  ;;  %v2291_v24 = vadd.f32 %v4421_v53, %v4389_v55 }
 0x18e   : > { %v1679_v16 = vadd.f32 1.0, %v4690_v1  ;;  %v2282_v4 = vpop.f32.mrf.mxu1  ;;  %v2348_v36 = vmax.f32 %v2332_v63, 0.0 }
 0x18f   : > { %v2374_v10 = vadd.f32 %v2359_v40, %v2358_v26  ;;  %v2346_v19 = vmax.f32 %v2330_v47, 0.0  ;;  %v4392_v27 = vpop.f32.mrf.mxu0  ;;  %v2030_v28 = vadd.f32 %v2029_v22, %v2028_v3  ;;  %v2283_v39 = vadd.f32 %v2282_v4, %v2185_v15 }
 0x190   : > { %4691 = vrcp.f32 %v1679_v16  ;;  %v4424_v30 = vpop.f32.mrf.mxu1  ;;  %v2333_v29 = vadd.f32 %v2291_v24, %v6793_v51 }
 0x191   : > { %v2375_v2 = vadd.f32 %v2374_v10, %v2360_v58  ;;  %v2198_v50 = vpop.f32.mrf.mxu0  ;;  %v2031_v8 = vrot.slane %v2030_v28, 2  ;;  %v2331_v37 = vadd.f32 %v2283_v39, %v6671_v41  ;;  %v2362_v44 = vmul.f32 %v2346_v19, %v6757_v54 }
 0x192   : > { %v2295_v45 = vpop.f32.mrf.mxu1  ;;  %v2304_v55 = vadd.f32 %v4424_v30, %v4392_v27  ;;  %v2349_v22 = vmax.f32 %v2333_v29, 0.0 }
 0x193   : > { %v2376_v21 = vadd.f32 %v2375_v2, %v2361_v5  ;;  %v2296_v53 = vadd.f32 %v2295_v45, %v2198_v50  ;;  %v4393_v3 = vpop.f32.mrf.mxu0  ;;  %v2032_v1 = vadd.f32 %v2031_v8, %v2030_v28  ;;  %v2347_v26 = vmax.f32 %v2331_v37, 0.0 }
 0x194   : > { %v4425_v40 = vpop.f32.mrf.mxu1  ;;  %v2336_v10 = vadd.f32 %v2304_v55, %v6970_v49  ;;  %v2364_v28 = vmul.f32 %v2348_v36, %v6885_v12  ;;  %v2365_v29 = vmul.f32 %v2349_v22, %v6938_v38 }
 0x195   : > { %v2377_v47 = vadd.f32 %v2376_v21, %v2362_v44  ;;  %v2334_v59 = vadd.f32 %v2296_v53, %v6859_v25  ;;  %v2201_v15 = vpop.f32.mrf.mxu0  ;;  %v2033_v16 = vrot.slane %v2032_v1, 1  ;;  %v2363_v24 = vmul.f32 %v2347_v26, %v6814_v57 }
 0x196   : > { %v2307_v4 = vadd.f32 %v4425_v40, %v4393_v3  ;;  %v2298_v58 = vpop.f32.mrf.mxu1  ;;  %v2352_v21 = vmax.f32 %v2336_v10, 0.0 }
 0x197   : > { %v2299_v19 = vadd.f32 %v2298_v58, %v2201_v15  ;;  %v4396_v27 = vpop.f32.mrf.mxu0  ;;  %v2034_v39 = vadd.f32 %v2033_v16, %v2032_v1  ;;  %v2378_v63 = vadd.f32 %v2377_v47, %v2363_v24  ;;  %v2350_v30 = vmax.f32 %v2334_v59, 0.0 }
 0x198   : > { %v4428_v5 = vpop.f32.mrf.mxu1  ;;  %v2337_v45 = vadd.f32 %v2307_v4, %v7838_v35 }
 0x199   : > { %v2335_v2 = vadd.f32 %v2299_v19, %v6919_v6  ;;  %v2214_v50 = vpop.f32.mrf.mxu0  ;;  %v2035_v8 = vadd.f32 %v2034_v39, %v7291_v13  ;;  %v2379_v37 = vadd.f32 %v2378_v63, %v2364_v28  ;;  %v2366_v36 = vmul.f32 %v2350_v30, %v6985_v20 }
 0x19a   : > { %v2311_v44 = vpop.f32.mrf.mxu1  ;;  %v2320_v40 = vadd.f32 %v4428_v5, %v4396_v27  ;;  %v2353_v58 = vmax.f32 %v2337_v45, 0.0  ;;  %v2368_v39 = vmul.f32 %v2352_v21, %v7111_v43 }
 0x19b   : > { %v2351_v55 = vmax.f32 %v2335_v2, 0.0  ;;  %v2312_v53 = vadd.f32 %v2311_v44, %v2214_v50  ;;  %v4397_v3 = vpop.f32.mrf.mxu0  ;;  %v2036_v1 = vsub.f32 0.0, %v2035_v8  ;;  %v2380_v26 = vadd.f32 %v2379_v37, %v2365_v29 }
 0x19c   : > { %v4429_v47 = vpop.f32.mrf.mxu1  ;;  %v2340_v27 = vadd.f32 %v2320_v40, %v7221_v31  ;;  %v2369_v29 = vmul.f32 %v2353_v58, %v7184_v0 }
 0x19d   : > { %v4692_v59 = vpop.eup %4691  ;;  %v2367_v15 = vmul.f32 %v2351_v55, %v7043_v9  ;;  %v2338_v16 = vadd.f32 %v2312_v53, %v7087_v7  ;;  %v2217_v22 = vpop.f32.mrf.mxu0  ;;  %v2037_v24 = vmul.f32 1.442695, %v2036_v1  ;;  %v2381_v4 = vadd.f32 %v2380_v26, %v2366_v36 }
 0x19e   : > { %v2323_v10 = vadd.f32 %v4429_v47, %v4397_v3  ;;  %v2314_v19 = vpop.f32.mrf.mxu1  ;;  %1681 = vst [vmem:[%s7341_s29 + $0x2] sm:$0x1] %v4692_v59  ;;  %v2356_v1 = vmax.f32 %v2340_v27, 0.0 }
 0x19f   : > { %v2315_v28 = vadd.f32 %v2314_v19, %v2217_v22  ;;  %v4448_v63 = vpop.f32.mrf.mxu0  ;;  %4693 = vpow2.f32 %v2037_v24  ;;  %v2382_v30 = vadd.f32 %v2381_v4, %v2367_v15  ;;  %v2354_v5 = vmax.f32 %v2338_v16, 0.0 }
 0x1a0   : > { %v4480_v2 = vpop.f32.mrf.mxu1  ;;  %v2341_v45 = vadd.f32 %v2323_v10, %v7247_v32 }
 0x1a1   : > { %v2339_v50 = vadd.f32 %v2315_v28, %v7160_v14  ;;  %v2526_v8 = vpop.f32.mrf.mxu0  ;;  %v2383_v37 = vadd.f32 %v2382_v30, %v2368_v39  ;;  %v2632_v53 = vadd.f32 %v4480_v2, %v4448_v63  ;;  %v2370_v36 = vmul.f32 %v2354_v5, %v7235_v18 }
 0x1a2   : > { %v2623_v44 = vpop.f32.mrf.mxu1  ;;  %v2357_v24 = vmax.f32 %v2341_v45, 0.0  ;;  %v2372_v39 = vmul.f32 %v2356_v1, %v7262_v23 }
 0x1a3   : > { %v2355_v55 = vmax.f32 %v2339_v50, 0.0  ;;  %v2624_v21 = vadd.f32 %v2623_v44, %v2526_v8  ;;  %v4449_v3 = vpop.f32.mrf.mxu0  ;;  %v2384_v26 = vadd.f32 %v2383_v37, %v2369_v29  ;;  %v2688_v58 = vadd.f32 %v2632_v53, %v6464_v62 }
 0x1a4   : > { %v4481_v40 = vpop.f32.mrf.mxu1  ;;  %v2373_v50 = vmul.f32 %v2357_v24, %v7266_v52 }
 0x1a5   : > { %v2371_v47 = vmul.f32 %v2355_v55, %v7254_v48  ;;  %v2686_v59 = vadd.f32 %v2624_v21, %v6449_v56  ;;  %v2635_v15 = vadd.f32 %v4481_v40, %v4449_v3  ;;  %v2529_v16 = vpop.f32.mrf.mxu0  ;;  %v2385_v22 = vadd.f32 %v2384_v26, %v2370_v36 }
 0x1a6   : > { %v2626_v4 = vpop.f32.mrf.mxu1  ;;  %v2704_v37 = vmax.f32 %v2688_v58, 0.0 }
 0x1a7   : > { %v2627_v10 = vadd.f32 %v2626_v4, %v2529_v16  ;;  %v4452_v19 = vpop.f32.mrf.mxu0  ;;  %v2386_v28 = vadd.f32 %v2385_v22, %v2371_v47  ;;  %v2702_v30 = vmax.f32 %v2686_v59, 0.0  ;;  %v2689_v27 = vadd.f32 %v2635_v15, %v6515_v61 }
 0x1a8   : > { %v4484_v63 = vpop.f32.mrf.mxu1  ;;  %v2720_v4 = vmul.f32 %v2704_v37, %v6623_v33 }
 0x1a9   : > { %v2687_v5 = vadd.f32 %v2627_v10, %v7839_v60  ;;  %v2542_v2 = vpop.f32.mrf.mxu0  ;;  %v2387_v8 = vadd.f32 %v2386_v28, %v2372_v39  ;;  %v2648_v21 = vadd.f32 %v4484_v63, %v4452_v19  ;;  %v2718_v36 = vmul.f32 %v2702_v30, %v6552_v11 }
 0x1aa   : > { %v2639_v29 = vpop.f32.mrf.mxu1  ;;  %v2705_v26 = vmax.f32 %v2689_v27, 0.0 }
 0x1ab   : > { %v2703_v45 = vmax.f32 %v2687_v5, 0.0  ;;  %v2640_v44 = vadd.f32 %v2639_v29, %v2542_v2  ;;  %v4453_v55 = vpop.f32.mrf.mxu0  ;;  %v2388_v53 = vadd.f32 %v2387_v8, %v2373_v50  ;;  %v2692_v28 = vadd.f32 %v2648_v21, %v6728_v46 }
 0x1ac   : > { %v4485_v3 = vpop.f32.mrf.mxu1  ;;  %v4694_v1 = vpop.eup %4693  ;;  %v2721_v27 = vmul.f32 %v2705_v26, %v6686_v42 }
 0x1ad   : > { %v2719_v40 = vmul.f32 %v2703_v45, %v6568_v34  ;;  %v2690_v47 = vadd.f32 %v2640_v44, %v6600_v17  ;;  %v2545_v59 = vpop.f32.mrf.mxu0  ;;  %v2039_v15 = vadd.f32 1.0, %v4694_v1  ;;  %v2389_v16 = vrot.slane %v2388_v53, 4 }
 0x1ae   : > { %v2651_v22 = vadd.f32 %v4485_v3, %v4453_v55  ;;  %v2642_v24 = vpop.f32.mrf.mxu1  ;;  %v2708_v21 = vmax.f32 %v2692_v28, 0.0 }
 0x1af   : > { %v2734_v58 = vadd.f32 %v2719_v40, %v2718_v36  ;;  %v2706_v10 = vmax.f32 %v2690_v47, 0.0  ;;  %v4456_v39 = vpop.f32.mrf.mxu0  ;;  %4695 = vrcp.f32 %v2039_v15  ;;  %v2390_v19 = vadd.f32 %v2389_v16, %v2388_v53 }
 0x1b0   : > { %v2643_v63 = vadd.f32 %v2642_v24, %v2545_v59  ;;  %v4488_v30 = vpop.f32.mrf.mxu1  ;;  %v2693_v8 = vadd.f32 %v2651_v22, %v6793_v51 }
 0x1b1   : > { %v2735_v5 = vadd.f32 %v2734_v58, %v2720_v4  ;;  %v2558_v2 = vpop.f32.mrf.mxu0  ;;  %v2391_v50 = vrot.slane %v2390_v19, 2  ;;  %v2722_v37 = vmul.f32 %v2706_v10, %v6757_v54  ;;  %v2664_v55 = vadd.f32 %v4488_v30, %v4456_v39 }
 0x1b2   : > { %v2691_v29 = vadd.f32 %v2643_v63, %v6671_v41  ;;  %v2655_v45 = vpop.f32.mrf.mxu1  ;;  %v2709_v16 = vmax.f32 %v2693_v8, 0.0 }
 0x1b3   : > { %v2736_v44 = vadd.f32 %v2735_v5, %v2721_v27  ;;  %v2656_v3 = vadd.f32 %v2655_v45, %v2558_v2  ;;  %v4457_v53 = vpop.f32.mrf.mxu0  ;;  %v2392_v1 = vadd.f32 %v2391_v50, %v2390_v19  ;;  %v2696_v58 = vadd.f32 %v2664_v55, %v6970_v49 }
 0x1b4   : > { %v2707_v36 = vmax.f32 %v2691_v29, 0.0  ;;  %v4489_v40 = vpop.f32.mrf.mxu1  ;;  %v2724_v19 = vmul.f32 %v2708_v21, %v6885_v12  ;;  %v2725_v8 = vmul.f32 %v2709_v16, %v6938_v38 }
 0x1b5   : > { %v2737_v47 = vadd.f32 %v2736_v44, %v2722_v37  ;;  %v2694_v26 = vadd.f32 %v2656_v3, %v6859_v25  ;;  %v2561_v59 = vpop.f32.mrf.mxu0  ;;  %v2393_v15 = vrot.slane %v2392_v1, 1  ;;  %v2667_v24 = vadd.f32 %v4489_v40, %v4457_v53 }
 0x1b6   : > { %v2723_v22 = vmul.f32 %v2707_v36, %v6814_v57  ;;  %v2658_v4 = vpop.f32.mrf.mxu1  ;;  %v2712_v44 = vmax.f32 %v2696_v58, 0.0 }
 0x1b7   : > { %v2659_v10 = vadd.f32 %v2658_v4, %v2561_v59  ;;  %v4460_v39 = vpop.f32.mrf.mxu0  ;;  %v2394_v63 = vadd.f32 %v2393_v15, %v2392_v1  ;;  %v2710_v30 = vmax.f32 %v2694_v26, 0.0  ;;  %v2697_v45 = vadd.f32 %v2667_v24, %v7838_v35 }
 0x1b8   : > { %v2738_v28 = vadd.f32 %v2737_v47, %v2723_v22  ;;  %v4492_v27 = vpop.f32.mrf.mxu1 }
 0x1b9   : > { %v2695_v5 = vadd.f32 %v2659_v10, %v6919_v6  ;;  %v2574_v2 = vpop.f32.mrf.mxu0  ;;  %v2395_v50 = vadd.f32 %v2394_v63, %v7291_v13  ;;  %v2726_v21 = vmul.f32 %v2710_v30, %v6985_v20  ;;  %v2680_v40 = vadd.f32 %v4492_v27, %v4460_v39 }
 0x1ba   : > { %v2739_v29 = vadd.f32 %v2738_v28, %v2724_v19  ;;  %v2671_v37 = vpop.f32.mrf.mxu1  ;;  %v2713_v4 = vmax.f32 %v2697_v45, 0.0  ;;  %v2728_v63 = vmul.f32 %v2712_v44, %v7111_v43 }
 0x1bb   : > { %v2711_v55 = vmax.f32 %v2695_v5, 0.0  ;;  %v2672_v3 = vadd.f32 %v2671_v37, %v2574_v2  ;;  %v4461_v53 = vpop.f32.mrf.mxu0  ;;  %v2396_v1 = vsub.f32 0.0, %v2395_v50  ;;  %v2700_v39 = vadd.f32 %v2680_v40, %v7221_v31 }
 0x1bc   : > { %v2740_v36 = vadd.f32 %v2739_v29, %v2725_v8  ;;  %v4493_v47 = vpop.f32.mrf.mxu1  ;;  %v4696_v26 = vpop.eup %4695  ;;  %v2729_v8 = vmul.f32 %v2713_v4, %v7184_v0 }
 0x1bd   : > { %v2727_v59 = vmul.f32 %v2711_v55, %v7043_v9  ;;  %v2698_v15 = vadd.f32 %v2672_v3, %v7087_v7  ;;  %v2577_v16 = vpop.f32.mrf.mxu0  ;;  %v2397_v22 = vmul.f32 1.442695, %v2396_v1  ;;  %v2683_v58 = vadd.f32 %v4493_v47, %v4461_v53  ;;  %2041 = vst [vmem:[%s7341_s29 + $0x3] sm:$0x1] %v4696_v26 }
 0x1be   : > { %v2741_v24 = vadd.f32 %v2740_v36, %v2726_v21  ;;  %v2674_v10 = vpop.f32.mrf.mxu1  ;;  %v2716_v1 = vmax.f32 %v2700_v39, 0.0 }
 0x1bf   : > { %v2675_v19 = vadd.f32 %v2674_v10, %v2577_v16  ;;  %v4512_v28 = vpop.f32.mrf.mxu0  ;;  %4697 = vpow2.f32 %v2397_v22  ;;  %v2714_v27 = vmax.f32 %v2698_v15, 0.0  ;;  %v2701_v45 = vadd.f32 %v2683_v58, %v7247_v32 }
 0x1c0   : > { %v2742_v30 = vadd.f32 %v2741_v24, %v2727_v59  ;;  %v4544_v5 = vpop.f32.mrf.mxu1 }
 0x1c1   : > { %v2699_v2 = vadd.f32 %v2675_v19, %v7160_v14  ;;  %v2886_v50 = vpop.f32.mrf.mxu0  ;;  %v2992_v3 = vadd.f32 %v4544_v5, %v4512_v28  ;;  %v2730_v21 = vmul.f32 %v2714_v27, %v7235_v18  ;;  %v2717_v22 = vmax.f32 %v2701_v45, 0.0 }
 0x1c2   : > { %v2743_v29 = vadd.f32 %v2742_v30, %v2728_v63  ;;  %v2983_v37 = vpop.f32.mrf.mxu1  ;;  %v2732_v63 = vmul.f32 %v2716_v1, %v7262_v23 }
 0x1c3   : > { %v2715_v55 = vmax.f32 %v2699_v2, 0.0  ;;  %v2984_v44 = vadd.f32 %v2983_v37, %v2886_v50  ;;  %v4513_v53 = vpop.f32.mrf.mxu0  ;;  %v3048_v4 = vadd.f32 %v2992_v3, %v6464_v62  ;;  %v2733_v2 = vmul.f32 %v2717_v22, %v7266_v52 }
 0x1c4   : > { %v2744_v36 = vadd.f32 %v2743_v29, %v2729_v8  ;;  %v4545_v40 = vpop.f32.mrf.mxu1 }
 0x1c5   : > { %v2731_v47 = vmul.f32 %v2715_v55, %v7254_v48  ;;  %v3046_v26 = vadd.f32 %v2984_v44, %v6449_v56  ;;  %v2995_v59 = vadd.f32 %v4545_v40, %v4513_v53  ;;  %v2889_v15 = vpop.f32.mrf.mxu0  ;;  %v3064_v29 = vmax.f32 %v3048_v4, 0.0 }
 0x1c6   : > { %v2745_v16 = vadd.f32 %v2744_v36, %v2730_v21  ;;  %v2986_v24 = vpop.f32.mrf.mxu1 }
 0x1c7   : > { %v2987_v58 = vadd.f32 %v2986_v24, %v2889_v15  ;;  %v4516_v10 = vpop.f32.mrf.mxu0  ;;  %v3062_v30 = vmax.f32 %v3046_v26, 0.0  ;;  %v3049_v39 = vadd.f32 %v2995_v59, %v6515_v61  ;;  %v3080_v24 = vmul.f32 %v3064_v29, %v6623_v33 }
 0x1c8   : > { %v2746_v19 = vadd.f32 %v2745_v16, %v2731_v47  ;;  %v4548_v28 = vpop.f32.mrf.mxu1 }
 0x1c9   : > { %v3047_v27 = vadd.f32 %v2987_v58, %v7839_v60  ;;  %v2902_v5 = vpop.f32.mrf.mxu0  ;;  %v3008_v44 = vadd.f32 %v4548_v28, %v4516_v10  ;;  %v3078_v21 = vmul.f32 %v3062_v30, %v6552_v11  ;;  %v3065_v36 = vmax.f32 %v3049_v39, 0.0 }
 0x1ca   : > { %v2747_v50 = vadd.f32 %v2746_v19, %v2732_v63  ;;  %v2999_v8 = vpop.f32.mrf.mxu1 }
 0x1cb   : > { %v3063_v45 = vmax.f32 %v3047_v27, 0.0  ;;  %v3000_v37 = vadd.f32 %v2999_v8, %v2902_v5  ;;  %v4517_v55 = vpop.f32.mrf.mxu0  ;;  %v3052_v19 = vadd.f32 %v3008_v44, %v6728_v46  ;;  %v3081_v39 = vmul.f32 %v3065_v36, %v6686_v42 }
 0x1cc   : > { %v2748_v3 = vadd.f32 %v2747_v50, %v2733_v2  ;;  %v4549_v53 = vpop.f32.mrf.mxu1  ;;  %v4698_v1 = vpop.eup %4697 }
 0x1cd   : > { %v3079_v40 = vmul.f32 %v3063_v45, %v6568_v34  ;;  %v3050_v47 = vadd.f32 %v3000_v37, %v6600_v17  ;;  %v2905_v26 = vpop.f32.mrf.mxu0  ;;  %v2399_v59 = vadd.f32 1.0, %v4698_v1  ;;  %v3011_v16 = vadd.f32 %v4549_v53, %v4517_v55 }
 0x1ce   : > { %v2749_v15 = vrot.slane %v2748_v3, 4  ;;  %v3002_v22 = vpop.f32.mrf.mxu1  ;;  %v3068_v44 = vmax.f32 %v3052_v19, 0.0 }
 0x1cf   : > { %v3094_v4 = vadd.f32 %v3079_v40, %v3078_v21  ;;  %v3066_v58 = vmax.f32 %v3050_v47, 0.0  ;;  %v4520_v63 = vpop.f32.mrf.mxu0  ;;  %4699 = vrcp.f32 %v2399_v59  ;;  %v3003_v28 = vadd.f32 %v3002_v22, %v2905_v26 }
 0x1d0   : > { %v2750_v10 = vadd.f32 %v2749_v15, %v2748_v3  ;;  %v4552_v30 = vpop.f32.mrf.mxu1  ;;  %v3053_v50 = vadd.f32 %v3011_v16, %v6793_v51 }
 0x1d1   : > { %v3095_v27 = vadd.f32 %v3094_v4, %v3080_v24  ;;  %v2918_v5 = vpop.f32.mrf.mxu0  ;;  %v3051_v8 = vadd.f32 %v3003_v28, %v6671_v41  ;;  %v3082_v29 = vmul.f32 %v3066_v58, %v6757_v54  ;;  %v3024_v55 = vadd.f32 %v4552_v30, %v4520_v63 }
 0x1d2   : > { %v2751_v2 = vrot.slane %v2750_v10, 2  ;;  %v3015_v45 = vpop.f32.mrf.mxu1  ;;  %v3069_v15 = vmax.f32 %v3053_v50, 0.0 }
 0x1d3   : > { %v3096_v37 = vadd.f32 %v3095_v27, %v3081_v39  ;;  %v3016_v53 = vadd.f32 %v3015_v45, %v2918_v5  ;;  %v4521_v3 = vpop.f32.mrf.mxu0  ;;  %v3067_v21 = vmax.f32 %v3051_v8, 0.0  ;;  %v3056_v4 = vadd.f32 %v3024_v55, %v6970_v49 }
 0x1d4   : > { %v2752_v1 = vadd.f32 %v2751_v2, %v2750_v10  ;;  %v4553_v40 = vpop.f32.mrf.mxu1  ;;  %v3084_v10 = vmul.f32 %v3068_v44, %v6885_v12  ;;  %v3085_v50 = vmul.f32 %v3069_v15, %v6938_v38 }
 0x1d5   : > { %v3097_v47 = vadd.f32 %v3096_v37, %v3082_v29  ;;  %v3054_v36 = vadd.f32 %v3016_v53, %v6859_v25  ;;  %v2921_v26 = vpop.f32.mrf.mxu0  ;;  %v3083_v16 = vmul.f32 %v3067_v21, %v6814_v57  ;;  %v3027_v22 = vadd.f32 %v4553_v40, %v4521_v3 }
 0x1d6   : > { %v2753_v59 = vrot.slane %v2752_v1, 1  ;;  %v3018_v24 = vpop.f32.mrf.mxu1  ;;  %v3072_v37 = vmax.f32 %v3056_v4, 0.0 }
 0x1d7   : > { %v3019_v58 = vadd.f32 %v3018_v24, %v2921_v26  ;;  %v4524_v63 = vpop.f32.mrf.mxu0  ;;  %v3098_v19 = vadd.f32 %v3097_v47, %v3083_v16  ;;  %v3070_v30 = vmax.f32 %v3054_v36, 0.0  ;;  %v3057_v45 = vadd.f32 %v3027_v22, %v7838_v35 }
 0x1d8   : > { %v2754_v28 = vadd.f32 %v2753_v59, %v2752_v1  ;;  %v4556_v39 = vpop.f32.mrf.mxu1 }
 0x1d9   : > { %v3055_v27 = vadd.f32 %v3019_v58, %v6919_v6  ;;  %v2934_v5 = vpop.f32.mrf.mxu0  ;;  %v3099_v8 = vadd.f32 %v3098_v19, %v3084_v10  ;;  %v3086_v44 = vmul.f32 %v3070_v30, %v6985_v20  ;;  %v3040_v40 = vadd.f32 %v4556_v39, %v4524_v63 }
 0x1da   : > { %v2755_v2 = vadd.f32 %v2754_v28, %v7291_v13  ;;  %v3031_v29 = vpop.f32.mrf.mxu1  ;;  %v3073_v24 = vmax.f32 %v3057_v45, 0.0  ;;  %v3088_v28 = vmul.f32 %v3072_v37, %v7111_v43 }
 0x1db   : > { %v3071_v55 = vmax.f32 %v3055_v27, 0.0  ;;  %v3032_v53 = vadd.f32 %v3031_v29, %v2934_v5  ;;  %v4525_v3 = vpop.f32.mrf.mxu0  ;;  %v3100_v21 = vadd.f32 %v3099_v8, %v3085_v50  ;;  %v3060_v63 = vadd.f32 %v3040_v40, %v7221_v31 }
 0x1dc   : > { %v2756_v1 = vsub.f32 0.0, %v2755_v2  ;;  %v4557_v47 = vpop.f32.mrf.mxu1  ;;  %v4700_v36 = vpop.eup %4699  ;;  %v3089_v50 = vmul.f32 %v3073_v24, %v7184_v0 }
 0x1dd   : > { %v3087_v26 = vmul.f32 %v3071_v55, %v7043_v9  ;;  %v3058_v59 = vadd.f32 %v3032_v53, %v7087_v7  ;;  %v2937_v15 = vpop.f32.mrf.mxu0  ;;  %v3101_v22 = vadd.f32 %v3100_v21, %v3086_v44  ;;  %v3043_v4 = vadd.f32 %v4557_v47, %v4525_v3  ;;  %2401 = vst [vmem:[%s7341_s29 + $0x4] sm:$0x1] %v4700_v36 }
 0x1de   : > { %v2757_v16 = vmul.f32 1.442695, %v2756_v1  ;;  %v3034_v58 = vpop.f32.mrf.mxu1  ;;  %v3076_v1 = vmax.f32 %v3060_v63, 0.0 }
 0x1df   : > { %v3035_v10 = vadd.f32 %v3034_v58, %v2937_v15  ;;  %v4576_v19 = vpop.f32.mrf.mxu0  ;;  %v3102_v30 = vadd.f32 %v3101_v22, %v3087_v26  ;;  %v3074_v39 = vmax.f32 %v3058_v59, 0.0  ;;  %v3061_v45 = vadd.f32 %v3043_v4, %v7247_v32 }
 0x1e0   : > { %4701 = vpow2.f32 %v2757_v16  ;;  %v4608_v27 = vpop.f32.mrf.mxu1 }
 0x1e1   : > { %v3059_v5 = vadd.f32 %v3035_v10, %v7160_v14  ;;  %v3246_v2 = vpop.f32.mrf.mxu0  ;;  %v3103_v8 = vadd.f32 %v3102_v30, %v3088_v28  ;;  %v3352_v53 = vadd.f32 %v4608_v27, %v4576_v19  ;;  %v3090_v44 = vmul.f32 %v3074_v39, %v7235_v18 }
 0x1e2   : > { %v3343_v29 = vpop.f32.mrf.mxu1  ;;  %v3077_v16 = vmax.f32 %v3061_v45, 0.0  ;;  %v3092_v28 = vmul.f32 %v3076_v1, %v7262_v23 }
 0x1e3   : > { %v3075_v55 = vmax.f32 %v3059_v5, 0.0  ;;  %v3344_v37 = vadd.f32 %v3343_v29, %v3246_v2  ;;  %v4577_v3 = vpop.f32.mrf.mxu0  ;;  %v3104_v21 = vadd.f32 %v3103_v8, %v3089_v50  ;;  %v3408_v24 = vadd.f32 %v3352_v53, %v6464_v62 }
 0x1e4   : > { %v4609_v40 = vpop.f32.mrf.mxu1 }
 0x1e5   : > { %v3091_v47 = vmul.f32 %v3075_v55, %v7254_v48  ;;  %v3406_v36 = vadd.f32 %v3344_v37, %v6449_v56  ;;  %v3355_v26 = vadd.f32 %v4609_v40, %v4577_v3  ;;  %v3249_v59 = vpop.f32.mrf.mxu0  ;;  %v3105_v15 = vadd.f32 %v3104_v21, %v3090_v44 }
 0x1e6   : > { %v3346_v22 = vpop.f32.mrf.mxu1  ;;  %v3093_v56 = vmul.f32 %v3077_v16, %v7266_v52  ;;  %v3424_v50 = vmax.f32 %v3408_v24, 0.0 }
 0x1e7   : > { %v3347_v4 = vadd.f32 %v3346_v22, %v3249_v59  ;;  %v4580_v58 = vpop.f32.mrf.mxu0  ;;  %v3106_v10 = vadd.f32 %v3105_v15, %v3091_v47  ;;  %v3422_v30 = vmax.f32 %v3406_v36, 0.0  ;;  %v3409_v63 = vadd.f32 %v3355_v26, %v6515_v61 }
 0x1e8   : > { %v4612_v19 = vpop.f32.mrf.mxu1  ;;  %v3440_v26 = vmul.f32 %v3424_v50, %v6623_v33 }
 0x1e9   : > { %v3407_v39 = vadd.f32 %v3347_v4, %v7839_v60  ;;  %v3262_v27 = vpop.f32.mrf.mxu0  ;;  %v3107_v5 = vadd.f32 %v3106_v10, %v3092_v28  ;;  %v3368_v55 = vadd.f32 %v4612_v19, %v4580_v58  ;;  %v3438_v3 = vmul.f32 %v3422_v30, %v6552_v11 }
 0x1ea   : > { %v3359_v2 = vpop.f32.mrf.mxu1  ;;  %v3425_v1 = vmax.f32 %v3409_v63, 0.0 }
 0x1eb   : > { %v3423_v8 = vmax.f32 %v3407_v39, 0.0  ;;  %v3360_v45 = vadd.f32 %v3359_v2, %v3262_v27  ;;  %v4581_v62 = vpop.f32.mrf.mxu0  ;;  %v3108_v29 = vadd.f32 %v3107_v5, %v3093_v56  ;;  %v3412_v24 = vadd.f32 %v3368_v55, %v6728_v46 }
 0x1ec   : > { %v4613_v53 = vpop.f32.mrf.mxu1 }
 0x1ed   : > { %v4702_v37 = vpop.eup %4701  ;;  %v3439_v61 = vmul.f32 %v3423_v8, %v6568_v34  ;;  %v3410_v60 = vadd.f32 %v3360_v45, %v6600_v17  ;;  %v3265_v44 = vpop.f32.mrf.mxu0  ;;  %v3109_v40 = vrot.slane %v3108_v29, 4  ;;  %v3371_v47 = vadd.f32 %v4613_v53, %v4581_v62 }
 0x1ee   : > { %v2759_v21 = vadd.f32 1.0, %v4702_v37  ;;  %v3362_v36 = vpop.f32.mrf.mxu1  ;;  %v3441_v34 = vmul.f32 %v3425_v1, %v6686_v42  ;;  %v3428_v46 = vmax.f32 %v3412_v24, 0.0 }
 0x1ef   : > { %v3454_v59 = vadd.f32 %v3439_v61, %v3438_v3  ;;  %v3426_v15 = vmax.f32 %v3410_v60, 0.0  ;;  %v4584_v16 = vpop.f32.mrf.mxu0  ;;  %v3110_v22 = vadd.f32 %v3109_v40, %v3108_v29  ;;  %v3363_v11 = vadd.f32 %v3362_v36, %v3265_v44 }
 0x1f0   : > { %4703 = vrcp.f32 %v2759_v21  ;;  %v4616_v4 = vpop.f32.mrf.mxu1  ;;  %v3413_v10 = vadd.f32 %v3371_v47, %v6793_v51  ;;  %v3444_v1 = vmul.f32 %v3428_v46, %v6885_v12 }
 0x1f1   : > { %v3455_v58 = vadd.f32 %v3454_v59, %v3440_v26  ;;  %v3278_v17 = vpop.f32.mrf.mxu0  ;;  %v3111_v28 = vrot.slane %v3110_v22, 2  ;;  %v3411_v19 = vadd.f32 %v3363_v11, %v6671_v41  ;;  %v3442_v33 = vmul.f32 %v3426_v15, %v6757_v54 }
 0x1f2   : > { %v3375_v30 = vpop.f32.mrf.mxu1  ;;  %v3384_v39 = vadd.f32 %v4616_v4, %v4584_v16  ;;  %v3429_v29 = vmax.f32 %v3413_v10, 0.0 }
 0x1f3   : > { %v3456_v63 = vadd.f32 %v3455_v58, %v3441_v34  ;;  %v3376_v27 = vadd.f32 %v3375_v30, %v3278_v17  ;;  %v4585_v56 = vpop.f32.mrf.mxu0  ;;  %v3112_v5 = vadd.f32 %v3111_v28, %v3110_v22  ;;  %v3427_v2 = vmax.f32 %v3411_v19, 0.0 }
 0x1f4   : > { %v4617_v50 = vpop.f32.mrf.mxu1  ;;  %v3416_v54 = vadd.f32 %v3384_v39, %v6970_v49  ;;  %v3445_v47 = vmul.f32 %v3429_v29, %v6938_v38 }
 0x1f5   : > { %v3457_v8 = vadd.f32 %v3456_v63, %v3442_v33  ;;  %v3414_v42 = vadd.f32 %v3376_v27, %v6859_v25  ;;  %v3281_v45 = vpop.f32.mrf.mxu0  ;;  %v3113_v62 = vrot.slane %v3112_v5, 1  ;;  %v3443_v51 = vmul.f32 %v3427_v2, %v6814_v57 }
 0x1f6   : > { %v3387_v41 = vadd.f32 %v4617_v50, %v4585_v56  ;;  %v3378_v55 = vpop.f32.mrf.mxu1  ;;  %v3432_v49 = vmax.f32 %v3416_v54, 0.0 }
 0x1f7   : > { %v3379_v53 = vadd.f32 %v3378_v55, %v3281_v45  ;;  %v4588_v37 = vpop.f32.mrf.mxu0  ;;  %v3114_v3 = vadd.f32 %v3113_v62, %v3112_v5  ;;  %v3458_v61 = vadd.f32 %v3457_v8, %v3443_v51  ;;  %v3430_v60 = vmax.f32 %v3414_v42, 0.0 }
 0x1f8   : > { %v4620_v44 = vpop.f32.mrf.mxu1  ;;  %v3417_v36 = vadd.f32 %v3387_v41, %v7838_v35  ;;  %v3448_v30 = vmul.f32 %v3432_v49, %v7111_v43 }
 0x1f9   : > { %v3415_v21 = vadd.f32 %v3379_v53, %v6919_v6  ;;  %v3294_v25 = vpop.f32.mrf.mxu0  ;;  %v3115_v40 = vadd.f32 %v3114_v3, %v7291_v13  ;;  %v3459_v57 = vadd.f32 %v3458_v61, %v3444_v1  ;;  %v3446_v22 = vmul.f32 %v3430_v60, %v6985_v20 }
 0x1fa   : > { %v3391_v26 = vpop.f32.mrf.mxu1  ;;  %v3400_v11 = vadd.f32 %v4620_v44, %v4588_v37  ;;  %v3433_v28 = vmax.f32 %v3417_v36, 0.0 }
 0x1fb   : > { %v3431_v59 = vmax.f32 %v3415_v21, 0.0  ;;  %v3392_v15 = vadd.f32 %v3391_v26, %v3294_v25  ;;  %v4589_v16 = vpop.f32.mrf.mxu0  ;;  %v3116_v12 = vsub.f32 0.0, %v3115_v40  ;;  %v3460_v24 = vadd.f32 %v3459_v57, %v3445_v47 }
 0x1fc   : > { %v4621_v6 = vpop.f32.mrf.mxu1  ;;  %v3420_v63 = vadd.f32 %v3400_v11, %v7221_v31 }
 0x1fd   : > { %v4704_v4 = vpop.eup %4703  ;;  %v3447_v34 = vmul.f32 %v3431_v59, %v7043_v9  ;;  %v3418_v38 = vadd.f32 %v3392_v15, %v7087_v7  ;;  %v3297_v58 = vpop.f32.mrf.mxu0  ;;  %v3117_v17 = vmul.f32 1.442695, %v3116_v12  ;;  %v3461_v35 = vadd.f32 %v3460_v24, %v3446_v22 }
 0x1fe   : > { %v3403_v10 = vadd.f32 %v4621_v6, %v4589_v16  ;;  %v3394_v19 = vpop.f32.mrf.mxu1  ;;  %2761 = vst [vmem:[%s7341_s29 + $0x5] sm:$0x1] %v4704_v4  ;;  %v3449_v9 = vmul.f32 %v3433_v28, %v7184_v0  ;;  %v3436_v46 = vmax.f32 %v3420_v63, 0.0 }
 0x1ff   : > { %v3395_v33 = vadd.f32 %v3394_v19, %v3297_v58  ;;  %4705 = vpow2.f32 %v3117_v17  ;;  %v3462_v20 = vadd.f32 %v3461_v35, %v3447_v34  ;;  %v3434_v39 = vmax.f32 %v3418_v38, 0.0 }
 0x200   : > { %v3421_v56 = vadd.f32 %v3403_v10, %v7247_v32  ;;  %v3452_v45 = vmul.f32 %v3436_v46, %v7262_v23 }
 0x201   : > { %v3419_v27 = vadd.f32 %v3395_v33, %v7160_v14  ;;  %v3463_v7 = vadd.f32 %v3462_v20, %v3448_v30  ;;  %v3450_v2 = vmul.f32 %v3434_v39, %v7235_v18 }
 0x202   : > { %v3437_v42 = vmax.f32 %v3421_v56, 0.0 }
 0x203   : > { %v3435_v5 = vmax.f32 %v3419_v27, 0.0  ;;  %v3464_v50 = vadd.f32 %v3463_v7, %v3449_v9 }
 0x204   : > { %v3453_v62 = vmul.f32 %v3437_v42, %v7266_v52 }
 0x205   : > { %v3451_v43 = vmul.f32 %v3435_v5, %v7254_v48  ;;  %v3465_v8 = vadd.f32 %v3464_v50, %v3450_v2 }
 0x207   : > { %v3466_v31 = vadd.f32 %v3465_v8, %v3451_v43 }
 0x209   : > { %v3467_v14 = vadd.f32 %v3466_v31, %v3452_v45 }
 0x20b   : > { %v3468_v0 = vadd.f32 %v3467_v14, %v3453_v62 }
 0x20c   : > { %v4706_v29 = vpop.eup %4705 }
 0x20d   : > { %v3119_v51 = vadd.f32 1.0, %v4706_v29  ;;  %v3469_v32 = vrot.slane %v3468_v0, 4 }
 0x20f   : > { %4707 = vrcp.f32 %v3119_v51  ;;  %v3470_v18 = vadd.f32 %v3469_v32, %v3468_v0 }
 0x211   : > { %v3471_v41 = vrot.slane %v3470_v18, 2 }
 0x213   : > { %v3472_v55 = vadd.f32 %v3471_v41, %v3470_v18 }
 0x215   : > { %v3473_v48 = vrot.slane %v3472_v55, 1 }
 0x217   : > { %v3474_v54 = vadd.f32 %v3473_v48, %v3472_v55 }
 0x219   : > { %v3475_v23 = vadd.f32 %v3474_v54, %v7291_v13 }
 0x21b   : > { %v3476_v53 = vsub.f32 0.0, %v3475_v23 }
 0x21c   : > { %v4708_v52 = vpop.eup %4707 }
 0x21d   : > { %v3477_v37 = vmul.f32 1.442695, %v3476_v53  ;;  %3121 = vst [vmem:[%s7341_s29 + $0x6] sm:$0x1] %v4708_v52 }
 0x21f   : > { %4709 = vpow2.f32 %v3477_v37 }
 0x22c   : > { %v4710_v3 = vpop.eup %4709 }
 0x22d   : > { %v3479_v1 = vadd.f32 1.0, %v4710_v3 }
 0x22f   : > { %4711 = vrcp.f32 %v3479_v1 }
 0x23c   : > { %v4712_v61 = vpop.eup %4711 }
 0x23d   : > { %3481 = vst [vmem:[%s7341_s29 + $0x7] sm:$0x1] %v4712_v61 }
 0x23e   : > { %4742 = shalt.err (!%p4739_p3)
}
 0x23f   : > { %s4743_s19 = scalar_lea.hbm %s7530_s13, 128  ;;  %s4747_s21 = scalar_lea.hbm %s7574_s6, 256 }
 0x240   : > { %p4744_p4 = scmp.ne.s32.totalorder %s7530_s13, %s4743_s19  ;;  %p4748_p9 = scmp.lt.s32.totalorder %s7530_s13, %s7574_s6 }
 0x241   : > { %p4749_p10 = scmp.lt.s32.totalorder %s4747_s21, %s4743_s19 }
 0x242   : > { %p4745_p7 = pnand %p4744_p4, %p4870_p5 }
 0x243   : > { %p4750_p11 = por %p4749_p10, %p4748_p9 }
 0x244   : > { %p4746_p8 = pneg %p4745_p7 }
 0x246   : > { %p4751_p12 = pnand %p4750_p11, %p4746_p8 }
 0x248   : > { %4754 = shalt.err (!%p4751_p12)
}
 0x249   : > { %4622 = dma.vmem_to_hbm [thread:$0]  (%p4870_p5), %s3497_s10, 128, %s7530_s13, %s3483_s14  }
 0x24a PF: > { %p4628_p13 = scmp.ge.s32.totalorder %s4789_s26, 2  ;;  %s3508_s29 = sand.u32 1, %s4777_s23  }
 0x24b   : > { %s3509_s30 = scalar_lea.sflag [#allocation4], %s3508_s29 }
 0x24c   : > { %p4625_p0 = pnand %p4628_p13, %p4874_p6 }
 0x24e   : > { %p4626_p1 = pneg %p4625_p0 }
 0x250   : > { %4772 = dma.done.wait (%p4626_p1), %s3509_s30, 128  }
 0x251   : > { %4774 = vsyncadd (%p4626_p1), %s3509_s30, 4294967168  ;;  %p18_p2 = scmp.ge.s32.totalorder %s4857_s28, 4   ;;  %s7840_s23 = smov %s4781_s24 }
 0x252   : > { %s7841_s24 = smov %s4785_s25  ;;  %s7842_s25 = smov %s4868_s7 }
 0x253   : > { %s7843_s26 = smov %s4857_s28  ;;  %20 = sbr.rel (!%p18_p2) target bundleno = 6 (0x6), region = 79 }
 0x258   :  { %3514 = vsyncpa [#allocation4], 1 }
 0x259   :  { %3516 = vsyncpa [#allocation4 + $0x1], 1 }

</bundles_post_ra>
